<compile_context>
chip_gen: v7x
topology: tpu7x:2x2x1
jax: 0.10.0
libtpu: 0.0.40
codegen_flags: <defaults>
</compile_context>

<pallas_src>
import functools

import jax
import jax.numpy as jnp
import numpy as np
from jax.experimental import pallas as pl
from jax.experimental.pallas import tpu as pltpu

EPS = 1e-5


def _self_attention_kernel(H, DK, DV,
                           x_ref, mask_ref, pair_ref, sc_ref,
                           gamma_ref, wsb_ref, bsb_ref,
                           wqkvg_ref, bqkvg_ref,
                           wt2_ref, wazc_ref, bazc_ref,
                           out_ref,
                           q_scr, k_scr, v_scr, gate_scr, acc_scr):
    h = pl.program_id(1)
    C = x_ref.shape[-1]
    HDK = H * DK
    HDV = H * DV

    # ---- stage (once per batch element): LN + adaptive LN + projections ----
    @pl.when(h == 0)
    def _stage():
        x = x_ref[0].astype(jnp.float32)        # (S, C)
        sc = sc_ref[0].astype(jnp.float32)      # (S, Cs)

        mu = jnp.mean(x, axis=-1, keepdims=True)
        xc = x - mu
        var = jnp.mean(xc * xc, axis=-1, keepdims=True)
        x_ln = xc * jax.lax.rsqrt(var + EPS)

        mus = jnp.mean(sc, axis=-1, keepdims=True)
        scc = sc - mus
        var_s = jnp.mean(scc * scc, axis=-1, keepdims=True)
        sc_ln = scc * jax.lax.rsqrt(var_s + EPS) * gamma_ref[...]

        # fused [scale | bias] projection of the normed single_cond
        sb = jnp.dot(sc_ln.astype(jnp.bfloat16), wsb_ref[...],
                     preferred_element_type=jnp.float32) + bsb_ref[...]
        x_ada = jax.nn.sigmoid(sb[:, :C]) * x_ln + sb[:, C:]        # (S, C) f32

        # fused [q | k | v | gate] projection (one wide bf16 MXU matmul)
        proj = jnp.dot(x_ada.astype(jnp.bfloat16), wqkvg_ref[...],
                       preferred_element_type=jnp.float32) + bqkvg_ref[...]
        q_b = (proj[:, :HDK] * (DK ** -0.5)).astype(jnp.bfloat16)   # scale folded
        k_b = proj[:, HDK:2 * HDK].astype(jnp.bfloat16)
        v_b = proj[:, 2 * HDK:2 * HDK + HDV].astype(jnp.bfloat16)
        gate_scr[...] = jax.nn.sigmoid(proj[:, 2 * HDK + HDV:])     # (S, H*DV) f32

        # stage per-head slabs head-major so the h-loop does leading-axis
        # dynamic indexing only (no dynamic lane slices).
        for hh in range(H):
            q_scr[hh] = q_b[:, hh * DK:(hh + 1) * DK]
            k_scr[hh] = k_b[:, hh * DK:(hh + 1) * DK]
            v_scr[hh] = v_b[:, hh * DV:(hh + 1) * DV]

    # ---- per-head attention core (every grid step) --------------------------
    mask = mask_ref[0].astype(jnp.float32)                           # (1, S)
    attn_bias = 1e9 * (mask - 1.0)

    q_h = q_scr[h]                                                   # (S, DK) bf16
    k_h = k_scr[h]
    v_h = v_scr[h]

    logits = jax.lax.dot_general(
        q_h, k_h, (((1,), (1,)), ((), ())),
        preferred_element_type=jnp.float32)                          # (S, S) f32
    logits = logits + attn_bias + pair_ref[0, 0].astype(jnp.float32)

    m = jnp.max(logits, axis=-1, keepdims=True)
    p = jnp.exp(logits - m)
    p = p * pl.reciprocal(jnp.sum(p, axis=-1, keepdims=True), approx=True)

    acc_scr[h] = jnp.dot(p.astype(jnp.bfloat16), v_h,
                         preferred_element_type=jnp.float32)         # (S, DV)

    # ---- finalize (last head): gate, transition2, AdaptiveZeroInit ----------
    @pl.when(h == H - 1)
    def _finalize():
        o_cat = jnp.concatenate([acc_scr[hh] for hh in range(H)], axis=-1)
        o_cat = o_cat * gate_scr[...]                                # (S, H*DV)
        out = jnp.dot(o_cat.astype(jnp.bfloat16), wt2_ref[...],
                      preferred_element_type=jnp.float32)            # (S, C)
        azc = jnp.dot(sc_ref[0].astype(jnp.bfloat16), wazc_ref[...],
                      preferred_element_type=jnp.float32) + bazc_ref[...]
        out_ref[0] = (jax.nn.sigmoid(azc) * out).astype(out_ref.dtype)


def self_attention(x, mask, pair_logits, single_cond, params, H, DK, DV):
    B, S, C = x.shape
    Cs = single_cond.shape[-1]
    HDK, HDV = H * DK, H * DV
    mask3 = mask.reshape(B, 1, S).astype(jnp.float32)

    bf = lambda a: a.astype(jnp.bfloat16)
    f32 = jnp.float32

    # Fused x-side projection [wq|wk|wv|w_gate] and bias [bq|0|0|0].
    w_qkvg = bf(jnp.concatenate(
        [params['wq'], params['wk'], params['wv'], params['w_gate']], axis=1))
    b_qkvg = jnp.concatenate(
        [params['bq'], jnp.zeros((1, HDK), f32), jnp.zeros((1, 2 * HDV), f32)],
        axis=1)

    # Fused single_cond-side projection [w_scale|w_bias], bias [b_scale|0].
    # (w_azc uses the *raw* single_cond, so it cannot be fused with these.)
    w_sb = bf(jnp.concatenate([params['w_scale'], params['w_bias']], axis=1))
    b_sb = jnp.concatenate([params['b_scale'], jnp.zeros((1, C), f32)], axis=1)

    wt2 = bf(params['w_t2'])
    wazc = bf(params['w_azc'])

    kernel = functools.partial(_self_attention_kernel, H, DK, DV)

    def batch_spec(shape):
        nd = len(shape)
        return pl.BlockSpec((1,) + shape, lambda b, h, _nd=nd: (b,) + (0,) * _nd)

    def full_spec(arr):
        nd = arr.ndim
        return pl.BlockSpec(arr.shape, lambda b, h, _nd=nd: (0,) * _nd)

    in_specs = [
        batch_spec((S, C)),                                     # x
        batch_spec((1, S)),                                     # mask
        pl.BlockSpec((1, 1, S, S), lambda b, h: (b, h, 0, 0)),  # pair (head-tiled)
        batch_spec((S, Cs)),                                    # single_cond
        full_spec(params['gamma_sc']),
        full_spec(w_sb),
        full_spec(b_sb),
        full_spec(w_qkvg),
        full_spec(b_qkvg),
        full_spec(wt2),
        full_spec(wazc),
        full_spec(params['b_azc']),
    ]

    return pl.pallas_call(
        kernel,
        out_shape=jax.ShapeDtypeStruct((B, S, C), x.dtype),
        grid_spec=pltpu.PrefetchScalarGridSpec(
            num_scalar_prefetch=0,
            grid=(B, H),
            in_specs=in_specs,
            out_specs=batch_spec((S, C)),
            scratch_shapes=[
                pltpu.VMEM((H, S, DK), jnp.bfloat16),   # q  (per-head slabs)
                pltpu.VMEM((H, S, DK), jnp.bfloat16),   # k
                pltpu.VMEM((H, S, DV), jnp.bfloat16),   # v
                pltpu.VMEM((S, H * DV), jnp.float32),   # sigmoid(gate)
                pltpu.VMEM((H, S, DV), jnp.float32),    # per-head attention out
            ]),
        compiler_params=pltpu.CompilerParams(
            dimension_semantics=("parallel", "arbitrary"),
            vmem_limit_bytes=32 * 1024 * 1024),
    )(x, mask3, pair_logits, single_cond,
      params['gamma_sc'], w_sb, b_sb, w_qkvg, b_qkvg,
      wt2, wazc, params['b_azc'])


def ref_self_attention(x, mask, pair_logits, single_cond, params, H, DK, DV):
    """Pure-JAX f32 reference mirroring the PyTorch forward."""
    B, S, C = x.shape
    mu = x.mean(-1, keepdims=True)
    xc = x - mu
    x_ln = xc / jnp.sqrt((xc ** 2).mean(-1, keepdims=True) + EPS)

    mus = single_cond.mean(-1, keepdims=True)
    scc = single_cond - mus
    sc_ln = (scc / jnp.sqrt((scc ** 2).mean(-1, keepdims=True) + EPS)
             * params['gamma_sc'][0])

    scale = sc_ln @ params['w_scale'] + params['b_scale'][0]
    bias_v = sc_ln @ params['w_bias']
    xa = jax.nn.sigmoid(scale) * x_ln + bias_v

    q = (xa @ params['wq']).reshape(B, S, H, DK) + params['bq'].reshape(1, 1, H, DK)
    k = (xa @ params['wk']).reshape(B, S, H, DK)
    v = (xa @ params['wv']).reshape(B, S, H, DV)

    bias = 1e9 * (mask.astype(jnp.float32) - 1.0)[:, None, None, :] + pair_logits
    logits = jnp.einsum('bqhd,bkhd->bhqk', q, k) * (DK ** -0.5) + bias
    p = jax.nn.softmax(logits, axis=-1)
    wa = jnp.einsum('bhqk,bkhd->bqhd', p, v).reshape(B, S, H * DV)
    wa = wa * jax.nn.sigmoid(xa @ params['w_gate'])

    out = wa @ params['w_t2']
    azc = single_cond @ params['w_azc'] + params['b_azc'][0]
    return jax.nn.sigmoid(azc) * out


def init_params(key, C, Cs, H, DK, DV):
    ks = jax.random.split(key, 12)

    def rnd(k, shape, s):
        return (s * jax.random.normal(k, shape)).astype(jnp.float32)

    return dict(
        gamma_sc=(1.0 + 0.1 * jax.random.normal(ks[0], (1, Cs))).astype(jnp.float32),
        w_scale=rnd(ks[1], (Cs, C), Cs ** -0.5),
        b_scale=rnd(ks[2], (1, C), 0.1),
        w_bias=rnd(ks[3], (Cs, C), Cs ** -0.5),
        wq=rnd(ks[4], (C, H * DK), C ** -0.5),
        bq=rnd(ks[5], (1, H * DK), 0.1),
        wk=rnd(ks[6], (C, H * DK), C ** -0.5),
        wv=rnd(ks[7], (C, H * DV), C ** -0.5),
        w_gate=rnd(ks[8], (C, H * DV), C ** -0.5),
        w_t2=rnd(ks[9], (H * DV, C), (H * DV) ** -0.5),
        w_azc=rnd(ks[10], (Cs, C), Cs ** -0.5),
        b_azc=rnd(ks[11], (1, C), 0.1),
    )


if __name__ == "__main__":
    # Small but lane-dense shapes: C = S = H*DK = H*DV = 128.
    B, S, C, Cs = 2, 128, 128, 128
    H = 4
    DK = C // H   # key_dim = num_channels -> key_dim_per_head
    DV = C // H   # value_dim = num_channels -> value_dim_per_head

    key = jax.random.PRNGKey(0)
    k1, k2, k3, k4, kp = jax.random.split(key, 5)

    x = jax.random.normal(k1, (B, S, C), jnp.float32)
    mask = (jax.random.uniform(k2, (B, S)) > 0.2).astype(jnp.float32)
    pair_logits = 0.5 * jax.random.normal(k3, (B, H, S, S), jnp.float32)
    single_cond = jax.random.normal(k4, (B, S, Cs), jnp.float32)
    params = init_params(kp, C, Cs, H, DK, DV)

    out = self_attention(x, mask, pair_logits, single_cond, params, H, DK, DV)
    out = jax.block_until_ready(out)

    ref = ref_self_attention(x, mask, pair_logits, single_cond, params, H, DK, DV)
    # Tolerance reflects bf16 MXU matmuls + approx reciprocal (LN/softmax are f32).
    np.testing.assert_allclose(np.asarray(out), np.asarray(ref),
                               rtol=2e-2, atol=2e-2)
    print("KERNEL_OK")
</pallas_src>

<mosaic_0001>
module attributes {stable_mosaic.version = 11 : i64} {
  func.func @_self_attention_kernel(%arg0: i32, %arg1: i32, %arg2: memref<1x128x128xf32, #tpu.memory_space<vmem>>, %arg3: memref<1x1x128xf32, #tpu.memory_space<vmem>>, %arg4: memref<1x1x128x128xf32, #tpu.memory_space<vmem>>, %arg5: memref<1x128x128xf32, #tpu.memory_space<vmem>>, %arg6: memref<1x128xf32, #tpu.memory_space<vmem>>, %arg7: memref<128x256xbf16, #tpu.memory_space<vmem>>, %arg8: memref<1x256xf32, #tpu.memory_space<vmem>>, %arg9: memref<128x512xbf16, #tpu.memory_space<vmem>>, %arg10: memref<1x512xf32, #tpu.memory_space<vmem>>, %arg11: memref<128x128xbf16, #tpu.memory_space<vmem>>, %arg12: memref<128x128xbf16, #tpu.memory_space<vmem>>, %arg13: memref<1x128xf32, #tpu.memory_space<vmem>>, %arg14: memref<1x128x128xf32, #tpu.memory_space<vmem>>, %arg15: memref<4x128x32xbf16, #tpu.memory_space<vmem>>, %arg16: memref<4x128x32xbf16, #tpu.memory_space<vmem>>, %arg17: memref<4x128x32xbf16, #tpu.memory_space<vmem>>, %arg18: memref<128x128xf32, #tpu.memory_space<vmem>>, %arg19: memref<4x128x32xf32, #tpu.memory_space<vmem>>) attributes {dimension_semantics = [#tpu.dimension_semantics<parallel>, #tpu.dimension_semantics<arbitrary>], iteration_bounds = array<i64: 2, 4>, scalar_prefetch = 0 : i64, scratch_operands = 5 : i64, tpu.core_type = #tpu.core_type<tc>, window_params = [{transform_indices = @transform_0, window_bounds = array<i64: 1, 128, 128>}, {transform_indices = @transform_1, window_bounds = array<i64: 1, 1, 128>}, {transform_indices = @transform_2, window_bounds = array<i64: 1, 1, 128, 128>}, {transform_indices = @transform_3, window_bounds = array<i64: 1, 128, 128>}, {pipeline_mode = #tpu.pipeline_mode<synchronous>, transform_indices = @transform_4, window_bounds = array<i64: 1, 128>}, {pipeline_mode = #tpu.pipeline_mode<synchronous>, transform_indices = @transform_5, window_bounds = array<i64: 128, 256>}, {pipeline_mode = #tpu.pipeline_mode<synchronous>, transform_indices = @transform_6, window_bounds = array<i64: 1, 256>}, {pipeline_mode = #tpu.pipeline_mode<synchronous>, transform_indices = @transform_7, window_bounds = array<i64: 128, 512>}, {pipeline_mode = #tpu.pipeline_mode<synchronous>, transform_indices = @transform_8, window_bounds = array<i64: 1, 512>}, {pipeline_mode = #tpu.pipeline_mode<synchronous>, transform_indices = @transform_9, window_bounds = array<i64: 128, 128>}, {pipeline_mode = #tpu.pipeline_mode<synchronous>, transform_indices = @transform_10, window_bounds = array<i64: 128, 128>}, {pipeline_mode = #tpu.pipeline_mode<synchronous>, transform_indices = @transform_11, window_bounds = array<i64: 1, 128>}, {transform_indices = @transform_12, window_bounds = array<i64: 1, 128, 128>}]} {
    %c0_i32 = arith.constant 0 : i32
    %0 = arith.cmpi eq, %arg1, %c0_i32 : i32
    %1 = arith.extui %0 : i1 to i32
    %c0_i32_0 = arith.constant 0 : i32
    %2 = arith.cmpi ne, %1, %c0_i32_0 : i32
    scf.if %2 {
      %c0_21 = arith.constant 0 : index
      %c0_22 = arith.constant 0 : index
      %c0_23 = arith.constant 0 : index
      %43 = vector.load %arg2[%c0_21, %c0_22, %c0_23] : memref<1x128x128xf32, #tpu.memory_space<vmem>>, vector<1x128x128xf32>
      %44 = vector.shape_cast %43 : vector<1x128x128xf32> to vector<128x128xf32>
      %c0_24 = arith.constant 0 : index
      %c0_25 = arith.constant 0 : index
      %c0_26 = arith.constant 0 : index
      %45 = vector.load %arg5[%c0_24, %c0_25, %c0_26] : memref<1x128x128xf32, #tpu.memory_space<vmem>>, vector<1x128x128xf32>
      %46 = vector.shape_cast %45 : vector<1x128x128xf32> to vector<128x128xf32>
      %cst_27 = arith.constant dense<0.000000e+00> : vector<128xf32>
      %47 = vector.multi_reduction <add>, %44, %cst_27 [1] : vector<128x128xf32> to vector<128xf32>
      %48 = vector.shape_cast %47 : vector<128xf32> to vector<128x1xf32>
      %cst_28 = arith.constant 1.280000e+02 : f32
      %49 = vector.broadcast %cst_28 : f32 to vector<128x1xf32>
      %50 = arith.divf %48, %49 : vector<128x1xf32>
      %51 = vector.broadcast %50 : vector<128x1xf32> to vector<128x128xf32>
      %52 = arith.subf %44, %51 : vector<128x128xf32>
      %53 = arith.mulf %52, %52 : vector<128x128xf32>
      %cst_29 = arith.constant dense<0.000000e+00> : vector<128xf32>
      %54 = vector.multi_reduction <add>, %53, %cst_29 [1] : vector<128x128xf32> to vector<128xf32>
      %55 = vector.shape_cast %54 : vector<128xf32> to vector<128x1xf32>
      %cst_30 = arith.constant 1.280000e+02 : f32
      %56 = vector.broadcast %cst_30 : f32 to vector<128x1xf32>
      %57 = arith.divf %55, %56 : vector<128x1xf32>
      %cst_31 = arith.constant 9.99999974E-6 : f32
      %58 = vector.broadcast %cst_31 : f32 to vector<128x1xf32>
      %59 = arith.addf %57, %58 : vector<128x1xf32>
      %60 = math.rsqrt %59 : vector<128x1xf32>
      %61 = vector.broadcast %60 : vector<128x1xf32> to vector<128x128xf32>
      %62 = arith.mulf %52, %61 : vector<128x128xf32>
      %cst_32 = arith.constant dense<0.000000e+00> : vector<128xf32>
      %63 = vector.multi_reduction <add>, %46, %cst_32 [1] : vector<128x128xf32> to vector<128xf32>
      %64 = vector.shape_cast %63 : vector<128xf32> to vector<128x1xf32>
      %cst_33 = arith.constant 1.280000e+02 : f32
      %65 = vector.broadcast %cst_33 : f32 to vector<128x1xf32>
      %66 = arith.divf %64, %65 : vector<128x1xf32>
      %67 = vector.broadcast %66 : vector<128x1xf32> to vector<128x128xf32>
      %68 = arith.subf %46, %67 : vector<128x128xf32>
      %69 = arith.mulf %68, %68 : vector<128x128xf32>
      %cst_34 = arith.constant dense<0.000000e+00> : vector<128xf32>
      %70 = vector.multi_reduction <add>, %69, %cst_34 [1] : vector<128x128xf32> to vector<128xf32>
      %71 = vector.shape_cast %70 : vector<128xf32> to vector<128x1xf32>
      %cst_35 = arith.constant 1.280000e+02 : f32
      %72 = vector.broadcast %cst_35 : f32 to vector<128x1xf32>
      %73 = arith.divf %71, %72 : vector<128x1xf32>
      %cst_36 = arith.constant 9.99999974E-6 : f32
      %74 = vector.broadcast %cst_36 : f32 to vector<128x1xf32>
      %75 = arith.addf %73, %74 : vector<128x1xf32>
      %76 = math.rsqrt %75 : vector<128x1xf32>
      %77 = vector.broadcast %76 : vector<128x1xf32> to vector<128x128xf32>
      %78 = arith.mulf %68, %77 : vector<128x128xf32>
      %c0_37 = arith.constant 0 : index
      %c0_38 = arith.constant 0 : index
      %79 = vector.load %arg6[%c0_37, %c0_38] : memref<1x128xf32, #tpu.memory_space<vmem>>, vector<1x128xf32>
      %80 = vector.broadcast %79 : vector<1x128xf32> to vector<128x128xf32>
      %81 = arith.mulf %78, %80 : vector<128x128xf32>
      %82 = arith.truncf %81 : vector<128x128xf32> to vector<128x128xbf16>
      %c0_39 = arith.constant 0 : index
      %c0_40 = arith.constant 0 : index
      %83 = vector.load %arg7[%c0_39, %c0_40] : memref<128x256xbf16, #tpu.memory_space<vmem>>, vector<128x256xbf16>
      %cst_41 = arith.constant dense<0.000000e+00> : vector<128x256xf32>
      %84 = tpu.matmul %82, %83, %cst_41 {dimension_numbers = #tpu.dot_dimension_numbers<[1], [0], [0], [1], [0, 0, 1, 1], [], []>} : vector<128x128xbf16>, vector<128x256xbf16>, vector<128x256xf32> -> vector<128x256xf32>
      %c0_42 = arith.constant 0 : index
      %c0_43 = arith.constant 0 : index
      %85 = vector.load %arg8[%c0_42, %c0_43] : memref<1x256xf32, #tpu.memory_space<vmem>>, vector<1x256xf32>
      %86 = vector.broadcast %85 : vector<1x256xf32> to vector<128x256xf32>
      %87 = arith.addf %84, %86 : vector<128x256xf32>
      %88 = vector.extract_strided_slice %87 {offsets = [0, 0], sizes = [128, 128], strides = [1, 1]} : vector<128x256xf32> to vector<128x128xf32>
      %89 = arith.negf %88 : vector<128x128xf32>
      %90 = math.exp %89 : vector<128x128xf32>
      %cst_44 = arith.constant 1.000000e+00 : f32
      %91 = vector.broadcast %cst_44 : f32 to vector<128x128xf32>
      %92 = arith.addf %91, %90 : vector<128x128xf32>
      %93 = arith.divf %91, %92 : vector<128x128xf32>
      %94 = arith.mulf %93, %62 : vector<128x128xf32>
      %95 = vector.extract_strided_slice %87 {offsets = [0, 128], sizes = [128, 128], strides = [1, 1]} : vector<128x256xf32> to vector<128x128xf32>
      %96 = arith.addf %94, %95 : vector<128x128xf32>
      %97 = arith.truncf %96 : vector<128x128xf32> to vector<128x128xbf16>
      %c0_45 = arith.constant 0 : index
      %c0_46 = arith.constant 0 : index
      %98 = vector.load %arg9[%c0_45, %c0_46] : memref<128x512xbf16, #tpu.memory_space<vmem>>, vector<128x512xbf16>
      %cst_47 = arith.constant dense<0.000000e+00> : vector<128x512xf32>
      %99 = tpu.matmul %97, %98, %cst_47 {dimension_numbers = #tpu.dot_dimension_numbers<[1], [0], [0], [1], [0, 0, 1, 1], [], []>} : vector<128x128xbf16>, vector<128x512xbf16>, vector<128x512xf32> -> vector<128x512xf32>
      %c0_48 = arith.constant 0 : index
      %c0_49 = arith.constant 0 : index
      %100 = vector.load %arg10[%c0_48, %c0_49] : memref<1x512xf32, #tpu.memory_space<vmem>>, vector<1x512xf32>
      %101 = vector.broadcast %100 : vector<1x512xf32> to vector<128x512xf32>
      %102 = arith.addf %99, %101 : vector<128x512xf32>
      %103 = vector.extract_strided_slice %102 {offsets = [0, 0], sizes = [128, 128], strides = [1, 1]} : vector<128x512xf32> to vector<128x128xf32>
      %cst_50 = arith.constant 0.176776692 : f32
      %104 = vector.broadcast %cst_50 : f32 to vector<128x128xf32>
      %105 = arith.mulf %103, %104 : vector<128x128xf32>
      %106 = arith.truncf %105 : vector<128x128xf32> to vector<128x128xbf16>
      %107 = vector.extract_strided_slice %102 {offsets = [0, 128], sizes = [128, 128], strides = [1, 1]} : vector<128x512xf32> to vector<128x128xf32>
      %108 = arith.truncf %107 : vector<128x128xf32> to vector<128x128xbf16>
      %109 = vector.extract_strided_slice %102 {offsets = [0, 256], sizes = [128, 128], strides = [1, 1]} : vector<128x512xf32> to vector<128x128xf32>
      %110 = arith.truncf %109 : vector<128x128xf32> to vector<128x128xbf16>
      %111 = vector.extract_strided_slice %102 {offsets = [0, 384], sizes = [128, 128], strides = [1, 1]} : vector<128x512xf32> to vector<128x128xf32>
      %112 = arith.negf %111 : vector<128x128xf32>
      %113 = math.exp %112 : vector<128x128xf32>
      %cst_51 = arith.constant 1.000000e+00 : f32
      %114 = vector.broadcast %cst_51 : f32 to vector<128x128xf32>
      %115 = arith.addf %114, %113 : vector<128x128xf32>
      %116 = arith.divf %114, %115 : vector<128x128xf32>
      %c0_52 = arith.constant 0 : index
      %c0_53 = arith.constant 0 : index
      %117 = vector.load %arg18[%c0_52, %c0_53] : memref<128x128xf32, #tpu.memory_space<vmem>>, vector<128x128xf32>
      tpu.vector_store %arg18[%c0_52, %c0_53], %116 {strides = array<i32>} : memref<128x128xf32, #tpu.memory_space<vmem>>, vector<128x128xf32>,
      %118 = vector.extract_strided_slice %106 {offsets = [0, 0], sizes = [128, 32], strides = [1, 1]} : vector<128x128xbf16> to vector<128x32xbf16>
      %c0_54 = arith.constant 0 : index
      %c0_55 = arith.constant 0 : index
      %c0_56 = arith.constant 0 : index
      %119 = vector.load %arg15[%c0_54, %c0_55, %c0_56] : memref<4x128x32xbf16, #tpu.memory_space<vmem>>, vector<1x128x32xbf16>
      %120 = vector.shape_cast %119 : vector<1x128x32xbf16> to vector<128x32xbf16>
      %121 = vector.shape_cast %118 : vector<128x32xbf16> to vector<1x128x32xbf16>
      tpu.vector_store %arg15[%c0_54, %c0_55, %c0_56], %121 {strides = array<i32>} : memref<4x128x32xbf16, #tpu.memory_space<vmem>>, vector<1x128x32xbf16>,
      %122 = vector.extract_strided_slice %108 {offsets = [0, 0], sizes = [128, 32], strides = [1, 1]} : vector<128x128xbf16> to vector<128x32xbf16>
      %c0_57 = arith.constant 0 : index
      %c0_58 = arith.constant 0 : index
      %c0_59 = arith.constant 0 : index
      %123 = vector.load %arg16[%c0_57, %c0_58, %c0_59] : memref<4x128x32xbf16, #tpu.memory_space<vmem>>, vector<1x128x32xbf16>
      %124 = vector.shape_cast %123 : vector<1x128x32xbf16> to vector<128x32xbf16>
      %125 = vector.shape_cast %122 : vector<128x32xbf16> to vector<1x128x32xbf16>
      tpu.vector_store %arg16[%c0_57, %c0_58, %c0_59], %125 {strides = array<i32>} : memref<4x128x32xbf16, #tpu.memory_space<vmem>>, vector<1x128x32xbf16>,
      %126 = vector.extract_strided_slice %110 {offsets = [0, 0], sizes = [128, 32], strides = [1, 1]} : vector<128x128xbf16> to vector<128x32xbf16>
      %c0_60 = arith.constant 0 : index
      %c0_61 = arith.constant 0 : index
      %c0_62 = arith.constant 0 : index
      %127 = vector.load %arg17[%c0_60, %c0_61, %c0_62] : memref<4x128x32xbf16, #tpu.memory_space<vmem>>, vector<1x128x32xbf16>
      %128 = vector.shape_cast %127 : vector<1x128x32xbf16> to vector<128x32xbf16>
      %129 = vector.shape_cast %126 : vector<128x32xbf16> to vector<1x128x32xbf16>
      tpu.vector_store %arg17[%c0_60, %c0_61, %c0_62], %129 {strides = array<i32>} : memref<4x128x32xbf16, #tpu.memory_space<vmem>>, vector<1x128x32xbf16>,
      %130 = vector.extract_strided_slice %106 {offsets = [0, 32], sizes = [128, 32], strides = [1, 1]} : vector<128x128xbf16> to vector<128x32xbf16>
      %c1 = arith.constant 1 : index
      %c0_63 = arith.constant 0 : index
      %c0_64 = arith.constant 0 : index
      %131 = vector.load %arg15[%c1, %c0_63, %c0_64] : memref<4x128x32xbf16, #tpu.memory_space<vmem>>, vector<1x128x32xbf16>
      %132 = vector.shape_cast %131 : vector<1x128x32xbf16> to vector<128x32xbf16>
      %133 = vector.shape_cast %130 : vector<128x32xbf16> to vector<1x128x32xbf16>
      tpu.vector_store %arg15[%c1, %c0_63, %c0_64], %133 {strides = array<i32>} : memref<4x128x32xbf16, #tpu.memory_space<vmem>>, vector<1x128x32xbf16>,
      %134 = vector.extract_strided_slice %108 {offsets = [0, 32], sizes = [128, 32], strides = [1, 1]} : vector<128x128xbf16> to vector<128x32xbf16>
      %c1_65 = arith.constant 1 : index
      %c0_66 = arith.constant 0 : index
      %c0_67 = arith.constant 0 : index
      %135 = vector.load %arg16[%c1_65, %c0_66, %c0_67] : memref<4x128x32xbf16, #tpu.memory_space<vmem>>, vector<1x128x32xbf16>
      %136 = vector.shape_cast %135 : vector<1x128x32xbf16> to vector<128x32xbf16>
      %137 = vector.shape_cast %134 : vector<128x32xbf16> to vector<1x128x32xbf16>
      tpu.vector_store %arg16[%c1_65, %c0_66, %c0_67], %137 {strides = array<i32>} : memref<4x128x32xbf16, #tpu.memory_space<vmem>>, vector<1x128x32xbf16>,
      %138 = vector.extract_strided_slice %110 {offsets = [0, 32], sizes = [128, 32], strides = [1, 1]} : vector<128x128xbf16> to vector<128x32xbf16>
      %c1_68 = arith.constant 1 : index
      %c0_69 = arith.constant 0 : index
      %c0_70 = arith.constant 0 : index
      %139 = vector.load %arg17[%c1_68, %c0_69, %c0_70] : memref<4x128x32xbf16, #tpu.memory_space<vmem>>, vector<1x128x32xbf16>
      %140 = vector.shape_cast %139 : vector<1x128x32xbf16> to vector<128x32xbf16>
      %141 = vector.shape_cast %138 : vector<128x32xbf16> to vector<1x128x32xbf16>
      tpu.vector_store %arg17[%c1_68, %c0_69, %c0_70], %141 {strides = array<i32>} : memref<4x128x32xbf16, #tpu.memory_space<vmem>>, vector<1x128x32xbf16>,
      %142 = vector.extract_strided_slice %106 {offsets = [0, 64], sizes = [128, 32], strides = [1, 1]} : vector<128x128xbf16> to vector<128x32xbf16>
      %c2 = arith.constant 2 : index
      %c0_71 = arith.constant 0 : index
      %c0_72 = arith.constant 0 : index
      %143 = vector.load %arg15[%c2, %c0_71, %c0_72] : memref<4x128x32xbf16, #tpu.memory_space<vmem>>, vector<1x128x32xbf16>
      %144 = vector.shape_cast %143 : vector<1x128x32xbf16> to vector<128x32xbf16>
      %145 = vector.shape_cast %142 : vector<128x32xbf16> to vector<1x128x32xbf16>
      tpu.vector_store %arg15[%c2, %c0_71, %c0_72], %145 {strides = array<i32>} : memref<4x128x32xbf16, #tpu.memory_space<vmem>>, vector<1x128x32xbf16>,
      %146 = vector.extract_strided_slice %108 {offsets = [0, 64], sizes = [128, 32], strides = [1, 1]} : vector<128x128xbf16> to vector<128x32xbf16>
      %c2_73 = arith.constant 2 : index
      %c0_74 = arith.constant 0 : index
      %c0_75 = arith.constant 0 : index
      %147 = vector.load %arg16[%c2_73, %c0_74, %c0_75] : memref<4x128x32xbf16, #tpu.memory_space<vmem>>, vector<1x128x32xbf16>
      %148 = vector.shape_cast %147 : vector<1x128x32xbf16> to vector<128x32xbf16>
      %149 = vector.shape_cast %146 : vector<128x32xbf16> to vector<1x128x32xbf16>
      tpu.vector_store %arg16[%c2_73, %c0_74, %c0_75], %149 {strides = array<i32>} : memref<4x128x32xbf16, #tpu.memory_space<vmem>>, vector<1x128x32xbf16>,
      %150 = vector.extract_strided_slice %110 {offsets = [0, 64], sizes = [128, 32], strides = [1, 1]} : vector<128x128xbf16> to vector<128x32xbf16>
      %c2_76 = arith.constant 2 : index
      %c0_77 = arith.constant 0 : index
      %c0_78 = arith.constant 0 : index
      %151 = vector.load %arg17[%c2_76, %c0_77, %c0_78] : memref<4x128x32xbf16, #tpu.memory_space<vmem>>, vector<1x128x32xbf16>
      %152 = vector.shape_cast %151 : vector<1x128x32xbf16> to vector<128x32xbf16>
      %153 = vector.shape_cast %150 : vector<128x32xbf16> to vector<1x128x32xbf16>
      tpu.vector_store %arg17[%c2_76, %c0_77, %c0_78], %153 {strides = array<i32>} : memref<4x128x32xbf16, #tpu.memory_space<vmem>>, vector<1x128x32xbf16>,
      %154 = vector.extract_strided_slice %106 {offsets = [0, 96], sizes = [128, 32], strides = [1, 1]} : vector<128x128xbf16> to vector<128x32xbf16>
      %c3 = arith.constant 3 : index
      %c0_79 = arith.constant 0 : index
      %c0_80 = arith.constant 0 : index
      %155 = vector.load %arg15[%c3, %c0_79, %c0_80] : memref<4x128x32xbf16, #tpu.memory_space<vmem>>, vector<1x128x32xbf16>
      %156 = vector.shape_cast %155 : vector<1x128x32xbf16> to vector<128x32xbf16>
      %157 = vector.shape_cast %154 : vector<128x32xbf16> to vector<1x128x32xbf16>
      tpu.vector_store %arg15[%c3, %c0_79, %c0_80], %157 {strides = array<i32>} : memref<4x128x32xbf16, #tpu.memory_space<vmem>>, vector<1x128x32xbf16>,
      %158 = vector.extract_strided_slice %108 {offsets = [0, 96], sizes = [128, 32], strides = [1, 1]} : vector<128x128xbf16> to vector<128x32xbf16>
      %c3_81 = arith.constant 3 : index
      %c0_82 = arith.constant 0 : index
      %c0_83 = arith.constant 0 : index
      %159 = vector.load %arg16[%c3_81, %c0_82, %c0_83] : memref<4x128x32xbf16, #tpu.memory_space<vmem>>, vector<1x128x32xbf16>
      %160 = vector.shape_cast %159 : vector<1x128x32xbf16> to vector<128x32xbf16>
      %161 = vector.shape_cast %158 : vector<128x32xbf16> to vector<1x128x32xbf16>
      tpu.vector_store %arg16[%c3_81, %c0_82, %c0_83], %161 {strides = array<i32>} : memref<4x128x32xbf16, #tpu.memory_space<vmem>>, vector<1x128x32xbf16>,
      %162 = vector.extract_strided_slice %110 {offsets = [0, 96], sizes = [128, 32], strides = [1, 1]} : vector<128x128xbf16> to vector<128x32xbf16>
      %c3_84 = arith.constant 3 : index
      %c0_85 = arith.constant 0 : index
      %c0_86 = arith.constant 0 : index
      %163 = vector.load %arg17[%c3_84, %c0_85, %c0_86] : memref<4x128x32xbf16, #tpu.memory_space<vmem>>, vector<1x128x32xbf16>
      %164 = vector.shape_cast %163 : vector<1x128x32xbf16> to vector<128x32xbf16>
      %165 = vector.shape_cast %162 : vector<128x32xbf16> to vector<1x128x32xbf16>
      tpu.vector_store %arg17[%c3_84, %c0_85, %c0_86], %165 {strides = array<i32>} : memref<4x128x32xbf16, #tpu.memory_space<vmem>>, vector<1x128x32xbf16>,
    } else {
    }
    %c0 = arith.constant 0 : index
    %c0_1 = arith.constant 0 : index
    %c0_2 = arith.constant 0 : index
    %3 = vector.load %arg3[%c0, %c0_1, %c0_2] : memref<1x1x128xf32, #tpu.memory_space<vmem>>, vector<1x1x128xf32>
    %4 = vector.shape_cast %3 : vector<1x1x128xf32> to vector<1x128xf32>
    %cst = arith.constant 1.000000e+00 : f32
    %5 = vector.broadcast %cst : f32 to vector<1x128xf32>
    %6 = arith.subf %4, %5 : vector<1x128xf32>
    %cst_3 = arith.constant 1.000000e+09 : f32
    %7 = vector.broadcast %cst_3 : f32 to vector<1x128xf32>
    %8 = arith.mulf %7, %6 : vector<1x128xf32>
    %9 = arith.index_cast %arg1 : i32 to index
    %c0_4 = arith.constant 0 : index
    %c0_5 = arith.constant 0 : index
    %10 = vector.load %arg15[%9, %c0_4, %c0_5] : memref<4x128x32xbf16, #tpu.memory_space<vmem>>, vector<1x128x32xbf16>
    %11 = vector.shape_cast %10 : vector<1x128x32xbf16> to vector<128x32xbf16>
    %12 = arith.index_cast %arg1 : i32 to index
    %c0_6 = arith.constant 0 : index
    %c0_7 = arith.constant 0 : index
    %13 = vector.load %arg16[%12, %c0_6, %c0_7] : memref<4x128x32xbf16, #tpu.memory_space<vmem>>, vector<1x128x32xbf16>
    %14 = vector.shape_cast %13 : vector<1x128x32xbf16> to vector<128x32xbf16>
    %15 = arith.index_cast %arg1 : i32 to index
    %c0_8 = arith.constant 0 : index
    %c0_9 = arith.constant 0 : index
    %16 = vector.load %arg17[%15, %c0_8, %c0_9] : memref<4x128x32xbf16, #tpu.memory_space<vmem>>, vector<1x128x32xbf16>
    %17 = vector.shape_cast %16 : vector<1x128x32xbf16> to vector<128x32xbf16>
    %cst_10 = arith.constant dense<0.000000e+00> : vector<128x128xf32>
    %18 = tpu.matmul %11, %14, %cst_10 {dimension_numbers = #tpu.dot_dimension_numbers<[1], [1], [0], [0], [0, 0, 1, 0], [], []>} : vector<128x32xbf16>, vector<128x32xbf16>, vector<128x128xf32> -> vector<128x128xf32>
    %19 = vector.broadcast %8 : vector<1x128xf32> to vector<128x128xf32>
    %20 = arith.addf %18, %19 : vector<128x128xf32>
    %c0_11 = arith.constant 0 : index
    %c0_12 = arith.constant 0 : index
    %c0_13 = arith.constant 0 : index
    %c0_14 = arith.constant 0 : index
    %21 = vector.load %arg4[%c0_11, %c0_12, %c0_13, %c0_14] : memref<1x1x128x128xf32, #tpu.memory_space<vmem>>, vector<1x1x128x128xf32>
    %22 = vector.shape_cast %21 : vector<1x1x128x128xf32> to vector<128x128xf32>
    %23 = arith.addf %20, %22 : vector<128x128xf32>
    %cst_15 = arith.constant dense<0xFF800000> : vector<128xf32>
    %24 = vector.multi_reduction <maximumf>, %23, %cst_15 [1] : vector<128x128xf32> to vector<128xf32>
    %25 = vector.shape_cast %24 : vector<128xf32> to vector<128x1xf32>
    %26 = vector.broadcast %25 : vector<128x1xf32> to vector<128x128xf32>
    %27 = arith.subf %23, %26 : vector<128x128xf32>
    %28 = math.exp %27 : vector<128x128xf32>
    %cst_16 = arith.constant dense<0.000000e+00> : vector<128xf32>
    %29 = vector.multi_reduction <add>, %28, %cst_16 [1] : vector<128x128xf32> to vector<128xf32>
    %30 = vector.shape_cast %29 : vector<128xf32> to vector<128x1xf32>
    %31 = tpu.reciprocal %30 {approx = true} : vector<128x1xf32> -> vector<128x1xf32>
    %32 = vector.broadcast %31 : vector<128x1xf32> to vector<128x128xf32>
    %33 = arith.mulf %28, %32 : vector<128x128xf32>
    %34 = arith.truncf %33 : vector<128x128xf32> to vector<128x128xbf16>
    %cst_17 = arith.constant dense<0.000000e+00> : vector<128x32xf32>
    %35 = tpu.matmul %34, %17, %cst_17 {dimension_numbers = #tpu.dot_dimension_numbers<[1], [0], [0], [1], [0, 0, 1, 1], [], []>} : vector<128x128xbf16>, vector<128x32xbf16>, vector<128x32xf32> -> vector<128x32xf32>
    %36 = arith.index_cast %arg1 : i32 to index
    %c0_18 = arith.constant 0 : index
    %c0_19 = arith.constant 0 : index
    %37 = vector.load %arg19[%36, %c0_18, %c0_19] : memref<4x128x32xf32, #tpu.memory_space<vmem>>, vector<1x128x32xf32>
    %38 = vector.shape_cast %37 : vector<1x128x32xf32> to vector<128x32xf32>
    %39 = vector.shape_cast %35 : vector<128x32xf32> to vector<1x128x32xf32>
    tpu.vector_store %arg19[%36, %c0_18, %c0_19], %39 {strides = array<i32>} : memref<4x128x32xf32, #tpu.memory_space<vmem>>, vector<1x128x32xf32>,
    %c3_i32 = arith.constant 3 : i32
    %40 = arith.cmpi eq, %arg1, %c3_i32 : i32
    %41 = arith.extui %40 : i1 to i32
    %c0_i32_20 = arith.constant 0 : i32
    %42 = arith.cmpi ne, %41, %c0_i32_20 : i32
    scf.if %42 {
      %c0_21 = arith.constant 0 : index
      %c0_22 = arith.constant 0 : index
      %c0_23 = arith.constant 0 : index
      %43 = vector.load %arg19[%c0_21, %c0_22, %c0_23] : memref<4x128x32xf32, #tpu.memory_space<vmem>>, vector<1x128x32xf32>
      %44 = vector.shape_cast %43 : vector<1x128x32xf32> to vector<128x32xf32>
      %c1 = arith.constant 1 : index
      %c0_24 = arith.constant 0 : index
      %c0_25 = arith.constant 0 : index
      %45 = vector.load %arg19[%c1, %c0_24, %c0_25] : memref<4x128x32xf32, #tpu.memory_space<vmem>>, vector<1x128x32xf32>
      %46 = vector.shape_cast %45 : vector<1x128x32xf32> to vector<128x32xf32>
      %c2 = arith.constant 2 : index
      %c0_26 = arith.constant 0 : index
      %c0_27 = arith.constant 0 : index
      %47 = vector.load %arg19[%c2, %c0_26, %c0_27] : memref<4x128x32xf32, #tpu.memory_space<vmem>>, vector<1x128x32xf32>
      %48 = vector.shape_cast %47 : vector<1x128x32xf32> to vector<128x32xf32>
      %c3 = arith.constant 3 : index
      %c0_28 = arith.constant 0 : index
      %c0_29 = arith.constant 0 : index
      %49 = vector.load %arg19[%c3, %c0_28, %c0_29] : memref<4x128x32xf32, #tpu.memory_space<vmem>>, vector<1x128x32xf32>
      %50 = vector.shape_cast %49 : vector<1x128x32xf32> to vector<128x32xf32>
      %51 = tpu.concatenate %44, %46, %48, %50 in 1 : vector<128x32xf32>, vector<128x32xf32>, vector<128x32xf32>, vector<128x32xf32> -> vector<128x128xf32>
      %c0_30 = arith.constant 0 : index
      %c0_31 = arith.constant 0 : index
      %52 = vector.load %arg18[%c0_30, %c0_31] : memref<128x128xf32, #tpu.memory_space<vmem>>, vector<128x128xf32>
      %53 = arith.mulf %51, %52 : vector<128x128xf32>
      %54 = arith.truncf %53 : vector<128x128xf32> to vector<128x128xbf16>
      %c0_32 = arith.constant 0 : index
      %c0_33 = arith.constant 0 : index
      %55 = vector.load %arg11[%c0_32, %c0_33] : memref<128x128xbf16, #tpu.memory_space<vmem>>, vector<128x128xbf16>
      %cst_34 = arith.constant dense<0.000000e+00> : vector<128x128xf32>
      %56 = tpu.matmul %54, %55, %cst_34 {dimension_numbers = #tpu.dot_dimension_numbers<[1], [0], [0], [1], [0, 0, 1, 1], [], []>} : vector<128x128xbf16>, vector<128x128xbf16>, vector<128x128xf32> -> vector<128x128xf32>
      %c0_35 = arith.constant 0 : index
      %c0_36 = arith.constant 0 : index
      %c0_37 = arith.constant 0 : index
      %57 = vector.load %arg5[%c0_35, %c0_36, %c0_37] : memref<1x128x128xf32, #tpu.memory_space<vmem>>, vector<1x128x128xf32>
      %58 = vector.shape_cast %57 : vector<1x128x128xf32> to vector<128x128xf32>
      %59 = arith.truncf %58 : vector<128x128xf32> to vector<128x128xbf16>
      %c0_38 = arith.constant 0 : index
      %c0_39 = arith.constant 0 : index
      %60 = vector.load %arg12[%c0_38, %c0_39] : memref<128x128xbf16, #tpu.memory_space<vmem>>, vector<128x128xbf16>
      %cst_40 = arith.constant dense<0.000000e+00> : vector<128x128xf32>
      %61 = tpu.matmul %59, %60, %cst_40 {dimension_numbers = #tpu.dot_dimension_numbers<[1], [0], [0], [1], [0, 0, 1, 1], [], []>} : vector<128x128xbf16>, vector<128x128xbf16>, vector<128x128xf32> -> vector<128x128xf32>
      %c0_41 = arith.constant 0 : index
      %c0_42 = arith.constant 0 : index
      %62 = vector.load %arg13[%c0_41, %c0_42] : memref<1x128xf32, #tpu.memory_space<vmem>>, vector<1x128xf32>
      %63 = vector.broadcast %62 : vector<1x128xf32> to vector<128x128xf32>
      %64 = arith.addf %61, %63 : vector<128x128xf32>
      %65 = arith.negf %64 : vector<128x128xf32>
      %66 = math.exp %65 : vector<128x128xf32>
      %cst_43 = arith.constant 1.000000e+00 : f32
      %67 = vector.broadcast %cst_43 : f32 to vector<128x128xf32>
      %68 = arith.addf %67, %66 : vector<128x128xf32>
      %69 = arith.divf %67, %68 : vector<128x128xf32>
      %70 = arith.mulf %69, %56 : vector<128x128xf32>
      %c0_44 = arith.constant 0 : index
      %c0_45 = arith.constant 0 : index
      %c0_46 = arith.constant 0 : index
      %71 = vector.load %arg14[%c0_44, %c0_45, %c0_46] : memref<1x128x128xf32, #tpu.memory_space<vmem>>, vector<1x128x128xf32>
      %72 = vector.shape_cast %71 : vector<1x128x128xf32> to vector<128x128xf32>
      %73 = vector.shape_cast %70 : vector<128x128xf32> to vector<1x128x128xf32>
      tpu.vector_store %arg14[%c0_44, %c0_45, %c0_46], %73 {strides = array<i32>} : memref<1x128x128xf32, #tpu.memory_space<vmem>>, vector<1x128x128xf32>,
    } else {
    }
    return
  }
  func.func @transform_0(%arg0: i32, %arg1: i32) -> (i32, i32, i32) {
    %c0_i32 = arith.constant 0 : i32
    %c0_i32_0 = arith.constant 0 : i32
    %c0_i32_1 = arith.constant 0 : i32
    return %arg0, %c0_i32, %c0_i32_0 : i32, i32, i32
  }
  func.func @transform_1(%arg0: i32, %arg1: i32) -> (i32, i32, i32) {
    %c0_i32 = arith.constant 0 : i32
    %c0_i32_0 = arith.constant 0 : i32
    %c0_i32_1 = arith.constant 0 : i32
    return %arg0, %c0_i32, %c0_i32_0 : i32, i32, i32
  }
  func.func @transform_2(%arg0: i32, %arg1: i32) -> (i32, i32, i32, i32) {
    %c0_i32 = arith.constant 0 : i32
    %c0_i32_0 = arith.constant 0 : i32
    %c0_i32_1 = arith.constant 0 : i32
    return %arg0, %arg1, %c0_i32, %c0_i32_0 : i32, i32, i32, i32
  }
  func.func @transform_3(%arg0: i32, %arg1: i32) -> (i32, i32, i32) {
    %c0_i32 = arith.constant 0 : i32
    %c0_i32_0 = arith.constant 0 : i32
    %c0_i32_1 = arith.constant 0 : i32
    return %arg0, %c0_i32, %c0_i32_0 : i32, i32, i32
  }
  func.func @transform_4(%arg0: i32, %arg1: i32) -> (i32, i32) {
    %c0_i32 = arith.constant 0 : i32
    %c0_i32_0 = arith.constant 0 : i32
    %c0_i32_1 = arith.constant 0 : i32
    return %c0_i32, %c0_i32_0 : i32, i32
  }
  func.func @transform_5(%arg0: i32, %arg1: i32) -> (i32, i32) {
    %c0_i32 = arith.constant 0 : i32
    %c0_i32_0 = arith.constant 0 : i32
    %c0_i32_1 = arith.constant 0 : i32
    return %c0_i32, %c0_i32_0 : i32, i32
  }
  func.func @transform_6(%arg0: i32, %arg1: i32) -> (i32, i32) {
    %c0_i32 = arith.constant 0 : i32
    %c0_i32_0 = arith.constant 0 : i32
    %c0_i32_1 = arith.constant 0 : i32
    return %c0_i32, %c0_i32_0 : i32, i32
  }
  func.func @transform_7(%arg0: i32, %arg1: i32) -> (i32, i32) {
    %c0_i32 = arith.constant 0 : i32
    %c0_i32_0 = arith.constant 0 : i32
    %c0_i32_1 = arith.constant 0 : i32
    return %c0_i32, %c0_i32_0 : i32, i32
  }
  func.func @transform_8(%arg0: i32, %arg1: i32) -> (i32, i32) {
    %c0_i32 = arith.constant 0 : i32
    %c0_i32_0 = arith.constant 0 : i32
    %c0_i32_1 = arith.constant 0 : i32
    return %c0_i32, %c0_i32_0 : i32, i32
  }
  func.func @transform_9(%arg0: i32, %arg1: i32) -> (i32, i32) {
    %c0_i32 = arith.constant 0 : i32
    %c0_i32_0 = arith.constant 0 : i32
    %c0_i32_1 = arith.constant 0 : i32
    return %c0_i32, %c0_i32_0 : i32, i32
  }
  func.func @transform_10(%arg0: i32, %arg1: i32) -> (i32, i32) {
    %c0_i32 = arith.constant 0 : i32
    %c0_i32_0 = arith.constant 0 : i32
    %c0_i32_1 = arith.constant 0 : i32
    return %c0_i32, %c0_i32_0 : i32, i32
  }
  func.func @transform_11(%arg0: i32, %arg1: i32) -> (i32, i32) {
    %c0_i32 = arith.constant 0 : i32
    %c0_i32_0 = arith.constant 0 : i32
    %c0_i32_1 = arith.constant 0 : i32
    return %c0_i32, %c0_i32_0 : i32, i32
  }
  func.func @transform_12(%arg0: i32, %arg1: i32) -> (i32, i32, i32) {
    %c0_i32 = arith.constant 0 : i32
    %c0_i32_0 = arith.constant 0 : i32
    %c0_i32_1 = arith.constant 0 : i32
    return %arg0, %c0_i32, %c0_i32_0 : i32, i32, i32
  }
}

</mosaic_0001>

<bundles_post_ra>
// kernel: tpu_custom_call.1
= control target key start
LH: loop header
LB: loop body
LE: loop exit
PB: predicated region body
PF: predicated region fallthrough
CT: control target
= control target key end

     0   :  { %s6989_s0 = inlined_call_operand.hbm [shape: f32[2,128,128], index: 0, kind: input, shape index: {}]   ;;  %s6990_s1 = inlined_call_operand.vmem [shape: f32[2,1,128], index: 1, kind: input, shape index: {}]   ;;  %s6991_s2 = inlined_call_operand.hbm [shape: f32[2,4,128,128], index: 2, kind: input, shape index: {}]   ;;  %s6992_s3 = inlined_call_operand.hbm [shape: f32[2,128,128], index: 3, kind: input, shape index: {}]   ;;  %s6993_s4 = inlined_call_operand.vmem [shape: f32[1,128], index: 4, kind: input, shape index: {}]   ;;  %s6994_s5 = inlined_call_operand.hbm [shape: bf16[128,256], index: 5, kind: input, shape index: {}]   ;;  %s6995_s6 = inlined_call_operand.vmem [shape: f32[1,256], index: 6, kind: input, shape index: {}]   ;;  %s6996_s7 = inlined_call_operand.hbm [shape: bf16[128,512], index: 7, kind: input, shape index: {}]   ;;  %s6997_s8 = inlined_call_operand.vmem [shape: f32[1,512], index: 8, kind: input, shape index: {}]   ;;  %s6998_s9 = inlined_call_operand.hbm [shape: bf16[128,128], index: 9, kind: input, shape index: {}]   ;;  %s6999_s10 = inlined_call_operand.hbm [shape: bf16[128,128], index: 10, kind: input, shape index: {}]   ;;  %s7000_s11 = inlined_call_operand.vmem [shape: f32[1,128], index: 11, kind: input, shape index: {}]   ;;  %s7001_s12 = inlined_call_operand.hbm [shape: f32[2,128,128], index: 12, kind: output, shape index: {}]  }
   0x1   :  { %7029 = sst [smem:[#allocation36_spill]] %s6989_s0 }
   0x2   :  { %7030 = sst [smem:[#allocation37_spill]] %s6990_s1 }
   0x3   :  { %7031 = sst [smem:[#allocation38_spill]] %s6991_s2 }
   0x4   :  { %7032 = sst [smem:[#allocation39_spill]] %s6992_s3 }
   0x5   :  { %7033 = sst [smem:[#allocation40_spill]] %s6993_s4 }
   0x6   :  { %7034 = sst [smem:[#allocation41_spill]] %s6994_s5 }
   0x7   :  { %7035 = sst [smem:[#allocation42_spill]] %s6995_s6 }
   0x8   :  { %7036 = sst [smem:[#allocation43_spill]] %s6996_s7 }
   0x9   :  { %7037 = sst [smem:[#allocation44_spill]] %s6997_s8 }
   0xa   :  { %7038 = sst [smem:[#allocation45_spill]] %s6998_s9 }
   0xb   :  { %7039 = sst [smem:[#allocation46_spill]] %s6999_s10 }
   0xc   :  { %7040 = sst [smem:[#allocation47_spill]] %s7000_s11 }
   0xd   :  { %7041 = sst [smem:[#allocation48_spill]] %s7001_s12 }
   0xe   :  { %17 = vsyncpa [#allocation8], 0 }
   0xf   :  { %19 = vsyncpa [#allocation8 + $0x1], 0 }
  0x10   :  { %20 = vsyncpa [#allocation11], 0 }
  0x11   :  { %22 = vsyncpa [#allocation11 + $0x1], 0 }
  0x12   :  { %23 = vsyncpa [#allocation14], 0 }
  0x13   :  { %24 = vsyncpa [#allocation17], 0 }
  0x14   :  { %25 = vsyncpa [#allocation9], 0 }
  0x15   :  { %27 = vsyncpa [#allocation9 + $0x1], 0  ;;  %s5221_s21 = smov 0   ;;  %s5223_s22 = smov 0  }
  0x16   :  { %s5225_s23 = smov 0   ;;  %s5227_s24 = smov 0  }
  0x17   :  { %s5229_s25 = smov 0   ;;  %s5231_s26 = smov 0  }
  0x18   :  { %s5233_s27 = smov 0   ;;  %s5235_s28 = smov 0  }
  0x19   :  { %s5237_s29 = smov 0   ;;  %s5239_s30 = smov 0  }
  0x1a   :  { %s5241_s13 = smov 0  }
  0x1b LB: > { %7042 = sst [smem:[#allocation26_spill]] %s5095_s22  ;;  %s5277_s14 = sadd.s32 4294967295, %s5131_s13   ;;  %s5131_s13 = sphi %s5241_s13, %s33_s13   ;;  %s5127_s30 = sphi %s5239_s30, %s7107_s30   ;;  %s5123_s29 = sphi %s5237_s29, %s7114_s29   ;;  %s5119_s28 = sphi %s5235_s28, %s7113_s28   ;;  %s5115_s27 = sphi %s5233_s27, %s7104_s27   ;;  %s5111_s26 = sphi %s5231_s26, %s7112_s26   ;;  %s5107_s25 = sphi %s5229_s25, %s7111_s25   ;;  %s5103_s24 = sphi %s5227_s24, %s7110_s24   ;;  %s5099_s23 = sphi %s5225_s23, %s7109_s23   ;;  %s5095_s22 = sphi %s5223_s22, %s7108_s22   ;;  %s5091_s21 = sphi %s5221_s21, %s7102_s21  }
  0x1c   : > { %7043 = sst [smem:[#allocation27_spill]] %s5115_s27  ;;  %p3833_p0 = scmp.ge.s32.totalorder %s5131_s13, 1 }
  0x1d   : > { %7044 = sst [smem:[#allocation28_spill]] %s5119_s28  ;;  %p7004_p1 = scmp.eq.s32.totalorder %s5277_s14, 0 }
  0x1e   : > { %7045 = sst [smem:[#allocation29_spill]] %s5123_s29  ;;  %p350_p3 = scmp.lt.s32.totalorder %s5131_s13, 9 }
  0x1f   : > { %7046 = sst [smem:[#allocation30_spill]] %s5127_s30  ;;  %s5133_s16 = smov [#allocation13]  }
  0x20   : > { %p5283_p4 = pnand %p3833_p0, %p350_p3  ;;  %s365_s17 = sshll.u32 %s5133_s16, 4  ;;  %s366_s17 = int_to_ptr.vmem [resolvable:$true] %s365_s17 }
  0x21   : > { %s5134_s19 = smov [#allocation16]   ;;  %s7050_s5 = sld [smem:[#allocation41_spill]] }
  0x22   : > { %s7047_s15 = scalar_select %p5283_p4, 1, 0 }
  0x23   : > { %p4239_p5 = pneg %p5283_p4  ;;  %s397_s20 = sshll.u32 %s5134_s19, 4  ;;  %s5295_s20 = int_to_ptr.vmem [resolvable:$true] %s397_s20 }
  0x24   : > { %7048 = sst [smem:[#allocation31_spill]] %s7047_s15 }
  0x25   : > { %p5291_p6 = pnand %p4239_p5, %p7004_p1 }
  0x27   : > { %s7049_s18 = scalar_select %p5291_p6, 1, 0 }
  0x28   : > { %s4791_s8 = scalar_lea.hbm %s7050_s5, 2048  ;;  %p5305_p8 = pneg %p5291_p6 }
  0x29   : > { %p4792_p7 = scmp.ne.s32.totalorder %s7050_s5, %s4791_s8  ;;  %p4798_p11 = scmp.lt.u32.totalorder %s4791_s8, %s7050_s5 }
  0x2b   : > { %p4794_p9 = pnand %p5305_p8, %p4792_p7 }
  0x2d   : > { %p4795_p10 = pneg %p4794_p9 }
  0x2f   : > { %p4800_p12 = pnand %p4798_p11, %p4795_p10 }
  0x31   : > { %4803 = shalt.err (!%p4800_p12)
}
  0x32   : > { %s4804_s11 = scalar_lea.vmem %s366_s17, 2048  ;;  %p4812_p5 = scmp.lt.s32.totalorder %s366_s17, %s366_s17 }
  0x33   : > { %p4805_p13 = scmp.ne.s32.totalorder %s366_s17, %s4804_s11  ;;  %p4813_p2 = scmp.lt.s32.totalorder %s4804_s11, %s4804_s11 }
  0x35   : > { %p4807_p0 = pnand %p4805_p13, %p5305_p8  ;;  %p4814_p1 = por %p4813_p2, %p4812_p5 }
  0x37   : > { %p4808_p3 = pneg %p4807_p0 }
  0x39   : > { %p4815_p4 = pnand %p4814_p1, %p4808_p3 }
  0x3b   : > { %4818 = shalt.err (!%p4815_p4)
}
  0x3c   : > { %s7011_s4 = smov 128   ;;  %s7013_s6 = smov 8  }
  0x3d   : > { %4242 = dma.hbm_to_vmem [thread:$0]  (!%p5291_p6), %s7050_s5, 2048, %s366_s17, [#allocation14], %s7011_s4, %s7011_s4, %s7013_s6  }
  0x3e   : > { %s7052_s9 = sld [smem:[#allocation45_spill]] }
  0x44   : > { %s4819_s1 = scalar_lea.hbm %s7052_s9, 1024 }
  0x45   : > { %p4820_p1 = scmp.ne.s32.totalorder %s7052_s9, %s4819_s1  ;;  %p4826_p7 = scmp.lt.u32.totalorder %s4819_s1, %s7052_s9 }
  0x47   : > { %p4822_p2 = pnand %p4820_p1, %p5305_p8 }
  0x49   : > { %p4823_p4 = pneg %p4822_p2 }
  0x4b   : > { %p4828_p9 = pnand %p4826_p7, %p4823_p4 }
  0x4d   : > { %4831 = shalt.err (!%p4828_p9)
}
  0x4e   : > { %s4832_s17 = scalar_lea.vmem %s5295_s20, 1024  ;;  %p4840_p13 = scmp.lt.s32.totalorder %s5295_s20, %s5295_s20 }
  0x4f   : > { %p4833_p10 = scmp.ne.s32.totalorder %s5295_s20, %s4832_s17  ;;  %p4841_p0 = scmp.lt.s32.totalorder %s4832_s17, %s4832_s17 }
  0x51   : > { %p4835_p11 = pnand %p4833_p10, %p5305_p8  ;;  %p4842_p3 = por %p4841_p0, %p4840_p13 }
  0x53   : > { %p4836_p12 = pneg %p4835_p11 }
  0x55   : > { %p4843_p5 = pnand %p4842_p3, %p4836_p12 }
  0x57   : > { %4846 = shalt.err (!%p4843_p5)
}
  0x58   : > { %s7009_s28 = smov 64   ;;  %s7010_s1 = smov 4  }
  0x59   : > { %4248 = dma.hbm_to_vmem [thread:$0]  (!%p5291_p6), %s7052_s9, 1024, %s5295_s20, [#allocation17], %s7009_s28, %s7009_s28, %s7010_s1  }
  0x5a   : > { %s42_s8 = sadd.s32 1, %s5123_s29  ;;  %s45_s12 = sadd.s32 1, %s5127_s30 }
  0x5b   : > { %p43_p1 = scmp.ge.s32.totalorder %s42_s8, 4  ;;  %p7022_p2 = scmp.eq.s32.totalorder %s5131_s13, 0 }
  0x5c   : > { %s106_s27 = sadd.s32 1, %s5099_s23  ;;  %p113_p4 = scmp.ne.s32.totalorder %s5099_s23, %s5095_s22 }
  0x5d   : > { %s7116_s8 = smov (%p43_p1, %s42_s8), 0  ;;  %s7118_s12 = smov (!%p43_p1, %s45_s12), %s5127_s30 }
  0x5e   : > { %7053 = sst [smem:[#allocation32_spill]] %s7116_s8  ;;  %s102_s19 = ssub.s32 %s5123_s29, %s7116_s8 }
  0x5f   : > { %p47_p7 = scmp.ge.s32.totalorder %s7118_s12, 2  ;;  %p119_p9 = scmp.ne.s32.totalorder %s5095_s22, %s5091_s21 }
  0x60   : > { %p5365_p10 = por %p113_p4, %p7022_p2  ;;  %p7021_p11 = scmp.lt.s32.totalorder %s5131_s13, 8 }
  0x61   : > { %s7120_s12 = smov (%p47_p7, %s7118_s12), 0  ;;  %p7056_p12 = scmp.eq.s32.totalorder %s5277_s14, 0 }
  0x62   : > { %7055 = sst [smem:[#allocation33_spill]] %s7120_s12  ;;  %s454_s17 = sand.u32 1, %s5131_s13  }
  0x63   : > { %p5374_p13 = por %p119_p9, %p7056_p12  ;;  %s5381_s3 = ssub.s32 %s5127_s30, %s7120_s12 }
  0x64   : > { %s103_s21 = sor.u32 %s102_s19, %s5381_s3  ;;  %s456_s15 = sand.u32 1, %s5099_s23  }
  0x65   : > { %s7057_s11 = scalar_select %p5374_p13, 1, 0 }
  0x66   : > { %p104_p3 = scmp.eq.s32.totalorder %s103_s21, 0  ;;  %s3842_s28 = sshll.u32 %s456_s15, 7 }
  0x67   : > { %7058 = sst [smem:[#allocation34_spill]] %s7057_s11  ;;  %s3843_s1 = sshll.u32 %s5123_s29, 4 }
  0x68   : > { %s5388_s4 = scalar_select %p104_p3, %s5099_s23, %s106_s27  }
  0x69   : > { %s3844_s6 = sshll.u32 %s5127_s30, 6  ;;  %s458_s9 = scalar_lea.vmem [#allocation10], %s3842_s28 }
  0x6a   : > { %s464_s5 = sadd.s32 %s3844_s6, %s3843_s1  ;;  %s467_s8 = sshll.u32 %s458_s9, 4  ;;  %s5391_s8 = int_to_ptr.vmem [resolvable:$true] %s467_s8 }
  0x6b   : > { %s3845_s11 = sshll.u32 %s464_s5, 7  ;;  %s7059_s2 = sld [smem:[#allocation38_spill]] }
  0x6c   : > { %p5402_p5 = pnand %p7021_p11, %p5365_p10  ;;  %s5139_s5 = smov [#allocation15]  }
  0x6d   : > { %s5406_s9 = sshll.u32 %s5139_s5, 4  ;;  %s5408_s6 = scalar_lea.sflag [#allocation11], %s454_s17  ;;  %s382_s9 = int_to_ptr.vmem [resolvable:$true] %s5406_s9 }
  0x6e   : > { %p4849_p4 = pneg %p5402_p5 }
  0x71   : > { %s5396_s0 = scalar_lea.hbm %s7059_s2, %s3845_s11  ;;  %s4852_s12 = scalar_lea.hbm %s7059_s2, 16384 }
  0x72   : > { %s4847_s22 = scalar_lea.hbm %s5396_s0, 2048  ;;  %p4853_p10 = scmp.lt.u32.totalorder %s5396_s0, %s7059_s2 }
  0x73   : > { %p4848_p1 = scmp.ne.s32.totalorder %s5396_s0, %s4847_s22  ;;  %p4854_p12 = scmp.lt.u32.totalorder %s4852_s12, %s4847_s22 }
  0x74   : > { %p4856_p11 = scmp.lt.u32.totalorder %s4847_s22, %s5396_s0 }
  0x75   : > { %p4850_p7 = pnand %p4849_p4, %p4848_p1  ;;  %p4855_p3 = por %p4854_p12, %p4853_p10 }
  0x77   : > { %p4851_p9 = pneg %p4850_p7  ;;  %p4857_p2 = por %p4856_p11, %p4855_p3 }
  0x79   : > { %p4858_p0 = pnand %p4857_p2, %p4851_p9 }
  0x7b   : > { %4861 = shalt.err (!%p4858_p0)
}
  0x7c   : > { %s4862_s11 = scalar_lea.vmem %s5391_s8, 2048  ;;  %s5140_s17 = smov [#allocation10]  }
  0x7d   : > { %p4863_p1 = scmp.ne.s32.totalorder %s5391_s8, %s4862_s11  ;;  %s4867_s21 = sshll.u32 %s5140_s17, 4  ;;  %s4868_s21 = int_to_ptr.vmem [resolvable:$false] %s4867_s21 }
  0x7e   : > { %s4869_s15 = scalar_lea.vmem %s4868_s21, 4096  ;;  %p4870_p6 = scmp.lt.s32.totalorder %s5391_s8, %s4868_s21 }
  0x7f   : > { %p4865_p7 = pnand %p4863_p1, %p4849_p4  ;;  %p4871_p10 = scmp.lt.s32.totalorder %s4869_s15, %s4862_s11 }
  0x81   : > { %p4866_p13 = pneg %p4865_p7  ;;  %p4872_p12 = por %p4871_p10, %p4870_p6 }
  0x83   : > { %p4873_p11 = pnand %p4872_p12, %p4866_p13 }
  0x85   : > { %4876 = shalt.err (!%p4873_p11)
}
  0x86   : > { %s7061_s5 = smov 8   ;;  %s7062_s22 = smov 128  }
  0x87   : > { %4258 = dma.hbm_to_vmem [thread:$0]  (!%p5402_p5), %s5396_s0, 2048, %s5391_s8, %s5408_s6, %s7062_s22, %s7062_s22, %s7061_s5  }
  0x88   : > { %s7063_s7 = sld [smem:[#allocation43_spill]] }
  0x8e   : > { %s4877_s12 = scalar_lea.hbm %s7063_s7, 4096 }
  0x8f   : > { %p4878_p6 = scmp.ne.s32.totalorder %s7063_s7, %s4877_s12  ;;  %p4884_p0 = scmp.lt.u32.totalorder %s4877_s12, %s7063_s7 }
  0x91   : > { %p4880_p2 = pnand %p4878_p6, %p5305_p8 }
  0x93   : > { %p4881_p13 = pneg %p4880_p2 }
  0x95   : > { %p4886_p4 = pnand %p4884_p0, %p4881_p13 }
  0x97   : > { %4889 = shalt.err (!%p4886_p4)
}
  0x98   : > { %s4890_s17 = scalar_lea.vmem %s382_s9, 4096  ;;  %p4898_p1 = scmp.lt.s32.totalorder %s382_s9, %s382_s9 }
  0x99   : > { %p4891_p5 = scmp.ne.s32.totalorder %s382_s9, %s4890_s17  ;;  %p4899_p7 = scmp.lt.s32.totalorder %s4890_s17, %s4890_s17 }
  0x9b   : > { %p4893_p9 = pnand %p4891_p5, %p5305_p8  ;;  %p4900_p10 = por %p4899_p7, %p4898_p1 }
  0x9d   : > { %p4894_p3 = pneg %p4893_p9 }
  0x9f   : > { %p4901_p12 = pnand %p4900_p10, %p4894_p3 }
  0xa1   : > { %4904 = shalt.err (!%p4901_p12)
}
  0xa2   : > { %s5141_s0 = smov 256   ;;  %s5142_s8 = smov 16  }
  0xa3   : > { %p7064_p11 = scmp.ne.s32.totalorder %s7049_s18, 0  ;;  %s5143_s28 = smov [#allocation18]  }
  0xa4   : > { %s410_s1 = sshll.u32 %s5143_s28, 4  ;;  %s7065_s10 = sld [smem:[#allocation46_spill]]  ;;  %s411_s1 = int_to_ptr.vmem [resolvable:$true] %s410_s1 }
  0xa5   : > { %4245 = dma.hbm_to_vmem [thread:$0]  (!%p7064_p11), %s7063_s7, 4096, %s382_s9, [#allocation14], %s5141_s0, %s5141_s0, %s5142_s8  }
  0xaa   : > { %s4905_s20 = scalar_lea.hbm %s7065_s10, 1024 }
  0xab   : > { %p4906_p6 = scmp.ne.s32.totalorder %s7065_s10, %s4905_s20  ;;  %p4912_p0 = scmp.lt.u32.totalorder %s4905_s20, %s7065_s10 }
  0xad   : > { %p4908_p2 = pnand %p4906_p6, %p5305_p8 }
  0xaf   : > { %p4909_p13 = pneg %p4908_p2 }
  0xb1   : > { %p4914_p4 = pnand %p4912_p0, %p4909_p13 }
  0xb3   : > { %4917 = shalt.err (!%p4914_p4)
}
  0xb4   : > { %s4918_s9 = scalar_lea.vmem %s411_s1, 1024  ;;  %p4926_p1 = scmp.lt.s32.totalorder %s411_s1, %s411_s1 }
  0xb5   : > { %p4919_p5 = scmp.ne.s32.totalorder %s411_s1, %s4918_s9  ;;  %p4927_p7 = scmp.lt.s32.totalorder %s4918_s9, %s4918_s9 }
  0xb7   : > { %p4921_p9 = pnand %p4919_p5, %p5305_p8  ;;  %p4928_p10 = por %p4927_p7, %p4926_p1 }
  0xb9   : > { %p4922_p3 = pneg %p4921_p9 }
  0xbb   : > { %p4929_p12 = pnand %p4928_p10, %p4922_p3 }
  0xbd   : > { %4932 = shalt.err (!%p4929_p12)
}
  0xbe   : > { %s7066_s0 = smov 4   ;;  %s7067_s8 = smov 64  }
  0xbf   : > { %4251 = dma.hbm_to_vmem [thread:$0]  (!%p7064_p11), %s7065_s10, 1024, %s411_s1, [#allocation17], %s7067_s8, %s7067_s8, %s7066_s0  }
  0xc0   : > { %s3832_s18 = sadd.s32 4294967294, %s5131_s13   ;;  %s52_s16 = sadd.s32 1, %s5111_s26 }
  0xc1   : > { %p59_p8 = scmp.ne.s32.totalorder %s5111_s26, %s5107_s25  ;;  %p7068_p6 = scmp.eq.s32.totalorder %s5381_s3, 0 }
  0xc2   : > { %p7070_p2 = scmp.eq.s32.totalorder %s5131_s13, 0  ;;  %p65_p0 = scmp.ne.s32.totalorder %s5107_s25, %s5103_s24 }
  0xc3   : > { %s5486_s15 = scalar_select %p7068_p6, %s5111_s26, %s52_s16  }
  0xc4   : > { %p61_p13 = por %p7070_p2, %p59_p8  ;;  %p7071_p4 = scmp.eq.s32.totalorder %s5277_s14, 7 }
  0xc5   : > { %7069 = sst [smem:[#allocation35_spill]] %s5486_s15  ;;  %p343_p9 = scmp.eq.s32.totalorder %s3832_s18, 7 }
  0xc6   : > { %p5494_p5 = por %p7071_p4, %p59_p8  ;;  %p7073_p3 = scmp.eq.s32.totalorder %s5277_s14, 0 }
  0xc7   : > { %s427_s1 = sand.u32 1, %s5111_s26   ;;  %p5505_p11 = por %p343_p9, %p65_p0 }
  0xc8   : > { %s7072_s28 = scalar_select %p5494_p5, 1, 0 }
  0xc9   : > { %p5500_p1 = por %p7073_p3, %p65_p0  ;;  %s5509_s3 = sshll.u32 %s427_s1, 7 }
  0xca   : > { %s7075_s19 = scalar_select %p5505_p11, 1, 0 }
  0xcb   : > { %s3993_s20 = sshll.u32 %s5127_s30, 11  ;;  %s7076_s17 = sld [smem:[#allocation36_spill]] }
  0xcc   : > { %s431_s0 = scalar_lea.vmem [#allocation7], %s5509_s3  ;;  %p7077_p7 = scmp.lt.s32.totalorder %s5131_s13, 8 }
  0xcd   : > { %s438_s8 = sshll.u32 %s431_s0, 4  ;;  %s7079_s16 = sld [smem:[#allocation39_spill]]  ;;  %s5524_s8 = int_to_ptr.vmem [resolvable:$true] %s438_s8 }
  0xce   : > { %p5520_p10 = pnand %p7077_p7, %p61_p13  ;;  %s5531_s11 = scalar_lea.sflag [#allocation8], %s427_s1 }
  0xd0   : > { %p4935_p8 = pneg %p5520_p10 }
  0xd1   : > { %s5515_s9 = scalar_lea.hbm %s7076_s17, %s3993_s20  ;;  %s4938_s30 = scalar_lea.hbm %s7076_s17, 4096 }
  0xd2   : > { %s4933_s7 = scalar_lea.hbm %s5515_s9, 2048  ;;  %p4939_p13 = scmp.lt.u32.totalorder %s5515_s9, %s7076_s17 }
  0xd3   : > { %s5529_s27 = scalar_lea.hbm %s7079_s16, %s3993_s20  ;;  %p4934_p12 = scmp.ne.s32.totalorder %s5515_s9, %s4933_s7 }
  0xd4   : > { %p4940_p0 = scmp.lt.u32.totalorder %s4938_s30, %s4933_s7  ;;  %p4942_p9 = scmp.lt.u32.totalorder %s4933_s7, %s5515_s9 }
  0xd5   : > { %p4936_p6 = pnand %p4935_p8, %p4934_p12 }
  0xd6   : > { %p4941_p4 = por %p4940_p0, %p4939_p13 }
  0xd7   : > { %p4937_p2 = pneg %p4936_p6 }
  0xd8   : > { %p4943_p3 = por %p4942_p9, %p4941_p4 }
  0xda   : > { %p4944_p7 = pnand %p4943_p3, %p4937_p2 }
  0xdc   : > { %4947 = shalt.err (!%p4944_p7)
}
  0xdd   : > { %s4948_s1 = scalar_lea.vmem %s5524_s8, 2048  ;;  %s5144_s10 = smov [#allocation7]  }
  0xde   : > { %p4949_p12 = scmp.ne.s32.totalorder %s5524_s8, %s4948_s1  ;;  %s4953_s20 = sshll.u32 %s5144_s10, 4  ;;  %s4954_s20 = int_to_ptr.vmem [resolvable:$false] %s4953_s20 }
  0xdf   : > { %s4955_s29 = scalar_lea.vmem %s4954_s20, 4096  ;;  %p4956_p5 = scmp.lt.s32.totalorder %s5524_s8, %s4954_s20 }
  0xe0   : > { %p4951_p6 = pnand %p4949_p12, %p4935_p8  ;;  %p4957_p13 = scmp.lt.s32.totalorder %s4955_s29, %s4948_s1 }
  0xe2   : > { %p4952_p11 = pneg %p4951_p6  ;;  %p4958_p0 = por %p4957_p13, %p4956_p5 }
  0xe4   : > { %p4959_p4 = pnand %p4958_p0, %p4952_p11 }
  0xe6   : > { %4962 = shalt.err (!%p4959_p4)
}
  0xe7   : > { %4255 = dma.hbm_to_vmem [thread:$0]  (!%p5520_p10), %s5515_s9, 2048, %s5524_s8, %s5531_s11, %s7062_s22, %s7062_s22, %s7061_s5  }
  0xe8   : > { %s481_s7 = scalar_lea.vmem [#allocation12], %s5509_s3  ;;  %s4963_s15 = scalar_lea.hbm %s5529_s27, 2048 }
  0xe9   : > { %s488_s30 = sshll.u32 %s481_s7, 4  ;;  %p4964_p5 = scmp.ne.s32.totalorder %s5529_s27, %s4963_s15  ;;  %s5563_s30 = int_to_ptr.vmem [resolvable:$true] %s488_s30 }
  0xea   : > { %s4968_s0 = scalar_lea.hbm %s7079_s16, 4096  ;;  %p4969_p9 = scmp.lt.u32.totalorder %s5529_s27, %s7079_s16 }
  0xeb   : > { %p4966_p11 = pnand %p4964_p5, %p4935_p8  ;;  %p4970_p3 = scmp.lt.u32.totalorder %s4968_s0, %s4963_s15 }
  0xec   : > { %p4972_p12 = scmp.lt.u32.totalorder %s4963_s15, %s5529_s27 }
  0xed   : > { %p4967_p2 = pneg %p4966_p11  ;;  %p4971_p7 = por %p4970_p3, %p4969_p9 }
  0xef   : > { %p4973_p6 = por %p4972_p12, %p4971_p7 }
  0xf1   : > { %p4974_p13 = pnand %p4973_p6, %p4967_p2 }
  0xf3   : > { %4977 = shalt.err (!%p4974_p13)
}
  0xf4   : > { %s4978_s3 = scalar_lea.vmem %s5563_s30, 2048  ;;  %s5145_s9 = smov [#allocation12]  }
  0xf5   : > { %p4979_p0 = scmp.ne.s32.totalorder %s5563_s30, %s4978_s3  ;;  %s4983_s8 = sshll.u32 %s5145_s9, 4  ;;  %s4984_s8 = int_to_ptr.vmem [resolvable:$false] %s4983_s8 }
  0xf6   : > { %s4985_s11 = scalar_lea.vmem %s4984_s8, 4096  ;;  %p4986_p11 = scmp.lt.s32.totalorder %s5563_s30, %s4984_s8 }
  0xf7   : > { %p4981_p4 = pnand %p4979_p0, %p4935_p8  ;;  %p4987_p9 = scmp.lt.s32.totalorder %s4985_s11, %s4978_s3 }
  0xf9   : > { %p4982_p5 = pneg %p4981_p4  ;;  %p4988_p3 = por %p4987_p9, %p4986_p11 }
  0xfb   : > { %p4989_p7 = pnand %p4988_p3, %p4982_p5 }
  0xfd   : > { %4992 = shalt.err (!%p4989_p7)
}
  0xfe   : > { %4261 = dma.hbm_to_vmem [thread:$0]  (!%p5520_p10), %s5529_s27, 2048, %s5563_s30, %s5408_s6, %s7062_s22, %s7062_s22, %s7061_s5  }
  0xff   : > { %s7080_s20 = sld [smem:[#allocation31_spill]] }
 0x105   : > { %p7081_p8 = scmp.ne.s32.totalorder %s7080_s20, 0 }
 0x106   : > { %s5595_s29 = sand.u32 (!%p7081_p8), 1, %s5107_s25  }
 0x107   : > { %500 = sbr.rel (%p7081_p8) target bundleno = 2666 (0xa6a), region = 68  ;;  %s3850_s7 = sshll.u32 (!%p7081_p8), %s5595_s29, 7 }
 0x108   : > { %s503_s15 = scalar_lea.sflag (!%p7081_p8), [#allocation8], %s5595_s29  ;;  %s5599_s21 = scalar_lea.vmem (!%p7081_p8), [#allocation7], %s3850_s7 }
 0x10e   : > { %5066 = dma.done.wait (%p5500_p1), %s503_s15, 2048  }
 0x10f   : > { %5068 = vsyncadd (%p5500_p1), %s503_s15, 4294965248  ;;  %s7082_s6 = sld [smem:[#allocation26_spill]]  ;;  %s7083_s5 = sld [smem:[#allocation34_spill]] }
 0x110   : > { %s511_s22 = sand.u32 1, %s5277_s14  }
 0x111   : > { %s512_s30 = scalar_lea.sflag [#allocation11], %s511_s22 }
 0x115   : > { %s513_s2 = sand.u32 1, %s7082_s6   ;;  %p7084_p10 = scmp.ne.s32.totalorder %s7083_s5, 0 }
 0x116   : > { %s3851_s27 = sshll.u32 %s513_s2, 7 }
 0x117   : > { %s5607_s18 = scalar_lea.vmem [#allocation10], %s3851_s27 }
 0x118   : > { %5070 = dma.done.wait (%p7084_p10), %s512_s30, 2048  }
 0x119   : > { %5072 = vsyncadd (%p7084_p10), %s512_s30, 4294965248  ;;  %s5613_s0 = scalar_lea.vmem [#allocation12], %s3850_s7 }
 0x11a   : > { %5074 = dma.done.wait (%p5500_p1), %s512_s30, 2048  }
 0x11b   : > { %5076 = vsyncadd (%p5500_p1), %s512_s30, 4294965248  ;;  %p7085_p2 = scmp.eq.s32.totalorder %s5277_s14, 0 }
 0x11d   : > { %5078 = dma.done.wait (%p7085_p2), [#allocation14], 6144   ;;  %p7086_p12 = pmov %p7085_p2 }
 0x11e   : > { %p7087_p6 = pmov %p7085_p2 }
 0x11f   : > { %5080 = vsyncadd (%p7086_p12), [#allocation14], 4294961152 }
 0x120   : > { %5082 = dma.done.wait (%p7087_p6), [#allocation17], 2048   ;;  %p7088_p13 = pmov %p7085_p2 }
 0x121   : > { %s7089_s1 = sld [smem:[#allocation28_spill]]  ;;  %s7090_s3 = sld [smem:[#allocation37_spill]] }
 0x122   : > { %5084 = vsyncadd (%p7088_p13), [#allocation17], 4294965248  ;;  %s5635_s8 = scalar_lea.vmem [#allocation19], %s3850_s7  ;;  %s7091_s11 = sld [smem:[#allocation27_spill]] }
 0x127   : > { %p594_p0 = scmp.lt.s32.totalorder %s7089_s1, 1 }
 0x128   : > { %p3858_p1 = scmp.ne.s32.totalorder %s7091_s11, 0 }
 0x129   : > { %s7122_s1 = smov (!%p594_p0, %s7089_s1), 1  ;;  %v618_v0 = vld [vmem:[%s5613_s0] sm:$0xff] (!%p3858_p1)  ;;  %v620_v1 = vld [vmem:[%s5613_s0 + $0x10] sm:$0xff] (!%p3858_p1)  ;;  %v619_v2 = vld [vmem:[%s5613_s0 + $0x8] sm:$0xff] (!%p3858_p1)  ;;  %s7092_s7 = sld [smem:[#allocation40_spill]] (!%p3858_p1)  ;;  %vm1967_vm0 = vcmask (!%p3858_p1), 261120  }
 0x12a   : > { %s596_s9 = scalar_lea.vmem %s7090_s3, %s7122_s1  ;;  %601 = sbr.rel (%p3858_p1) target bundleno = 1349 (0x545), region = 100  ;;  %811 = vadd.xlane.f32.xlu0 (!%p3858_p1), %v618_v0  ;;  %815 = vadd.xlane.f32.xlu1 (!%p3858_p1), %v620_v1  ;;  %v621_v3 = vld [vmem:[%s5613_s0 + $0x18] sm:$0xff] (!%p3858_p1)  ;;  %v622_v4 = vld [vmem:[%s5613_s0 + $0x20] sm:$0xff] (!%p3858_p1)  ;;  %v623_v5 = vld [vmem:[%s5613_s0 + $0x28] sm:$0xff] (!%p3858_p1) }
 0x12b   : > { %v5645_v6 = vld [vmem:[%s5613_s0 + $0x30] sm:$0xff] (!%p3858_p1)  ;;  %v5648_v7 = vld [vmem:[%s5613_s0 + $0x38] sm:$0xff] (!%p3858_p1)  ;;  %v5651_v8 = vld [vmem:[%s5613_s0 + $0x40] sm:$0xff] (!%p3858_p1)  ;;  %s7093_s6 = sld [smem:[#allocation42_spill]] (!%p3858_p1)  ;;  %s7094_s2 = sld [smem:[#allocation44_spill]] (!%p3858_p1) }
 0x12c   : > { %v5654_v9 = vld [vmem:[%s5613_s0 + $0x48] sm:$0xff] (!%p3858_p1)  ;;  %v5659_v10 = vld [vmem:[%s5613_s0 + $0x50] sm:$0xff] (!%p3858_p1)  ;;  %v5662_v11 = vld [vmem:[%s5613_s0 + $0x58] sm:$0xff] (!%p3858_p1)  ;;  %s5147_s27 = smov (!%p3858_p1), 96   ;;  %s5148_s30 = smov (!%p3858_p1), 64  }
 0x12d   : > { %v5669_v12 = vld [vmem:[%s5613_s0 + $0x60] sm:$0xff] (!%p3858_p1)  ;;  %v5672_v13 = vld [vmem:[%s5613_s0 + $0x68] sm:$0xff] (!%p3858_p1)  ;;  %v5677_v14 = vld [vmem:[%s5613_s0 + $0x70] sm:$0xff] (!%p3858_p1)  ;;  %s5149_s12 = smov (!%p3858_p1), 32  }
 0x12e   : > { %813 = vadd.xlane.f32.xlu0 (!%p3858_p1), %v619_v2  ;;  %817 = vadd.xlane.f32.xlu1 (!%p3858_p1), %v621_v3  ;;  %v5680_v15 = vld [vmem:[%s5613_s0 + $0x78] sm:$0xff] (!%p3858_p1)  ;;  %v4383_v16 = vld [vmem:[#allocation13 + $0x4] ss:$8 sps:$4 sm:$0xff] (!%p3858_p1)   ;;  %v4385_v17 = vld [vmem:[#allocation13] ss:$8 sps:$4 sm:$0xff] (!%p3858_p1)  }
 0x12f   : > { %v4386_v18 = vld [vmem:[#allocation13 + $0x14] ss:$8 sps:$4 sm:$0xff] (!%p3858_p1)   ;;  %1126 = vmatprep.subr.bf16.mxu0 (!%p3858_p1), %v4383_v16  ;;  %4191 = vmatprep.subr.bf16.mxu1 (!%p3858_p1), %v4383_v16  ;;  %v4388_v19 = vld [vmem:[#allocation13 + $0x10] ss:$8 sps:$4 sm:$0xff] (!%p3858_p1)   ;;  %v4389_v60 = vld [vmem:[#allocation13 + $0x24] ss:$8 sps:$4 sm:$0xff] (!%p3858_p1)  }
 0x130   : > { %1127 = vmatpush1.bf16.msra.mxu0 (!%p3858_p1), %v4385_v17  ;;  %4199 = vmatpush1.bf16.msra.mxu1 (!%p3858_p1), %v4385_v17  ;;  %v4394_v16 = vld [vmem:[#allocation13 + $0x30] ss:$8 sps:$4 sm:$0xff] (!%p3858_p1)  }
 0x131   : > { %1128 = vmatprep.subr.bf16.mxu0 %v4386_v18  ;;  %4192 = vmatprep.subr.bf16.mxu1 %v4386_v18 }
 0x132   : > { %819 = vadd.xlane.f32.xlu0 %v622_v4  ;;  %821 = vadd.xlane.f32.xlu1 %v623_v5 }
 0x134   : > { %1129 = vmatpush1.bf16.msra.mxu0 %v4388_v19  ;;  %4200 = vmatpush1.bf16.msra.mxu1 %v4388_v19 }
 0x135   : > { %1130 = vmatprep.subr.bf16.mxu0 %v4389_v60  ;;  %4193 = vmatprep.subr.bf16.mxu1 %v4389_v60 }
 0x136   : > { %823 = vadd.xlane.f32.xlu0 %v5645_v6  ;;  %825 = vadd.xlane.f32.xlu1 %v5648_v7 }
 0x13a   : > { %827 = vadd.xlane.f32.xlu0 %v5651_v8  ;;  %829 = vadd.xlane.f32.xlu1 %v5654_v9 }
 0x13e   : > { %831 = vadd.xlane.f32.xlu0 %v5659_v10  ;;  %833 = vadd.xlane.f32.xlu1 %v5662_v11 }
 0x142   : > { %835 = vadd.xlane.f32.xlu0 %v5669_v12  ;;  %837 = vadd.xlane.f32.xlu1 %v5672_v13 }
 0x146   : > { %839 = vadd.xlane.f32.xlu0 %v5677_v14  ;;  %841 = vadd.xlane.f32.xlu1 %v5680_v15 }
 0x1b7   : > { %v812_v20 = vpop.xlane.xlu0 %811  ;;  %v816_v21 = vpop.xlane.xlu1 %815 }
 0x1b8   : > { %v843_v22 = vmul.f32 0.0078125, %v812_v20  ;;  %v845_v23 = vmul.f32 0.0078125, %v816_v21 }
 0x1ba   : > { %v5684_v24 = vsub.f32 %v618_v0, %v843_v22  ;;  %v5686_v25 = vsub.f32 %v620_v1, %v845_v23  ;;  %v4391_v0 = vld [vmem:[#allocation13 + $0x20] ss:$8 sps:$4 sm:$0xff]   ;;  %v4395_v23 = vld [vmem:[#allocation13 + $0x44] ss:$8 sps:$4 sm:$0xff]  }
 0x1bb   : > { %v814_v26 = vpop.xlane.xlu0 %813  ;;  %v818_v27 = vpop.xlane.xlu1 %817  ;;  %1131 = vmatpush1.bf16.msra.mxu0 %v4391_v0  ;;  %4201 = vmatpush1.bf16.msra.mxu1 %v4391_v0 }
 0x1bc   : > { %v844_v28 = vmul.f32 0.0078125, %v814_v26  ;;  %v875_v29 = vmul.f32 %v5684_v24, %v5684_v24  ;;  %v846_v30 = vmul.f32 0.0078125, %v818_v27  ;;  %v877_v31 = vmul.f32 %v5686_v25, %v5686_v25  ;;  %v4397_v26 = vld [vmem:[#allocation13 + $0x40] ss:$8 sps:$4 sm:$0xff]  }
 0x1be   : > { %891 = vadd.xlane.f32.xlu0 %v875_v29  ;;  %v5692_v32 = vsub.f32 %v619_v2, %v844_v28  ;;  %v5694_v33 = vsub.f32 %v621_v3, %v846_v30  ;;  %v4398_v29 = vld [vmem:[#allocation13 + $0x54] ss:$8 sps:$4 sm:$0xff]   ;;  %v4400_v30 = vld [vmem:[#allocation13 + $0x50] ss:$8 sps:$4 sm:$0xff]  }
 0x1bf   : > { %v820_v34 = vpop.xlane.xlu0 %819  ;;  %v822_v35 = vpop.xlane.xlu1 %821 }
 0x1c0   : > { %v847_v36 = vmul.f32 0.0078125, %v820_v34  ;;  %v876_v37 = vmul.f32 %v5692_v32, %v5692_v32  ;;  %v848_v38 = vmul.f32 0.0078125, %v822_v35  ;;  %v878_v39 = vmul.f32 %v5694_v33, %v5694_v33  ;;  %v4403_v34 = vld [vmem:[#allocation13 + $0x60] ss:$8 sps:$4 sm:$0xff]  }
 0x1c1   : > { %v5763_v35 = vld [vmem:[%s5599_s21 + $0x8] sm:$0xff] }
 0x1c2   : > { %895 = vadd.xlane.f32.xlu0 %v877_v31  ;;  %893 = vadd.xlane.f32.xlu1 %v876_v37  ;;  %v5700_v40 = vsub.f32 %v622_v4, %v847_v36  ;;  %v5702_v41 = vsub.f32 %v623_v5, %v848_v38  ;;  %v5759_v31 = vld [vmem:[%s5599_s21] sm:$0xff]  ;;  %v5766_v36 = vld [vmem:[%s5599_s21 + $0x10] sm:$0xff] }
 0x1c3   : > { %v824_v42 = vpop.xlane.xlu0 %823  ;;  %v826_v43 = vpop.xlane.xlu1 %825  ;;  %v4404_v37 = vld [vmem:[#allocation13 + $0x74] ss:$8 sps:$4 sm:$0xff]   ;;  %v4406_v38 = vld [vmem:[#allocation13 + $0x70] ss:$8 sps:$4 sm:$0xff]  }
 0x1c4   : > { %v849_v44 = vmul.f32 0.0078125, %v824_v42  ;;  %v879_v45 = vmul.f32 %v5700_v40, %v5700_v40  ;;  %v850_v46 = vmul.f32 0.0078125, %v826_v43  ;;  %v880_v47 = vmul.f32 %v5702_v41, %v5702_v41  ;;  %v5774_v42 = vld [vmem:[%s5599_s21 + $0x20] sm:$0xff] }
 0x1c5   : > { %v5146_v43 = vmov 0  }
 0x1c6   : > { %897 = vadd.xlane.f32.xlu1 %v878_v39  ;;  %899 = vadd.xlane.f32.xlu0 %v879_v45  ;;  %v5709_v48 = vsub.f32 %v5645_v6, %v849_v44  ;;  %v5712_v49 = vsub.f32 %v5648_v7, %v850_v46  ;;  %v5771_v39 = vld [vmem:[%s5599_s21 + $0x18] sm:$0xff]  ;;  %v5781_v44 = vld [vmem:[%s5599_s21 + $0x28] sm:$0xff]  ;;  %v5784_v45 = vld [vmem:[%s5599_s21 + $0x30] sm:$0xff] }
 0x1c7   : > { %v828_v50 = vpop.xlane.xlu0 %827  ;;  %v830_v51 = vpop.xlane.xlu1 %829  ;;  %1158 = vmatprep.mubr.bf16.mxu0 %v5146_v43  ;;  %1198 = vmatprep.mubr.bf16.mxu1 %v5146_v43  ;;  %v5789_v46 = vld [vmem:[%s5599_s21 + $0x38] sm:$0xff] }
 0x1c8   : > { %v851_v52 = vmul.f32 0.0078125, %v828_v50  ;;  %v881_v53 = vmul.f32 %v5709_v48, %v5709_v48  ;;  %v852_v54 = vmul.f32 0.0078125, %v830_v51  ;;  %v882_v55 = vmul.f32 %v5712_v49, %v5712_v49  ;;  %v5797_v50 = vld [vmem:[%s5599_s21 + $0x48] sm:$0xff]  ;;  %v5800_v51 = vld [vmem:[%s5599_s21 + $0x50] sm:$0xff] }
 0x1ca   : > { %901 = vadd.xlane.f32.xlu1 %v880_v47  ;;  %903 = vadd.xlane.f32.xlu0 %v881_v53  ;;  %v5719_v56 = vsub.f32 %v5651_v8, %v851_v52  ;;  %v5722_v57 = vsub.f32 %v5654_v9, %v852_v54  ;;  %v4392_v9 = vld [vmem:[#allocation13 + $0x34] ss:$8 sps:$4 sm:$0xff]   ;;  %v5792_v47 = vld [vmem:[%s5599_s21 + $0x40] sm:$0xff]  ;;  %v5813_v54 = vld [vmem:[%s5599_s21 + $0x68] sm:$0xff] }
 0x1cb   : > { %v832_v58 = vpop.xlane.xlu0 %831  ;;  %v834_v59 = vpop.xlane.xlu1 %833  ;;  %1132 = vmatprep.subr.bf16.mxu0 %v4392_v9  ;;  %4194 = vmatprep.subr.bf16.mxu1 %v4392_v9  ;;  %v5805_v52 = vld [vmem:[%s5599_s21 + $0x58] sm:$0xff]  ;;  %v5808_v53 = vld [vmem:[%s5599_s21 + $0x60] sm:$0xff] }
 0x1cc   : > { %v853_v61 = vmul.f32 0.0078125, %v832_v58  ;;  %v883_v62 = vmul.f32 %v5719_v56, %v5719_v56  ;;  %v854_v63 = vmul.f32 0.0078125, %v834_v59  ;;  %v884_v1 = vmul.f32 %v5722_v57, %v5722_v57  ;;  %1133 = vmatpush1.bf16.msra.mxu0 %v4394_v16  ;;  %4202 = vmatpush1.bf16.msra.mxu1 %v4394_v16  ;;  %v5821_v58 = vld [vmem:[%s5599_s21 + $0x78] sm:$0xff] }
 0x1cd   : > { %1134 = vmatprep.subr.bf16.mxu0 %v4395_v23  ;;  %4195 = vmatprep.subr.bf16.mxu1 %v4395_v23 }
 0x1ce   : > { %905 = vadd.xlane.f32.xlu1 %v882_v55  ;;  %907 = vadd.xlane.f32.xlu0 %v883_v62  ;;  %v5729_v2 = vsub.f32 %v5659_v10, %v853_v61  ;;  %v5732_v3 = vsub.f32 %v5662_v11, %v854_v63  ;;  %v5816_v55 = vld [vmem:[%s5599_s21 + $0x70] sm:$0xff] }
 0x1cf   : > { %v836_v4 = vpop.xlane.xlu0 %835  ;;  %v838_v5 = vpop.xlane.xlu1 %837 }
 0x1d0   : > { %v855_v6 = vmul.f32 0.0078125, %v836_v4  ;;  %v885_v7 = vmul.f32 %v5729_v2, %v5729_v2  ;;  %v856_v8 = vmul.f32 0.0078125, %v838_v5  ;;  %v886_v10 = vmul.f32 %v5732_v3, %v5732_v3  ;;  %1135 = vmatpush1.bf16.msra.mxu0 %v4397_v26  ;;  %4203 = vmatpush1.bf16.msra.mxu1 %v4397_v26 }
 0x1d1   : > { %1136 = vmatprep.subr.bf16.mxu0 %v4398_v29  ;;  %4196 = vmatprep.subr.bf16.mxu1 %v4398_v29 }
 0x1d2   : > { %909 = vadd.xlane.f32.xlu1 %v884_v1  ;;  %911 = vadd.xlane.f32.xlu0 %v885_v7  ;;  %v5739_v17 = vsub.f32 %v5669_v12, %v855_v6  ;;  %v5742_v11 = vsub.f32 %v5672_v13, %v856_v8 }
 0x1d3   : > { %v840_v18 = vpop.xlane.xlu0 %839  ;;  %v842_v19 = vpop.xlane.xlu1 %841 }
 0x1d4   : > { %v857_v20 = vmul.f32 0.0078125, %v840_v18  ;;  %v887_v21 = vmul.f32 %v5739_v17, %v5739_v17  ;;  %v858_v22 = vmul.f32 0.0078125, %v842_v19  ;;  %v888_v12 = vmul.f32 %v5742_v11, %v5742_v11  ;;  %1137 = vmatpush1.bf16.msra.mxu0 %v4400_v30  ;;  %4204 = vmatpush1.bf16.msra.mxu1 %v4400_v30 }
 0x1d6   : > { %913 = vadd.xlane.f32.xlu1 %v886_v10  ;;  %915 = vadd.xlane.f32.xlu0 %v887_v21  ;;  %v5749_v13 = vsub.f32 %v5677_v14, %v857_v20  ;;  %v5752_v27 = vsub.f32 %v5680_v15, %v858_v22  ;;  %v4401_v15 = vld [vmem:[#allocation13 + $0x64] ss:$8 sps:$4 sm:$0xff]  }
 0x1d7   : > { %1138 = vmatprep.subr.bf16.mxu0 %v4401_v15  ;;  %4197 = vmatprep.subr.bf16.mxu1 %v4401_v15 }
 0x1d8   : > { %v889_v28 = vmul.f32 %v5749_v13, %v5749_v13  ;;  %v890_v14 = vmul.f32 %v5752_v27, %v5752_v27  ;;  %1139 = vmatpush1.bf16.msra.mxu0 %v4403_v34  ;;  %4205 = vmatpush1.bf16.msra.mxu1 %v4403_v34  ;;  %v5828_v34 = vld [vmem:[%s7092_s7] ss:$0 sm:$0xff] }
 0x1d9   : > { %1140 = vmatprep.subr.bf16.mxu0 %v4404_v37  ;;  %4198 = vmatprep.subr.bf16.mxu1 %v4404_v37 }
 0x1da   : > { %917 = vadd.xlane.f32.xlu1 %v888_v12  ;;  %919 = vadd.xlane.f32.xlu0 %v889_v28 }
 0x1dc   : > { %1141 = vmatpush1.bf16.msra.mxu0 %v4406_v38  ;;  %4206 = vmatpush1.bf16.msra.mxu1 %v4406_v38 }
 0x1de   : > { %921 = vadd.xlane.f32.xlu1 %v890_v14  ;;  %634 = vadd.xlane.f32.xlu0 %v5759_v31 }
 0x1e2   : > { %636 = vadd.xlane.f32.xlu1 %v5763_v35  ;;  %638 = vadd.xlane.f32.xlu0 %v5766_v36 }
 0x1e6   : > { %640 = vadd.xlane.f32.xlu1 %v5771_v39  ;;  %642 = vadd.xlane.f32.xlu0 %v5774_v42 }
 0x1ea   : > { %644 = vadd.xlane.f32.xlu1 %v5781_v44  ;;  %646 = vadd.xlane.f32.xlu0 %v5784_v45 }
 0x1ee   : > { %648 = vadd.xlane.f32.xlu1 %v5789_v46  ;;  %650 = vadd.xlane.f32.xlu0 %v5792_v47 }
 0x1f2   : > { %652 = vadd.xlane.f32.xlu1 %v5797_v50  ;;  %654 = vadd.xlane.f32.xlu0 %v5800_v51 }
 0x1f6   : > { %656 = vadd.xlane.f32.xlu1 %v5805_v52  ;;  %658 = vadd.xlane.f32.xlu0 %v5808_v53 }
 0x1fa   : > { %660 = vadd.xlane.f32.xlu1 %v5813_v54  ;;  %662 = vadd.xlane.f32.xlu0 %v5816_v55 }
 0x1fe   : > { %664 = vadd.xlane.f32.xlu1 %v5821_v58 }
 0x24b   : > { %v892_v59 = vpop.xlane.xlu0 %891 }
 0x24c   : > { %v923_v60 = vmul.f32 0.0078125, %v892_v59 }
 0x24e   : > { %v939_v61 = vadd.f32 1e-05, %v923_v60 }
 0x24f   : > { %v894_v62 = vpop.xlane.xlu1 %893  ;;  %v896_v63 = vpop.xlane.xlu0 %895 }
 0x250   : > { %4455 = vrsqrt.f32 %v939_v61  ;;  %v924_v0 = vmul.f32 0.0078125, %v894_v62  ;;  %v925_v1 = vmul.f32 0.0078125, %v896_v63 }
 0x252   : > { %v940_v4 = vadd.f32 1e-05, %v924_v0  ;;  %v941_v5 = vadd.f32 1e-05, %v925_v1 }
 0x253   : > { %v898_v6 = vpop.xlane.xlu1 %897  ;;  %v900_v7 = vpop.xlane.xlu0 %899 }
 0x254   : > { %4457 = vrsqrt.f32 %v940_v4  ;;  %v926_v8 = vmul.f32 0.0078125, %v898_v6  ;;  %v927_v18 = vmul.f32 0.0078125, %v900_v7 }
 0x255   : > { %4459 = vrsqrt.f32 %v941_v5 }
 0x256   : > { %v942_v9 = vadd.f32 1e-05, %v926_v8  ;;  %v943_v26 = vadd.f32 1e-05, %v927_v18 }
 0x257   : > { %v902_v16 = vpop.xlane.xlu1 %901  ;;  %v904_v10 = vpop.xlane.xlu0 %903 }
 0x258   : > { %4461 = vrsqrt.f32 %v942_v9  ;;  %v928_v19 = vmul.f32 0.0078125, %v902_v16  ;;  %v929_v28 = vmul.f32 0.0078125, %v904_v10 }
 0x25a   : > { %v4456_v20 = vpop.eup %4455  ;;  %v944_v21 = vadd.f32 1e-05, %v928_v19  ;;  %v945_v63 = vadd.f32 1e-05, %v929_v28 }
 0x25b   : > { %v906_v22 = vpop.xlane.xlu1 %905  ;;  %v908_v23 = vpop.xlane.xlu0 %907  ;;  %v971_v29 = vmul.f32 %v4456_v20, %v5684_v24 }
 0x25c   : > { %v931_v12 = vmul.f32 0.0078125, %v908_v23  ;;  %4463 = vrsqrt.f32 %v944_v21  ;;  %v930_v14 = vmul.f32 0.0078125, %v906_v22 }
 0x25d   : > { %4465 = vrsqrt.f32 %v943_v26  ;;  %v994_v24 = vmul.f32 %v5828_v34, %v971_v29 }
 0x25e   : > { %v4458_v30 = vpop.eup %4457  ;;  %v947_v15 = vadd.f32 1e-05, %v931_v12  ;;  %v946_v4 = vadd.f32 1e-05, %v930_v14 }
 0x25f   : > { %v910_v37 = vpop.xlane.xlu1 %909  ;;  %v912_v38 = vpop.xlane.xlu0 %911  ;;  %v972_v59 = vmul.f32 %v4458_v30, %v5692_v32 }
 0x260   : > { %v932_v60 = vmul.f32 0.0078125, %v910_v37  ;;  %v933_v61 = vmul.f32 0.0078125, %v912_v38  ;;  %v4460_v62 = vpop.eup %4459  ;;  %4467 = vrsqrt.f32 %v947_v15 }
 0x261   : > { %v995_v0 = vmul.f32 %v5828_v34, %v972_v59  ;;  %v973_v10 = vmul.f32 %v4460_v62, %v5686_v25 }
 0x262   : > { %v4462_v1 = vpop.eup %4461  ;;  %v948_v5 = vadd.f32 1e-05, %v932_v60  ;;  %v949_v6 = vadd.f32 1e-05, %v933_v61 }
 0x263   : > { %v914_v7 = vpop.xlane.xlu1 %913  ;;  %v916_v8 = vpop.xlane.xlu0 %915  ;;  %v1010_v9 = vpack.c.bf16 %v995_v0, %v994_v24  ;;  %v974_v16 = vmul.f32 %v4462_v1, %v5694_v33  ;;  %v996_v33 = vmul.f32 %v5828_v34, %v973_v10 }
 0x264   : > { %4469 = vrsqrt.f32 %v948_v5  ;;  %v934_v32 = vmul.f32 0.0078125, %v914_v7  ;;  %v935_v23 = vmul.f32 0.0078125, %v916_v8 }
 0x265   : > { %4471 = vrsqrt.f32 %v945_v63  ;;  %1159 = vmatmul.mubr.bf16.vlgmr.msra.gmra.mrb[0].mxu0 %v1010_v9  ;;  %v997_v21 = vmul.f32 %v5828_v34, %v974_v16 }
 0x266   : > { %4473 = vrsqrt.f32 %v946_v4  ;;  %v950_v18 = vadd.f32 1e-05, %v934_v32  ;;  %1168 = vmatprep.mubr.bf16.mxu0 %v5146_v43  ;;  %v4464_v22 = vpop.eup %4463  ;;  %v951_v37 = vadd.f32 1e-05, %v935_v23 }
 0x267   : > { %4475 = vrsqrt.f32 %v949_v6  ;;  %v918_v19 = vpop.xlane.xlu1 %917  ;;  %v920_v20 = vpop.xlane.xlu0 %919  ;;  %v1011_v14 = vpack.c.bf16 %v997_v21, %v996_v33  ;;  %v976_v15 = vmul.f32 %v4464_v22, %v5702_v41 }
 0x268   : > { %4477 = vrsqrt.f32 %v950_v18  ;;  %v936_v26 = vmul.f32 0.0078125, %v918_v19  ;;  %v4466_v12 = vpop.eup %4465  ;;  %v937_v62 = vmul.f32 0.0078125, %v920_v20 }
 0x269   : > { %v975_v59 = vmul.f32 %v4466_v12, %v5700_v40  ;;  %v999_v41 = vmul.f32 %v5828_v34, %v976_v15 }
 0x26a   : > { %v952_v28 = vadd.f32 1e-05, %v936_v26  ;;  %v4468_v29 = vpop.eup %4467  ;;  %v953_v10 = vadd.f32 1e-05, %v937_v62 }
 0x26b   : > { %v922_v30 = vpop.xlane.xlu1 %921  ;;  %v635_v25 = vpop.xlane.xlu0 %634  ;;  %v979_v60 = vmul.f32 %v4468_v29, %v5719_v56 }
 0x26c   : > { %v667_v38 = vmul.f32 0.0078125, %v635_v25  ;;  %4479 = vrsqrt.f32 %v952_v28  ;;  %v938_v63 = vmul.f32 0.0078125, %v922_v30 }
 0x26d   : > { %1169 = vmatmul.mubr.bf16.gmra.mrb[4].mxu0 %v1011_v14  ;;  %4481 = vrsqrt.f32 %v951_v37  ;;  %v1002_v9 = vmul.f32 %v5828_v34, %v979_v60 }
 0x26e   : > { %v4470_v61 = vpop.eup %4469  ;;  %v5842_v24 = vsub.f32 %v5759_v31, %v667_v38  ;;  %1178 = vmatprep.mubr.bf16.mxu0 %v5146_v43  ;;  %v998_v31 = vmul.f32 %v5828_v34, %v975_v59  ;;  %v954_v18 = vadd.f32 1e-05, %v938_v63 }
 0x26f   : > { %v4472_v0 = vpop.eup %4471  ;;  %v637_v1 = vpop.xlane.xlu1 %636  ;;  %v980_v5 = vmul.f32 %v4470_v61, %v5722_v57 }
 0x270   : > { %v639_v4 = vpop.xlane.xlu0 %638  ;;  %v4474_v6 = vpop.eup %4473  ;;  %v668_v40 = vmul.f32 0.0078125, %v637_v1  ;;  %v699_v7 = vmul.f32 %v5842_v24, %v5842_v24  ;;  %v1012_v22 = vpack.c.bf16 %v999_v41, %v998_v31  ;;  %4483 = vrsqrt.f32 %v954_v18 }
 0x271   : > { %v669_v56 = vmul.f32 0.0078125, %v639_v4  ;;  %v4476_v8 = vpop.eup %4475  ;;  %v1003_v16 = vmul.f32 %v5828_v34, %v980_v5  ;;  %v978_v26 = vmul.f32 %v4474_v6, %v5712_v49  ;;  %4485 = vrsqrt.f32 %v953_v10 }
 0x272   : > { %v4478_v32 = vpop.eup %4477  ;;  %715 = vadd.xlane.f32.xlu0 %v699_v7  ;;  %v5853_v57 = vsub.f32 %v5763_v35, %v668_v40  ;;  %v981_v30 = vmul.f32 %v4476_v8, %v5729_v2 }
 0x273   : > { %v5856_v19 = vsub.f32 %v5766_v36, %v669_v56  ;;  %v641_v20 = vpop.xlane.xlu1 %640  ;;  %v1014_v23 = vpack.c.bf16 %v1003_v16, %v1002_v9  ;;  %v982_v33 = vmul.f32 %v4478_v32, %v5732_v3  ;;  %v977_v36 = vmul.f32 %v4472_v0, %v5709_v48 }
 0x274   : > { %v643_v21 = vpop.xlane.xlu0 %642  ;;  %v670_v12 = vmul.f32 0.0078125, %v641_v20  ;;  %v700_v29 = vmul.f32 %v5853_v57, %v5853_v57  ;;  %v1001_v48 = vmul.f32 %v5828_v34, %v978_v26  ;;  %v1004_v60 = vmul.f32 %v5828_v34, %v981_v30 }
 0x275   : > { %v671_v28 = vmul.f32 0.0078125, %v643_v21  ;;  %v701_v35 = vmul.f32 %v5856_v19, %v5856_v19  ;;  %1179 = vmatmul.mubr.bf16.gmra.mrb[8].mxu0 %v1012_v22  ;;  %1199 = vmatmul.mubr.bf16.vlgmr.msra.gmra.mrb[0].mxu1 %v1014_v23  ;;  %v1005_v2 = vmul.f32 %v5828_v34, %v982_v33  ;;  %v1000_v59 = vmul.f32 %v5828_v34, %v977_v36 }
 0x276   : > { %717 = vadd.xlane.f32.xlu1 %v700_v29  ;;  %v5870_v49 = vsub.f32 %v5771_v39, %v670_v12  ;;  %1188 = vmatprep.mubr.bf16.mxu0 %v5146_v43  ;;  %v4480_v15 = vpop.eup %4479 }
 0x277   : > { %v5867_v25 = vsub.f32 %v5774_v42, %v671_v28  ;;  %719 = vadd.xlane.f32.xlu0 %v701_v35  ;;  %v645_v3 = vpop.xlane.xlu1 %644  ;;  %1208 = vmatprep.mubr.bf16.mxu1 %v5146_v43  ;;  %v4482_v61 = vpop.eup %4481  ;;  %v1013_v4 = vpack.c.bf16 %v1001_v48, %v1000_v59  ;;  %v1015_v41 = vpack.c.bf16 %v1005_v2, %v1004_v60  ;;  %v4412_v60 = vld [vmem:[#allocation15 + $0x4] ss:$16 sps:$4 sm:$0xff]  }
 0x278   : > { %v647_v14 = vpop.xlane.xlu0 %646  ;;  %v672_v37 = vmul.f32 0.0078125, %v645_v3  ;;  %v702_v38 = vmul.f32 %v5870_v49, %v5870_v49  ;;  %v984_v5 = vmul.f32 %v4480_v15, %v5742_v11  ;;  %v983_v7 = vmul.f32 %v4482_v61, %v5739_v17  ;;  %v4407_v61 = vld [vmem:[#allocation15 + $0x8] ss:$16 sps:$4 sm:$0xff]   ;;  %1589 = vmatprep.subr.bf16.mxu1 %v4412_v60 }
 0x279   : > { %v673_v42 = vmul.f32 0.0078125, %v647_v14  ;;  %v703_v39 = vmul.f32 %v5867_v25, %v5867_v25 }
 0x27a   : > { %721 = vadd.xlane.f32.xlu1 %v702_v38  ;;  %v5886_v63 = vsub.f32 %v5781_v44, %v672_v37  ;;  %v1007_v9 = vmul.f32 %v5828_v34, %v984_v5  ;;  %v4484_v16 = vpop.eup %4483  ;;  %v4421_v5 = vld [vmem:[#allocation15 + $0x4c] ss:$16 sps:$4 sm:$0xff]  }
 0x27b   : > { %v5883_v62 = vsub.f32 %v5784_v45, %v673_v42  ;;  %723 = vadd.xlane.f32.xlu0 %v703_v39  ;;  %v649_v0 = vpop.xlane.xlu1 %648  ;;  %v4486_v18 = vpop.eup %4485  ;;  %v986_v33 = vmul.f32 %v4484_v16, %v5752_v27  ;;  %v4436_v16 = vld [vmem:[#allocation15 + $0x84] ss:$16 sps:$4 sm:$0xff]  }
 0x27c   : > { %v651_v1 = vpop.xlane.xlu0 %650  ;;  %v674_v6 = vmul.f32 0.0078125, %v649_v0  ;;  %v704_v56 = vmul.f32 %v5886_v63, %v5886_v63  ;;  %v4410_v0 = vld [vmem:[#allocation15] ss:$16 sps:$4 sm:$0xff]  }
 0x27d   : > { %v675_v40 = vmul.f32 0.0078125, %v651_v1  ;;  %v705_v45 = vmul.f32 %v5883_v62, %v5883_v62  ;;  %1189 = vmatmul.mubr.bf16.gmra.mrb[12].mxu0 %v1013_v4  ;;  %1209 = vmatmul.mubr.bf16.gmra.mrb[4].mxu1 %v1015_v41  ;;  %v1009_v3 = vmul.f32 %v5828_v34, %v986_v33  ;;  %v4415_v1 = vld [vmem:[#allocation15 + $0x2c] ss:$16 sps:$4 sm:$0xff]   ;;  %v4418_v4 = vld [vmem:[#allocation15 + $0x24] ss:$16 sps:$4 sm:$0xff]  }
 0x27e   : > { %725 = vadd.xlane.f32.xlu1 %v704_v56  ;;  %v5898_v8 = vsub.f32 %v5789_v46, %v674_v6  ;;  %1218 = vmatprep.mubr.bf16.mxu1 %v5146_v43  ;;  %v1006_v46 = vmul.f32 %v5828_v34, %v983_v7  ;;  %v4416_v41 = vld [vmem:[#allocation15 + $0x20] ss:$16 sps:$4 sm:$0xff]   ;;  %v4424_v6 = vld [vmem:[#allocation15 + $0x44] ss:$16 sps:$4 sm:$0xff]  }
 0x27f   : > { %v5895_v44 = vsub.f32 %v5792_v47, %v675_v40  ;;  %727 = vadd.xlane.f32.xlu0 %v705_v45  ;;  %v653_v11 = vpop.xlane.xlu1 %652  ;;  %1734 = vmatprep.mubr.bf16.mxu0 %v5146_v43  ;;  %v4419_v40 = vld [vmem:[#allocation15 + $0x48] ss:$16 sps:$4 sm:$0xff]   ;;  %v4422_v56 = vld [vmem:[#allocation15 + $0x40] ss:$16 sps:$4 sm:$0xff]   ;;  %v4427_v45 = vld [vmem:[#allocation15 + $0x6c] ss:$16 sps:$4 sm:$0xff]  }
 0x280   : > { %v655_v31 = vpop.xlane.xlu0 %654  ;;  %v676_v32 = vmul.f32 0.0078125, %v653_v11  ;;  %v706_v17 = vmul.f32 %v5898_v8, %v5898_v8  ;;  %v1016_v26 = vpack.c.bf16 %v1007_v9, %v1006_v46  ;;  %1590 = vmatpush1.bf16.msra.mxu1 %v4410_v0  ;;  %v4430_v7 = vld [vmem:[#allocation15 + $0x64] ss:$16 sps:$4 sm:$0xff]   ;;  %v4425_v11 = vld [vmem:[#allocation15 + $0x68] ss:$16 sps:$4 sm:$0xff]  }
 0x281   : > { %v677_v10 = vmul.f32 0.0078125, %v655_v31  ;;  %v707_v47 = vmul.f32 %v5895_v44, %v5895_v44  ;;  %1591 = vmatprep.subr.bf16.mxu1 %v4418_v4  ;;  %v4428_v31 = vld [vmem:[#allocation15 + $0x60] ss:$16 sps:$4 sm:$0xff]   ;;  %v4433_v9 = vld [vmem:[#allocation15 + $0x8c] ss:$16 sps:$4 sm:$0xff]  }
 0x282   : > { %v5909_v20 = vsub.f32 %v5797_v50, %v676_v32  ;;  %729 = vadd.xlane.f32.xlu1 %v706_v17  ;;  %v985_v50 = vmul.f32 %v4486_v18, %v5749_v13  ;;  %v4431_v32 = vld [vmem:[#allocation15 + $0x88] ss:$16 sps:$4 sm:$0xff]   ;;  %v4439_v17 = vld [vmem:[#allocation15 + $0xac] ss:$16 sps:$4 sm:$0xff]   ;;  %v4440_v46 = vld [vmem:[#allocation15 + $0xa0] ss:$16 sps:$4 sm:$0xff]  }
 0x283   : > { %v5912_v21 = vsub.f32 %v5800_v51, %v677_v10  ;;  %731 = vadd.xlane.f32.xlu0 %v707_v47  ;;  %v657_v22 = vpop.xlane.xlu1 %656  ;;  %v4434_v10 = vld [vmem:[#allocation15 + $0x80] ss:$16 sps:$4 sm:$0xff]   ;;  %v4442_v47 = vld [vmem:[#allocation15 + $0xa4] ss:$16 sps:$4 sm:$0xff]   ;;  %v4437_v18 = vld [vmem:[#allocation15 + $0xa8] ss:$16 sps:$4 sm:$0xff]  }
 0x284   : > { %v659_v23 = vpop.xlane.xlu0 %658  ;;  %v678_v12 = vmul.f32 0.0078125, %v657_v22  ;;  %v708_v29 = vmul.f32 %v5909_v20, %v5909_v20  ;;  %v1008_v2 = vmul.f32 %v5828_v34, %v985_v50  ;;  %1592 = vmatpush1.bf16.msra.mxu1 %v4416_v41  ;;  %v4445_v22 = vld [vmem:[#allocation15 + $0xcc] ss:$16 sps:$4 sm:$0xff]   ;;  %v4446_v33 = vld [vmem:[#allocation15 + $0xc0] ss:$16 sps:$4 sm:$0xff]  }
 0x285   : > { %v679_v28 = vmul.f32 0.0078125, %v659_v23  ;;  %v709_v35 = vmul.f32 %v5912_v21, %v5912_v21  ;;  %1219 = vmatmul.mubr.bf16.gmra.mrb[8].mxu1 %v1016_v26  ;;  %1593 = vmatprep.subr.bf16.mxu1 %v4424_v6  ;;  %v4448_v23 = vld [vmem:[#allocation15 + $0xc4] ss:$16 sps:$4 sm:$0xff]   ;;  %v4443_v26 = vld [vmem:[#allocation15 + $0xc8] ss:$16 sps:$4 sm:$0xff]  }
 0x286   : > { %v5921_v51 = vsub.f32 %v5805_v52, %v678_v12  ;;  %733 = vadd.xlane.f32.xlu1 %v708_v29  ;;  %1228 = vmatprep.mubr.bf16.mxu1 %v5146_v43  ;;  %v1017_v42 = vpack.c.bf16 %v1009_v3, %v1008_v2  ;;  %v4451_v12 = vld [vmem:[#allocation15 + $0xec] ss:$16 sps:$4 sm:$0xff]   ;;  %v4449_v29 = vld [vmem:[#allocation15 + $0xe8] ss:$16 sps:$4 sm:$0xff]   ;;  %v5955_v2 = vld [vmem:[%s7093_s6] sm:$0x3] }
 0x287   : > { %v5924_v36 = vsub.f32 %v5808_v53, %v679_v28  ;;  %735 = vadd.xlane.f32.xlu0 %v709_v35  ;;  %v661_v27 = vpop.xlane.xlu1 %660  ;;  %v4454_v28 = vld [vmem:[#allocation15 + $0xe4] ss:$16 sps:$4 sm:$0xff]   ;;  %v4452_v35 = vld [vmem:[#allocation15 + $0xe0] ss:$16 sps:$4 sm:$0xff]  }
 0x288   : > { %v663_v30 = vpop.xlane.xlu0 %662  ;;  %v680_v14 = vmul.f32 0.0078125, %v661_v27  ;;  %v710_v48 = vmul.f32 %v5921_v51, %v5921_v51  ;;  %1594 = vmatpush1.bf16.msra.mxu1 %v4422_v56  ;;  %v1036_v27 = vlaneseq }
 0x289   : > { %v711_v13 = vmul.f32 %v5924_v36, %v5924_v36  ;;  %v681_v52 = vmul.f32 0.0078125, %v663_v30  ;;  %1595 = vmatprep.subr.bf16.mxu1 %v4430_v7 }
 0x28a   : > { %v5934_v53 = vsub.f32 %v5813_v54, %v680_v14  ;;  %737 = vadd.xlane.f32.xlu1 %v710_v48  ;;  %v5949_v14 = vshrl.u32 %v1036_v27, 7 }
 0x28b   : > { %739 = vadd.xlane.f32.xlu0 %v711_v13  ;;  %v5937_v15 = vsub.f32 %v5816_v55, %v681_v52  ;;  %v665_v37 = vpop.xlane.xlu1 %664  ;;  %v4409_v55 = vld [vmem:[#allocation15 + $0xc] ss:$16 sps:$4 sm:$0xff]  }
 0x28c   : > { %v682_v38 = vmul.f32 0.0078125, %v665_v37  ;;  %v712_v39 = vmul.f32 %v5934_v53, %v5934_v53  ;;  %1702 = vmatprep.subr.bf16.mxu0 %v4409_v55  ;;  %1596 = vmatpush1.bf16.msra.mxu1 %v4428_v31  ;;  %v1038_v13 = vsub.s32 0, %v5949_v14 }
 0x28d   : > { %v713_v59 = vmul.f32 %v5937_v15, %v5937_v15  ;;  %1229 = vmatmul.mubr.bf16.gmra.mrb[12].mxu1 %v1017_v42  ;;  %1703 = vmatpush1.bf16.msra.mxu0 %v4407_v61 }
 0x28e   : > { %v5944_v34 = vsub.f32 %v5821_v58, %v682_v38  ;;  %741 = vadd.xlane.f32.xlu1 %v712_v39  ;;  %1621 = vmatprep.mubr.bf16.mxu1 %v5146_v43  ;;  %v4413_v58 = vld [vmem:[#allocation15 + $0x28] ss:$16 sps:$4 sm:$0xff]   ;;  %v5960_v37 = vrot.slane %v5955_v2, %v1038_v13 }
 0x28f   : > { %743 = vadd.xlane.f32.xlu0 %v713_v59  ;;  %1704 = vmatprep.subr.bf16.mxu0 %v4415_v1 }
 0x290   : > { %v714_v54 = vmul.f32 %v5944_v34, %v5944_v34  ;;  %1597 = vmatprep.subr.bf16.mxu1 %v4436_v16 }
 0x291   : > { %1705 = vmatpush1.bf16.msra.mxu0 %v4413_v58  ;;  %1598 = vmatpush1.bf16.msra.mxu1 %v4434_v10 }
 0x292   : > { %745 = vadd.xlane.f32.xlu1 %v714_v54  ;;  %1706 = vmatprep.subr.bf16.mxu0 %v4421_v5 }
 0x293   : > { %1599 = vmatprep.subr.bf16.mxu1 %v4442_v47 }
 0x295   : > { %1707 = vmatpush1.bf16.msra.mxu0 %v4419_v40  ;;  %1600 = vmatpush1.bf16.msra.mxu1 %v4440_v46 }
 0x296   : > { %1708 = vmatprep.subr.bf16.mxu0 %v4427_v45  ;;  %1601 = vmatprep.subr.bf16.mxu1 %v4448_v23 }
 0x299   : > { %1709 = vmatpush1.bf16.msra.mxu0 %v4425_v11  ;;  %1602 = vmatpush1.bf16.msra.mxu1 %v4446_v33 }
 0x29a   : > { %1710 = vmatprep.subr.bf16.mxu0 %v4433_v9  ;;  %1603 = vmatprep.subr.bf16.mxu1 %v4454_v28 }
 0x29d   : > { %1711 = vmatpush1.bf16.msra.mxu0 %v4431_v32  ;;  %1604 = vmatpush1.bf16.msra.mxu1 %v4452_v35 }
 0x29e   : > { %1712 = vmatprep.subr.bf16.mxu0 %v4439_v17 }
 0x2a1   : > { %1713 = vmatpush1.bf16.msra.mxu0 %v4437_v18 }
 0x2a2   : > { %1714 = vmatprep.subr.bf16.mxu0 %v4445_v22 }
 0x2a5   : > { %1715 = vmatpush1.bf16.msra.mxu0 %v4443_v26 }
 0x2a6   : > { %1716 = vmatprep.subr.bf16.mxu0 %v4451_v12 }
 0x2a9   : > { %1717 = vmatpush1.bf16.msra.mxu0 %v4449_v29 }
 0x2ff   : > { %v716_v50 = vpop.xlane.xlu0 %715 }
 0x300   : > { %v747_v42 = vmul.f32 0.0078125, %v716_v50 }
 0x302   : > { %v763_v0 = vadd.f32 1e-05, %v747_v42 }
 0x303   : > { %v718_v30 = vpop.xlane.xlu1 %717 }
 0x304   : > { %v720_v3 = vpop.xlane.xlu0 %719  ;;  %v748_v39 = vmul.f32 0.0078125, %v718_v30 }
 0x305   : > { %v749_v55 = vmul.f32 0.0078125, %v720_v3 }
 0x306   : > { %v764_v40 = vadd.f32 1e-05, %v748_v39 }
 0x307   : > { %v722_v48 = vpop.xlane.xlu1 %721  ;;  %v765_v45 = vadd.f32 1e-05, %v749_v55 }
 0x308   : > { %v724_v52 = vpop.xlane.xlu0 %723  ;;  %v750_v1 = vmul.f32 0.0078125, %v722_v48 }
 0x309   : > { %v751_v58 = vmul.f32 0.0078125, %v724_v52 }
 0x30a   : > { %v766_v31 = vadd.f32 1e-05, %v750_v1 }
 0x30b   : > { %v726_v38 = vpop.xlane.xlu1 %725  ;;  %v767_v32 = vadd.f32 1e-05, %v751_v58 }
 0x30c   : > { %v728_v59 = vpop.xlane.xlu0 %727  ;;  %v752_v56 = vmul.f32 0.0078125, %v726_v38 }
 0x30d   : > { %v753_v9 = vmul.f32 0.0078125, %v728_v59 }
 0x30e   : > { %v768_v10 = vadd.f32 1e-05, %v752_v56 }
 0x30f   : > { %v730_v7 = vpop.xlane.xlu1 %729  ;;  %v769_v23 = vadd.f32 1e-05, %v753_v9  ;;  %v1042_v9 = vsub.s32 1, %v5949_v14 }
 0x310   : > { %v732_v16 = vpop.xlane.xlu0 %731  ;;  %v754_v17 = vmul.f32 0.0078125, %v730_v7 }
 0x311   : > { %v755_v18 = vmul.f32 0.0078125, %v732_v16 }
 0x312   : > { %v770_v29 = vadd.f32 1e-05, %v754_v17 }
 0x313   : > { %v771_v35 = vadd.f32 1e-05, %v755_v18  ;;  %v734_v27 = vpop.xlane.xlu1 %733 }
 0x314   : > { %v756_v39 = vmul.f32 0.0078125, %v734_v27 }
 0x338   : > { %v1160_v54 = vpop.f32.mrb[0].mxu0 }
 0x339   : > { %v1161_v60 = vadd.f32 %v1160_v54, %v5960_v37  ;;  %v5963_v61 = vpop.f32.mrb[1].mxu0 }
 0x33a   : > { %v1164_v4 = vpop.f32.mrb[2].mxu0 }
 0x33b   : > { %v3876_v41 = vmul.f32 -1.442695, %v1161_v60  ;;  %v1165_v5 = vadd.f32 %v1164_v4, %v5960_v37  ;;  %v5966_v6 = vpop.f32.mrb[3].mxu0 }
 0x33d   : > { %4487 = vpow2.f32 %v3876_v41  ;;  %v3877_v11 = vmul.f32 -1.442695, %v1165_v5 }
 0x33e   : > { %4489 = vrsqrt.f32 %v763_v0 }
 0x33f   : > { %4491 = vpow2.f32 %v3877_v11 }
 0x340   : > { %4493 = vrsqrt.f32 %v764_v40  ;;  %v1170_v47 = vpop.f32.mrb[4].mxu0 }
 0x341   : > { %4495 = vrsqrt.f32 %v765_v45  ;;  %v1171_v46 = vadd.f32 %v1170_v47, %v5960_v37  ;;  %v5969_v22 = vpop.f32.mrb[5].mxu0 }
 0x342   : > { %4497 = vrsqrt.f32 %v766_v31  ;;  %v1174_v26 = vpop.f32.mrb[6].mxu0 }
 0x343   : > { %4499 = vrsqrt.f32 %v767_v32  ;;  %v3878_v33 = vmul.f32 -1.442695, %v1171_v46  ;;  %v1175_v12 = vadd.f32 %v1174_v26, %v5960_v37  ;;  %v5972_v28 = vpop.f32.mrb[7].mxu0  ;;  %v772_v32 = vadd.f32 1e-05, %v756_v39 }
 0x344   : > { %4501 = vrsqrt.f32 %v768_v10  ;;  %v736_v10 = vpop.xlane.xlu0 %735 }
 0x345   : > { %4503 = vpow2.f32 %v3878_v33  ;;  %v3879_v50 = vmul.f32 -1.442695, %v1175_v12  ;;  %v757_v33 = vmul.f32 0.0078125, %v736_v10  ;;  %v6000_v12 = vrot.slane %v5955_v2, %v1042_v9 }
 0x346   : > { %4505 = vrsqrt.f32 %v769_v23  ;;  %v738_v23 = vpop.xlane.xlu1 %737 }
 0x347   : > { %v4488_v30 = vpop.eup %4487  ;;  %4507 = vpow2.f32 %v3879_v50  ;;  %v773_v10 = vadd.f32 1e-05, %v757_v33 }
 0x348   : > { %v4490_v3 = vpop.eup %4489  ;;  %4509 = vrsqrt.f32 %v770_v29  ;;  %v1287_v48 = vadd.f32 1.0, %v4488_v30  ;;  %v1180_v52 = vpop.f32.mrb[8].mxu0 }
 0x349   : > { %v1200_v42 = vpop.f32.mrb[0].mxu1  ;;  %v4492_v38 = vpop.eup %4491  ;;  %4511 = vrsqrt.f32 %v771_v35  ;;  %v1181_v59 = vadd.f32 %v1180_v52, %v5960_v37  ;;  %v795_v39 = vmul.f32 %v4490_v3, %v5842_v24  ;;  %v1163_v24 = vadd.f32 %v5963_v61, %v6000_v12 }
 0x34a   : > { %v1201_v54 = vadd.f32 %v1200_v42, %v5960_v37  ;;  %v5976_v55 = vpop.f32.mrb[9].mxu0  ;;  %v5978_v60 = vpop.f32.mrb[1].mxu1  ;;  %4513 = vrcp.f32 %v1287_v48  ;;  %v1288_v1 = vadd.f32 1.0, %v4492_v38 }
 0x34b   : > { %v4494_v0 = vpop.eup %4493  ;;  %v1184_v4 = vpop.f32.mrb[10].mxu0  ;;  %v3880_v5 = vmul.f32 -1.442695, %v1181_v59 }
 0x34c   : > { %v1204_v58 = vpop.f32.mrb[2].mxu1  ;;  %v5980_v41 = vpop.eup %4495  ;;  %v3884_v40 = vmul.f32 -1.442695, %v1201_v54  ;;  %v1185_v56 = vadd.f32 %v1184_v4, %v5960_v37  ;;  %4515 = vrcp.f32 %v1288_v1  ;;  %v796_v3 = vmul.f32 %v4494_v0, %v5853_v57 }
 0x34d   : > { %v1205_v45 = vadd.f32 %v1204_v58, %v5960_v37  ;;  %v5984_v7 = vpop.f32.mrb[11].mxu0  ;;  %v5986_v11 = vpop.f32.mrb[3].mxu1  ;;  %4517 = vpow2.f32 %v3880_v5 }
 0x34e   : > { %v5988_v31 = vpop.eup %4497  ;;  %v3881_v17 = vmul.f32 -1.442695, %v1185_v56  ;;  %4519 = vpow2.f32 %v3884_v40 }
 0x34f   : > { %v5991_v16 = vpop.eup %4499  ;;  %v3885_v47 = vmul.f32 -1.442695, %v1205_v45 }
 0x350   : > { %v5993_v18 = vpop.eup %4501  ;;  %4521 = vpow2.f32 %v3881_v17  ;;  %v1190_v35 = vpop.f32.mrb[12].mxu0 }
 0x351   : > { %v4504_v46 = vpop.eup %4503  ;;  %4523 = vpow2.f32 %v3885_v47  ;;  %v1210_v50 = vpop.f32.mrb[4].mxu1  ;;  %v1191_v30 = vadd.f32 %v1190_v35, %v5960_v37 }
 0x352   : > { %v5995_v26 = vpop.eup %4505  ;;  %v1289_v29 = vadd.f32 1.0, %v4504_v46  ;;  %4525 = vrsqrt.f32 %v772_v32  ;;  %v1211_v48 = vadd.f32 %v1210_v50, %v5960_v37  ;;  %v6004_v52 = vpop.f32.mrb[13].mxu0  ;;  %v758_v50 = vmul.f32 0.0078125, %v738_v23 }
 0x353   : > { %v4508_v27 = vpop.eup %4507  ;;  %v6006_v42 = vpop.f32.mrb[5].mxu1  ;;  %v3882_v4 = vmul.f32 -1.442695, %v1191_v30 }
 0x354   : > { %v6008_v38 = vpop.eup %4509  ;;  %4527 = vrcp.f32 %v1289_v29  ;;  %v1290_v2 = vadd.f32 1.0, %v4508_v27  ;;  %v1194_v59 = vpop.f32.mrb[14].mxu0  ;;  %v3886_v58 = vmul.f32 -1.442695, %v1211_v48  ;;  %v1167_v48 = vadd.f32 %v5966_v6, %v6000_v12 }
 0x355   : > { %v1214_v54 = vpop.f32.mrb[6].mxu1  ;;  %v6011_v1 = vpop.eup %4511  ;;  %v1195_v5 = vadd.f32 %v1194_v59, %v5960_v37  ;;  %v797_v6 = vmul.f32 %v5980_v41, %v5856_v19  ;;  %v1173_v41 = vadd.f32 %v5969_v22, %v6000_v12 }
 0x356   : > { %v1215_v40 = vadd.f32 %v1214_v54, %v5960_v37  ;;  %v6015_v56 = vpop.f32.mrb[15].mxu0  ;;  %v6017_v45 = vpop.f32.mrb[7].mxu1  ;;  %4529 = vrcp.f32 %v1290_v2 }
 0x357   : > { %v4514_v32 = vpop.eup %4513  ;;  %v740_v17 = vpop.xlane.xlu0 %739  ;;  %4531 = vpow2.f32 %v3882_v4  ;;  %v3883_v46 = vmul.f32 -1.442695, %v1195_v5  ;;  %v774_v5 = vadd.f32 1e-05, %v758_v50 }
 0x358   : > { %v1335_v47 = vmul.f32 %v4514_v32, %v795_v39  ;;  %v3887_v29 = vmul.f32 -1.442695, %v1215_v40  ;;  %v4516_v35 = vpop.eup %4515  ;;  %4533 = vpow2.f32 %v3886_v58  ;;  %v759_v61 = vmul.f32 0.0078125, %v740_v17  ;;  %v1220_v57 = vpop.f32.mrb[8].mxu1 }
 0x359   : > { %v4518_v27 = vpop.eup %4517  ;;  %v1336_v33 = vmul.f32 %v4516_v35, %v796_v3  ;;  %4535 = vpow2.f32 %v3883_v46  ;;  %v1221_v4 = vadd.f32 %v1220_v57, %v5960_v37  ;;  %v6025_v23 = vpop.f32.mrb[9].mxu1  ;;  %v799_v57 = vmul.f32 %v5991_v16, %v5867_v25 }
 0x35a   : > { %v1351_v30 = vadd.f32 %v1335_v47, %v1163_v24  ;;  %v4520_v59 = vpop.eup %4519  ;;  %v1291_v54 = vadd.f32 1.0, %v4518_v27  ;;  %4537 = vpow2.f32 %v3887_v29  ;;  %v1224_v32 = vpop.f32.mrb[10].mxu1  ;;  %v798_v29 = vmul.f32 %v5988_v31, %v5870_v49 }
 0x35b   : > { %v4522_v0 = vpop.eup %4521  ;;  %4539 = vrsqrt.f32 %v773_v10  ;;  %v1352_v39 = vadd.f32 %v1336_v33, %v1167_v48  ;;  %v1295_v2 = vadd.f32 1.0, %v4520_v59  ;;  %v3888_v10 = vmul.f32 -1.442695, %v1221_v4  ;;  %v6031_v47 = vpop.f32.mrb[11].mxu1 }
 0x35c   : > { %v4524_v58 = vpop.eup %4523  ;;  %4541 = vrcp.f32 %v1291_v54  ;;  %v1292_v40 = vadd.f32 1.0, %v4522_v0  ;;  %v1225_v35 = vadd.f32 %v1224_v32, %v5960_v37  ;;  %v775_v50 = vadd.f32 1e-05, %v759_v61  ;;  %v742_v19 = vpop.xlane.xlu1 %741 }
 0x35d   : > { %v6029_v24 = vpop.eup %4525  ;;  %v1367_v3 = vpack.c.bf16 %v1352_v39, %v1351_v30  ;;  %4543 = vrcp.f32 %v1295_v2  ;;  %v1296_v17 = vadd.f32 1.0, %v4524_v58  ;;  %v744_v31 = vpop.xlane.xlu0 %743  ;;  %v1177_v59 = vadd.f32 %v5972_v28, %v6000_v12 }
 0x35e   : > { %v4528_v46 = vpop.eup %4527  ;;  %4545 = vrcp.f32 %v1292_v40  ;;  %v3889_v48 = vmul.f32 -1.442695, %v1225_v35  ;;  %v760_v54 = vmul.f32 0.0078125, %v742_v19  ;;  %v761_v32 = vmul.f32 0.0078125, %v744_v31 }
 0x35f   : > { %v1337_v27 = vmul.f32 %v4528_v46, %v797_v6  ;;  %4547 = vrcp.f32 %v1296_v17  ;;  %1622 = vmatmul.mubr.bf16.vlgmr.msra.gmra.mrb[16].mxu1 %v1367_v3  ;;  %1735 = vmatmul.mubr.bf16.vlgmr.msra.gmra.mrb[16].mxu0 %v1367_v3  ;;  %v800_v28 = vmul.f32 %v5993_v18, %v5886_v63  ;;  %v803_v19 = vmul.f32 %v6011_v1, %v5895_v44 }
 0x360   : > { %v4530_v30 = vpop.eup %4529  ;;  %4549 = vpow2.f32 %v3888_v10  ;;  %1631 = vmatprep.mubr.bf16.mxu1 %v5146_v43  ;;  %1744 = vmatprep.mubr.bf16.mxu0 %v5146_v43  ;;  %v1230_v39 = vpop.f32.mrb[12].mxu1  ;;  %v1183_v18 = vadd.f32 %v5976_v55, %v6000_v12 }
 0x361   : > { %v4532_v49 = vpop.eup %4531  ;;  %4551 = vrsqrt.f32 %v774_v5  ;;  %v1353_v33 = vadd.f32 %v1337_v27, %v1173_v41  ;;  %v1338_v61 = vmul.f32 %v4530_v30, %v798_v29  ;;  %v1231_v5 = vadd.f32 %v1230_v39, %v5960_v37  ;;  %v6045_v6 = vpop.f32.mrb[13].mxu1 }
 0x362   : > { %v4534_v22 = vpop.eup %4533  ;;  %v1293_v0 = vadd.f32 1.0, %v4532_v49  ;;  %4553 = vpow2.f32 %v3889_v48  ;;  %v1234_v17 = vpop.f32.mrb[14].mxu1 }
 0x363   : > { %v4536_v2 = vpop.eup %4535  ;;  %4555 = vrsqrt.f32 %v775_v50  ;;  %v1354_v4 = vadd.f32 %v1338_v61, %v1177_v59  ;;  %v1297_v58 = vadd.f32 1.0, %v4534_v22  ;;  %v3890_v10 = vmul.f32 -1.442695, %v1231_v5  ;;  %v6050_v29 = vpop.f32.mrb[15].mxu1 }
 0x364   : > { %v4538_v40 = vpop.eup %4537  ;;  %4557 = vrcp.f32 %v1293_v0  ;;  %v1294_v3 = vadd.f32 1.0, %v4536_v2  ;;  %v1235_v46 = vadd.f32 %v1234_v17, %v5960_v37  ;;  %v776_v50 = vadd.f32 1e-05, %v760_v54  ;;  %v746_v63 = vpop.xlane.xlu1 %745 }
 0x365   : > { %v4540_v25 = vpop.eup %4539  ;;  %4559 = vrcp.f32 %v1297_v58  ;;  %v1298_v16 = vadd.f32 1.0, %v4538_v40  ;;  %v1368_v41 = vpack.c.bf16 %v1354_v4, %v1353_v33  ;;  %v1203_v37 = vadd.f32 %v5978_v60, %v6000_v12 }
 0x366   : > { %v4542_v35 = vpop.eup %4541  ;;  %4561 = vrcp.f32 %v1294_v3  ;;  %v3891_v48 = vmul.f32 -1.442695, %v1235_v46  ;;  %v804_v59 = vmul.f32 %v6029_v24, %v5909_v20  ;;  %v1187_v33 = vadd.f32 %v5984_v7, %v6000_v12 }
 0x367   : > { %v4544_v27 = vpop.eup %4543  ;;  %v1339_v30 = vmul.f32 %v4542_v35, %v799_v57  ;;  %4563 = vrcp.f32 %v1298_v16  ;;  %1632 = vmatmul.mubr.bf16.gmra.mrb[20].mxu1 %v1368_v41  ;;  %1745 = vmatmul.mubr.bf16.gmra.mrb[20].mxu0 %v1368_v41  ;;  %v762_v60 = vmul.f32 0.0078125, %v746_v63  ;;  %v1207_v20 = vadd.f32 %v5986_v11, %v6000_v12 }
 0x368   : > { %v4546_v49 = vpop.eup %4545  ;;  %v1343_v31 = vmul.f32 %v4544_v27, %v803_v19  ;;  %4565 = vpow2.f32 %v3890_v10  ;;  %1641 = vmatprep.mubr.bf16.mxu1 %v5146_v43  ;;  %1754 = vmatprep.mubr.bf16.mxu0 %v5146_v43  ;;  %v801_v7 = vmul.f32 %v5995_v26, %v5883_v62  ;;  %v777_v58 = vadd.f32 1e-05, %v761_v32 }
 0x369   : > { %v4548_v44 = vpop.eup %4547  ;;  %v1355_v1 = vadd.f32 %v1339_v30, %v1183_v18  ;;  %v1340_v55 = vmul.f32 %v4546_v49, %v800_v28  ;;  %4567 = vpow2.f32 %v3891_v48  ;;  %v778_v3 = vadd.f32 1e-05, %v762_v60 }
 0x36a   : > { %v4550_v61 = vpop.eup %4549  ;;  %v1359_v22 = vadd.f32 %v1343_v31, %v1203_v37  ;;  %v1344_v24 = vmul.f32 %v4548_v44, %v804_v59  ;;  %4569 = vrsqrt.f32 %v776_v50  ;;  %v805_v17 = vmul.f32 %v4540_v25, %v5912_v21 }
 0x36b   : > { %v4552_v54 = vpop.eup %4551  ;;  %v1356_v57 = vadd.f32 %v1340_v55, %v1187_v33  ;;  %v1299_v0 = vadd.f32 1.0, %v4550_v61  ;;  %v1193_v10 = vadd.f32 %v6004_v52, %v6000_v12  ;;  %v802_v35 = vmul.f32 %v6008_v38, %v5898_v8 }
 0x36c   : > { %v4554_v39 = vpop.eup %4553  ;;  %v1360_v2 = vadd.f32 %v1344_v24, %v1207_v20  ;;  %v1213_v26 = vadd.f32 %v6006_v42, %v6000_v12  ;;  %v806_v50 = vmul.f32 %v4552_v54, %v5921_v51  ;;  %v1197_v52 = vadd.f32 %v6015_v56, %v6000_v12 }
 0x36d   : > { %v4556_v4 = vpop.eup %4555  ;;  %4571 = vrcp.f32 %v1299_v0  ;;  %v1300_v5 = vadd.f32 1.0, %v4554_v39  ;;  %v1369_v40 = vpack.c.bf16 %v1356_v57, %v1355_v1  ;;  %v1217_v42 = vadd.f32 %v6017_v45, %v6000_v12 }
 0x36e   : > { %v4558_v28 = vpop.eup %4557  ;;  %v1371_v11 = vpack.c.bf16 %v1360_v2, %v1359_v22  ;;  %v807_v49 = vmul.f32 %v4556_v4, %v5924_v36  ;;  %v1223_v59 = vadd.f32 %v6025_v23, %v6000_v12  ;;  %v1227_v36 = vadd.f32 %v6031_v47, %v6000_v12 }
 0x36f   : > { %v4560_v16 = vpop.eup %4559  ;;  %v1341_v46 = vmul.f32 %v4558_v28, %v801_v7  ;;  %4573 = vrcp.f32 %v1300_v5  ;;  %1642 = vmatmul.mubr.bf16.gmra.mrb[24].mxu1 %v1369_v40  ;;  %1755 = vmatmul.mubr.bf16.gmra.mrb[24].mxu0 %v1369_v40  ;;  %v1233_v57 = vadd.f32 %v6045_v6, %v6000_v12  ;;  %v1237_v47 = vadd.f32 %v6050_v29, %v6000_v12 }
 0x370   : > { %v4562_v62 = vpop.eup %4561  ;;  %v1345_v32 = vmul.f32 %v4560_v16, %v805_v17  ;;  %4575 = vrsqrt.f32 %v777_v58  ;;  %1651 = vmatprep.mubr.bf16.mxu1 %v5146_v43  ;;  %1764 = vmatprep.mubr.bf16.mxu0 %v5146_v43  ;;  %v1423_v12 = vsub.s32 3, %v5949_v14  ;;  %v1419_v6 = vsub.s32 2, %v5949_v14 }
 0x371   : > { %v4564_v21 = vpop.eup %4563  ;;  %v1357_v25 = vadd.f32 %v1341_v46, %v1193_v10  ;;  %v1342_v19 = vmul.f32 %v4562_v62, %v802_v35  ;;  %4577 = vrsqrt.f32 %v778_v3 }
 0x372   : > { %v4566_v8 = vpop.eup %4565  ;;  %v1361_v38 = vadd.f32 %v1345_v32, %v1213_v26  ;;  %v1346_v51 = vmul.f32 %v4564_v21, %v806_v50 }
 0x373   : > { %v4568_v41 = vpop.eup %4567  ;;  %v1358_v27 = vadd.f32 %v1342_v19, %v1197_v52  ;;  %v1301_v63 = vadd.f32 1.0, %v4566_v8 }
 0x374   : > { %v1362_v18 = vadd.f32 %v1346_v51, %v1217_v42  ;;  %v1302_v30 = vadd.f32 1.0, %v4568_v41  ;;  %v4570_v48 = vpop.eup %4569 }
 0x375   : > { %4579 = vrcp.f32 %v1301_v63  ;;  %v1370_v56 = vpack.c.bf16 %v1358_v27, %v1357_v25  ;;  %v808_v45 = vmul.f32 %v4570_v48, %v5934_v53 }
 0x376   : > { %4581 = vrcp.f32 %v1302_v30  ;;  %v1372_v37 = vpack.c.bf16 %v1362_v18, %v1361_v38 }
 0x377   : > { %v4572_v31 = vpop.eup %4571  ;;  %1652 = vmatmul.mubr.bf16.gmra.mrb[28].mxu1 %v1370_v56  ;;  %1765 = vmatmul.mubr.bf16.gmra.mrb[28].mxu0 %v1370_v56 }
 0x378   : > { %v1347_v44 = vmul.f32 %v4572_v31, %v807_v49  ;;  %1661 = vmatprep.mubr.bf16.mxu1 %v5146_v43  ;;  %1774 = vmatprep.mubr.bf16.mxu0 %v5146_v43 }
 0x379   : > { %v4574_v1 = vpop.eup %4573 }
 0x37a   : > { %v1363_v33 = vadd.f32 %v1347_v44, %v1223_v59  ;;  %v1348_v55 = vmul.f32 %v4574_v1, %v808_v45  ;;  %v4576_v61 = vpop.eup %4575 }
 0x37b   : > { %v4578_v60 = vpop.eup %4577  ;;  %v809_v23 = vmul.f32 %v4576_v61, %v5937_v15 }
 0x37c   : > { %v1364_v22 = vadd.f32 %v1348_v55, %v1227_v36  ;;  %v810_v53 = vmul.f32 %v4578_v60, %v5944_v34  ;;  %v1407_v34 = vld [vmem:[%s7094_s2] sm:$0xf] }
 0x37d   : > { %v6109_v29 = vrot.slane %v1407_v34, %v1038_v13  ;;  %v6111_v4 = vrot.slane %v1407_v34, %v1423_v12  ;;  %v6113_v58 = vrot.slane %v1407_v34, %v1419_v6  ;;  %v6117_v40 = vrot.slane %v1407_v34, %v1042_v9 }
 0x37e   : > { %v1373_v20 = vpack.c.bf16 %v1364_v22, %v1363_v33 }
 0x37f   : > { %v4580_v24 = vpop.eup %4579  ;;  %1662 = vmatmul.mubr.bf16.gmra.mrb[32].mxu1 %v1371_v11  ;;  %1775 = vmatmul.mubr.bf16.gmra.mrb[32].mxu0 %v1371_v11 }
 0x380   : > { %v4582_v54 = vpop.eup %4581  ;;  %v1349_v0 = vmul.f32 %v4580_v24, %v809_v23  ;;  %1671 = vmatprep.mubr.bf16.mxu1 %v5146_v43  ;;  %1784 = vmatprep.mubr.bf16.mxu0 %v5146_v43 }
 0x381   : > { %v1350_v39 = vmul.f32 %v4582_v54, %v810_v53 }
 0x382   : > { %v1365_v15 = vadd.f32 %v1349_v0, %v1233_v57 }
 0x383   : > { %v1366_v2 = vadd.f32 %v1350_v39, %v1237_v47 }
 0x385   : > { %v1374_v7 = vpack.c.bf16 %v1366_v2, %v1365_v15 }
 0x387   : > { %1672 = vmatmul.mubr.bf16.gmra.mrb[36].mxu1 %v1372_v37  ;;  %1785 = vmatmul.mubr.bf16.gmra.mrb[36].mxu0 %v1372_v37 }
 0x388   : > { %1681 = vmatprep.mubr.bf16.mxu1 %v5146_v43  ;;  %1794 = vmatprep.mubr.bf16.mxu0 %v5146_v43 }
 0x38f   : > { %1682 = vmatmul.mubr.bf16.gmra.mrb[40].mxu1 %v1373_v20  ;;  %1795 = vmatmul.mubr.bf16.gmra.mrb[40].mxu0 %v1373_v20 }
 0x390   : > { %1691 = vmatprep.mubr.bf16.mxu1 %v5146_v43  ;;  %1804 = vmatprep.mubr.bf16.mxu0 %v5146_v43 }
 0x397   : > { %1692 = vmatmul.mubr.bf16.gmra.mrb[44].mxu1 %v1374_v7  ;;  %1805 = vmatmul.mubr.bf16.gmra.mrb[44].mxu0 %v1374_v7 }
 0x432   : > { %v1623_v5 = vpop.f32.mrb[16].mxu1  ;;  %v1736_v43 = vpop.f32.mrb[16].mxu0 }
 0x433   : > { %v1624_v28 = vadd.f32 %v1623_v5, %v6109_v29  ;;  %v1625_v3 = vpop.f32.mrb[17].mxu1  ;;  %v1738_v17 = vpop.f32.mrb[17].mxu0  ;;  %v1737_v13 = vadd.f32 %v1736_v43, %v6113_v58 }
 0x434   : > { %v1739_v11 = vadd.f32 %v1738_v17, %v6111_v4  ;;  %v1627_v16 = vpop.f32.mrb[18].mxu1  ;;  %v1740_v10 = vpop.f32.mrb[18].mxu0  ;;  %v1626_v14 = vadd.f32 %v1625_v3, %v6117_v40 }
 0x435   : > { %v1628_v46 = vadd.f32 %v1627_v16, %v6109_v29  ;;  %v1741_v35 = vadd.f32 %v1740_v10, %v6113_v58  ;;  %v1629_v62 = vpop.f32.mrb[19].mxu1  ;;  %v1742_v26 = vpop.f32.mrb[19].mxu0  ;;  %v1815_v21 = vmul.f32 0.17677669, %v1624_v28 }
 0x436   : > { %v3924_v9 = vmul.f32 -1.442695, %v1739_v11  ;;  %v1630_v32 = vadd.f32 %v1629_v62, %v6117_v40  ;;  %v1743_v50 = vadd.f32 %v1742_v26, %v6111_v4 }
 0x437   : > { %v1816_v25 = vmul.f32 0.17677669, %v1628_v46  ;;  %v1847_v52 = vpack.c.bf16 %v1741_v35, %v1737_v13 }
 0x438   : > { %4583 = vpow2.f32 %v3924_v9  ;;  %v6127_v19 = vpack.c.bf16 %v1630_v32, %v1626_v14  ;;  %v3925_v8 = vmul.f32 -1.442695, %v1743_v50 }
 0x439   : > { %v6129_v38 = vpack.c.bf16 %v1816_v25, %v1815_v21  ;;  %1984 = vst.msk [vmem:[#allocation4] sm:$0xff] %vm1967_vm0, %v1847_v52  ;;  %2082 = vrot.lane.b32.xlu0 %v1847_v52, %s5147_s27 }
 0x43a   : > { %1976 = vst.msk [vmem:[#allocation3] sm:$0xff] %vm1967_vm0, %v6127_v19  ;;  %4585 = vpow2.f32 %v3925_v8  ;;  %v1633_v42 = vpop.f32.mrb[20].mxu1  ;;  %v1746_v51 = vpop.f32.mrb[20].mxu0 }
 0x43b   : > { %1968 = vst.msk [vmem:[#allocation2] sm:$0xff] %vm1967_vm0, %v6129_v38  ;;  %v1634_v41 = vadd.f32 %v1633_v42, %v6109_v29  ;;  %v1635_v27 = vpop.f32.mrb[21].mxu1  ;;  %v1748_v63 = vpop.f32.mrb[21].mxu0  ;;  %v1747_v56 = vadd.f32 %v1746_v51, %v6113_v58 }
 0x43c   : > { %v1749_v18 = vadd.f32 %v1748_v63, %v6111_v4  ;;  %v1637_v30 = vpop.f32.mrb[22].mxu1  ;;  %v1750_v48 = vpop.f32.mrb[22].mxu0  ;;  %v1636_v44 = vadd.f32 %v1635_v27, %v6117_v40 }
 0x43d   : > { %2181 = vrot.lane.b32.xlu0 %v1847_v52, %s5148_s30  ;;  %v1638_v49 = vadd.f32 %v1637_v30, %v6109_v29  ;;  %v1751_v37 = vadd.f32 %v1750_v48, %v6113_v58  ;;  %v1639_v31 = vpop.f32.mrb[23].mxu1  ;;  %v1752_v59 = vpop.f32.mrb[23].mxu0  ;;  %v1817_v36 = vmul.f32 0.17677669, %v1634_v41 }
 0x43e   : > { %v3926_v45 = vmul.f32 -1.442695, %v1749_v18  ;;  %v1640_v1 = vadd.f32 %v1639_v31, %v6117_v40  ;;  %v1753_v33 = vadd.f32 %v1752_v59, %v6111_v4 }
 0x43f   : > { %v1818_v55 = vmul.f32 0.17677669, %v1638_v49  ;;  %v1848_v61 = vpack.c.bf16 %v1751_v37, %v1747_v56 }
 0x440   : > { %4587 = vpow2.f32 %v3926_v45  ;;  %v6146_v60 = vpack.c.bf16 %v1640_v1, %v1636_v44  ;;  %v3927_v22 = vmul.f32 -1.442695, %v1753_v33 }
 0x441   : > { %2280 = vrot.lane.b32.xlu0 %v1847_v52, %s5149_s12  ;;  %v6149_v20 = vpack.c.bf16 %v1818_v55, %v1817_v36  ;;  %1985 = vst.msk [vmem:[#allocation4 + $0x8] sm:$0xff] %vm1967_vm0, %v1848_v61  ;;  %2084 = vrot.lane.b32.xlu1 %v1848_v61, %s5147_s27 }
 0x442   : > { %v4584_v23 = vpop.eup %4583  ;;  %1977 = vst.msk [vmem:[#allocation3 + $0x8] sm:$0xff] %vm1967_vm0, %v6146_v60  ;;  %4589 = vpow2.f32 %v3927_v22  ;;  %v1643_v53 = vpop.f32.mrb[24].mxu1 }
 0x443   : > { %v1903_v24 = vadd.f32 1.0, %v4584_v23  ;;  %v1756_v54 = vpop.f32.mrb[24].mxu0  ;;  %1969 = vst.msk [vmem:[#allocation2 + $0x8] sm:$0xff] %vm1967_vm0, %v6149_v20  ;;  %v1644_v0 = vadd.f32 %v1643_v53, %v6109_v29  ;;  %v1645_v47 = vpop.f32.mrb[25].mxu1 }
 0x444   : > { %v4586_v57 = vpop.eup %4585  ;;  %v1758_v39 = vpop.f32.mrb[25].mxu0  ;;  %v1757_v12 = vadd.f32 %v1756_v54, %v6113_v58  ;;  %v1646_v6 = vadd.f32 %v1645_v47, %v6117_v40 }
 0x445   : > { %4591 = vrcp.f32 %v1903_v24  ;;  %v1904_v15 = vadd.f32 1.0, %v4586_v57  ;;  %v1759_v2 = vadd.f32 %v1758_v39, %v6111_v4  ;;  %v1647_v7 = vpop.f32.mrb[26].mxu1  ;;  %v1760_v34 = vpop.f32.mrb[26].mxu0  ;;  %2041 = vrot.lane.b32.xlu0 %v6127_v19, %s5147_s27  ;;  %2183 = vrot.lane.b32.xlu1 %v1848_v61, %s5148_s30  ;;  %v1819_v10 = vmul.f32 0.17677669, %v1644_v0 }
 0x446   : > { %v1648_v5 = vadd.f32 %v1647_v7, %v6109_v29  ;;  %v1761_v43 = vadd.f32 %v1760_v34, %v6113_v58  ;;  %v1649_v28 = vpop.f32.mrb[27].mxu1  ;;  %v1762_v3 = vpop.f32.mrb[27].mxu0 }
 0x447   : > { %4593 = vrcp.f32 %v1904_v15  ;;  %v3928_v17 = vmul.f32 -1.442695, %v1759_v2  ;;  %v1650_v11 = vadd.f32 %v1649_v28, %v6117_v40  ;;  %v1763_v16 = vadd.f32 %v1762_v3, %v6111_v4 }
 0x448   : > { %v1820_v13 = vmul.f32 0.17677669, %v1648_v5  ;;  %v6168_v46 = vpack.c.bf16 %v1761_v43, %v1757_v12 }
 0x449   : > { %4595 = vpow2.f32 %v3928_v17  ;;  %v6170_v35 = vpack.c.bf16 %v1650_v11, %v1646_v6  ;;  %v3929_v62 = vmul.f32 -1.442695, %v1763_v16  ;;  %2148 = vrot.lane.b32.xlu0 %v6127_v19, %s5148_s30  ;;  %2282 = vrot.lane.b32.xlu1 %v1848_v61, %s5149_s12 }
 0x44a   : > { %v6174_v26 = vpack.c.bf16 %v1820_v13, %v1819_v10  ;;  %1986 = vst.msk [vmem:[#allocation4 + $0x10] sm:$0xff] %vm1967_vm0, %v6168_v46  ;;  %v4588_v14 = vpop.eup %4587  ;;  %v1653_v9 = vpop.f32.mrb[28].mxu1 }
 0x44b   : > { %1978 = vst.msk [vmem:[#allocation3 + $0x10] sm:$0xff] %vm1967_vm0, %v6170_v35  ;;  %4597 = vpow2.f32 %v3929_v62  ;;  %v1766_v32 = vpop.f32.mrb[28].mxu0  ;;  %v1905_v50 = vadd.f32 1.0, %v4588_v14  ;;  %v1654_v21 = vadd.f32 %v1653_v9, %v6109_v29  ;;  %v1655_v25 = vpop.f32.mrb[29].mxu1 }
 0x44c   : > { %1970 = vst.msk [vmem:[#allocation2 + $0x10] sm:$0xff] %vm1967_vm0, %v6174_v26  ;;  %v1768_v52 = vpop.f32.mrb[29].mxu0  ;;  %v4590_v8 = vpop.eup %4589  ;;  %v1767_v42 = vadd.f32 %v1766_v32, %v6113_v58  ;;  %v1656_v18 = vadd.f32 %v1655_v25, %v6117_v40 }
 0x44d   : > { %v1769_v51 = vadd.f32 %v1768_v52, %v6111_v4  ;;  %v1657_v41 = vpop.f32.mrb[30].mxu1  ;;  %v1770_v27 = vpop.f32.mrb[30].mxu0  ;;  %2247 = vrot.lane.b32.xlu0 %v6127_v19, %s5149_s12  ;;  %4599 = vrcp.f32 %v1905_v50  ;;  %v1906_v63 = vadd.f32 1.0, %v4590_v8  ;;  %2043 = vrot.lane.b32.xlu1 %v6146_v60, %s5147_s27  ;;  %v1821_v19 = vmul.f32 0.17677669, %v1654_v21 }
 0x44e   : > { %v1658_v30 = vadd.f32 %v1657_v41, %v6109_v29  ;;  %v1659_v48 = vpop.f32.mrb[31].mxu1  ;;  %v1772_v56 = vpop.f32.mrb[31].mxu0  ;;  %v1771_v31 = vadd.f32 %v1770_v27, %v6113_v58 }
 0x44f   : > { %v4592_v49 = vpop.eup %4591  ;;  %v3930_v37 = vmul.f32 -1.442695, %v1769_v51  ;;  %v1660_v59 = vadd.f32 %v1659_v48, %v6117_v40  ;;  %v1773_v44 = vadd.f32 %v1772_v56, %v6111_v4  ;;  %4601 = vrcp.f32 %v1906_v63 }
 0x450   : > { %1951 = vst [vmem:[#allocation5] sm:$0xff] %v4592_v49  ;;  %v1822_v45 = vmul.f32 0.17677669, %v1658_v30  ;;  %v6195_v33 = vpack.c.bf16 %v1771_v31, %v1767_v42 }
 0x451   : > { %v4594_v1 = vpop.eup %4593  ;;  %4603 = vpow2.f32 %v3930_v37  ;;  %v6197_v36 = vpack.c.bf16 %v1660_v59, %v1656_v18  ;;  %v3931_v55 = vmul.f32 -1.442695, %v1773_v44  ;;  %2000 = vrot.lane.b32.xlu0 %v6129_v38, %s5147_s27  ;;  %2150 = vrot.lane.b32.xlu1 %v6146_v60, %s5148_s30 }
 0x452   : > { %1952 = vst [vmem:[#allocation5 + $0x8] sm:$0xff] %v4594_v1  ;;  %v6201_v61 = vpack.c.bf16 %v1822_v45, %v1821_v19  ;;  %1987 = vst.msk [vmem:[#allocation4 + $0x18] sm:$0xff] %vm1967_vm0, %v6195_v33  ;;  %v1663_v23 = vpop.f32.mrb[32].mxu1  ;;  %v1776_v24 = vpop.f32.mrb[32].mxu0 }
 0x453   : > { %v4596_v22 = vpop.eup %4595  ;;  %1979 = vst.msk [vmem:[#allocation3 + $0x18] sm:$0xff] %vm1967_vm0, %v6197_v36  ;;  %4605 = vpow2.f32 %v3931_v55  ;;  %v1664_v54 = vadd.f32 %v1663_v23, %v6109_v29  ;;  %v1665_v57 = vpop.f32.mrb[33].mxu1  ;;  %v1777_v39 = vadd.f32 %v1776_v24, %v6113_v58 }
 0x454   : > { %v1907_v53 = vadd.f32 1.0, %v4596_v22  ;;  %1971 = vst.msk [vmem:[#allocation2 + $0x18] sm:$0xff] %vm1967_vm0, %v6201_v61  ;;  %v1778_v0 = vpop.f32.mrb[33].mxu0  ;;  %v1667_v2 = vpop.f32.mrb[34].mxu1  ;;  %v1666_v12 = vadd.f32 %v1665_v57, %v6117_v40 }
 0x455   : > { %v4598_v47 = vpop.eup %4597  ;;  %v1779_v15 = vadd.f32 %v1778_v0, %v6111_v4  ;;  %v1780_v7 = vpop.f32.mrb[34].mxu0  ;;  %2115 = vrot.lane.b32.xlu0 %v6129_v38, %s5148_s30  ;;  %v1668_v6 = vadd.f32 %v1667_v2, %v6109_v29  ;;  %2249 = vrot.lane.b32.xlu1 %v6146_v60, %s5149_s12  ;;  %v1823_v10 = vmul.f32 0.17677669, %v1664_v54 }
 0x456   : > { %4607 = vrcp.f32 %v1907_v53  ;;  %v1908_v34 = vadd.f32 1.0, %v4598_v47  ;;  %v1669_v5 = vpop.f32.mrb[35].mxu1  ;;  %v1782_v43 = vpop.f32.mrb[35].mxu0  ;;  %v1781_v3 = vadd.f32 %v1780_v7, %v6113_v58 }
 0x457   : > { %v3932_v28 = vmul.f32 -1.442695, %v1779_v15  ;;  %v1670_v17 = vadd.f32 %v1669_v5, %v6117_v40  ;;  %v1783_v11 = vadd.f32 %v1782_v43, %v6111_v4  ;;  %v4600_v16 = vpop.eup %4599  ;;  %v1824_v13 = vmul.f32 0.17677669, %v1668_v6 }
 0x458   : > { %4609 = vrcp.f32 %v1908_v34  ;;  %1953 = vst [vmem:[#allocation5 + $0x10] sm:$0xff] %v4600_v16  ;;  %v6223_v62 = vpack.c.bf16 %v1781_v3, %v1777_v39 }
 0x459   : > { %4611 = vpow2.f32 %v3932_v28  ;;  %v6225_v14 = vpack.c.bf16 %v1670_v17, %v1666_v12  ;;  %v3933_v60 = vmul.f32 -1.442695, %v1783_v11  ;;  %2214 = vrot.lane.b32.xlu0 %v6129_v38, %s5149_s12  ;;  %v4602_v9 = vpop.eup %4601  ;;  %v6229_v32 = vpack.c.bf16 %v1824_v13, %v1823_v10  ;;  %2002 = vrot.lane.b32.xlu1 %v6149_v20, %s5147_s27 }
 0x45a   : > { %1954 = vst [vmem:[#allocation5 + $0x18] sm:$0xff] %v4602_v9  ;;  %1988 = vst.msk [vmem:[#allocation4 + $0x20] sm:$0xff] %vm1967_vm0, %v6223_v62  ;;  %v1673_v21 = vpop.f32.mrb[36].mxu1  ;;  %v1786_v25 = vpop.f32.mrb[36].mxu0 }
 0x45b   : > { %v4604_v50 = vpop.eup %4603  ;;  %1980 = vst.msk [vmem:[#allocation3 + $0x20] sm:$0xff] %vm1967_vm0, %v6225_v14  ;;  %4613 = vpow2.f32 %v3933_v60  ;;  %1972 = vst.msk [vmem:[#allocation2 + $0x20] sm:$0xff] %vm1967_vm0, %v6229_v32  ;;  %v1674_v38 = vadd.f32 %v1673_v21, %v6109_v29  ;;  %v1675_v8 = vpop.f32.mrb[37].mxu1  ;;  %v1787_v41 = vadd.f32 %v1786_v25, %v6113_v58 }
 0x45c   : > { %v1909_v52 = vadd.f32 1.0, %v4604_v50  ;;  %v1788_v42 = vpop.f32.mrb[37].mxu0  ;;  %v1677_v63 = vpop.f32.mrb[38].mxu1  ;;  %v1676_v48 = vadd.f32 %v1675_v8, %v6117_v40 }
 0x45d   : > { %v4606_v51 = vpop.eup %4605  ;;  %v1789_v27 = vadd.f32 %v1788_v42, %v6111_v4  ;;  %v1790_v18 = vpop.f32.mrb[38].mxu0  ;;  %2086 = vrot.lane.b32.xlu0 %v6168_v46, %s5147_s27  ;;  %v1678_v56 = vadd.f32 %v1677_v63, %v6109_v29  ;;  %2117 = vrot.lane.b32.xlu1 %v6149_v20, %s5148_s30  ;;  %v1825_v1 = vmul.f32 0.17677669, %v1674_v38 }
 0x45e   : > { %4615 = vrcp.f32 %v1909_v52  ;;  %v1910_v30 = vadd.f32 1.0, %v4606_v51  ;;  %v1679_v49 = vpop.f32.mrb[39].mxu1  ;;  %v1792_v37 = vpop.f32.mrb[39].mxu0  ;;  %v1791_v59 = vadd.f32 %v1790_v18, %v6113_v58 }
 0x45f   : > { %v3934_v31 = vmul.f32 -1.442695, %v1789_v27  ;;  %v1680_v44 = vadd.f32 %v1679_v49, %v6117_v40  ;;  %v1793_v19 = vadd.f32 %v1792_v37, %v6111_v4  ;;  %v1826_v55 = vmul.f32 0.17677669, %v1678_v56 }
 0x460   : > { %v4608_v45 = vpop.eup %4607  ;;  %4617 = vrcp.f32 %v1910_v30  ;;  %v6251_v22 = vpack.c.bf16 %v1791_v59, %v1787_v41 }
 0x461   : > { %1955 = vst [vmem:[#allocation5 + $0x20] sm:$0xff] %v4608_v45  ;;  %4619 = vpow2.f32 %v3934_v31  ;;  %v6253_v23 = vpack.c.bf16 %v1680_v44, %v1676_v48  ;;  %v3935_v24 = vmul.f32 -1.442695, %v1793_v19  ;;  %2185 = vrot.lane.b32.xlu0 %v6168_v46, %s5148_s30  ;;  %v6257_v54 = vpack.c.bf16 %v1826_v55, %v1825_v1  ;;  %2216 = vrot.lane.b32.xlu1 %v6149_v20, %s5149_s12 }
 0x462   : > { %v4610_v53 = vpop.eup %4609  ;;  %1989 = vst.msk [vmem:[#allocation4 + $0x28] sm:$0xff] %vm1967_vm0, %v6251_v22  ;;  %v1683_v0 = vpop.f32.mrb[40].mxu1 }
 0x463   : > { %v4612_v57 = vpop.eup %4611  ;;  %1956 = vst [vmem:[#allocation5 + $0x28] sm:$0xff] %v4610_v53  ;;  %1981 = vst.msk [vmem:[#allocation3 + $0x28] sm:$0xff] %vm1967_vm0, %v6253_v23  ;;  %4621 = vpow2.f32 %v3935_v24  ;;  %v1796_v47 = vpop.f32.mrb[40].mxu0  ;;  %v1684_v15 = vadd.f32 %v1683_v0, %v6109_v29 }
 0x464   : > { %v1911_v39 = vadd.f32 1.0, %v4612_v57  ;;  %1973 = vst.msk [vmem:[#allocation2 + $0x28] sm:$0xff] %vm1967_vm0, %v6257_v54  ;;  %v1685_v2 = vpop.f32.mrb[41].mxu1  ;;  %v1798_v7 = vpop.f32.mrb[41].mxu0  ;;  %v1797_v34 = vadd.f32 %v1796_v47, %v6113_v58 }
 0x465   : > { %v4614_v20 = vpop.eup %4613  ;;  %v1799_v12 = vadd.f32 %v1798_v7, %v6111_v4  ;;  %v1687_v6 = vpop.f32.mrb[42].mxu1  ;;  %2284 = vrot.lane.b32.xlu0 %v6168_v46, %s5149_s12  ;;  %v1686_v28 = vadd.f32 %v1685_v2, %v6117_v40  ;;  %2004 = vrot.lane.b32.xlu1 %v6174_v26, %s5147_s27  ;;  %v1827_v46 = vmul.f32 0.17677669, %v1684_v15 }
 0x466   : > { %v1800_v5 = vpop.f32.mrb[42].mxu0  ;;  %4623 = vrcp.f32 %v1911_v39  ;;  %v1912_v43 = vadd.f32 1.0, %v4614_v20  ;;  %v1688_v3 = vadd.f32 %v1687_v6, %v6109_v29  ;;  %v1689_v17 = vpop.f32.mrb[43].mxu1 }
 0x467   : > { %v1802_v11 = vpop.f32.mrb[43].mxu0  ;;  %v3936_v16 = vmul.f32 -1.442695, %v1799_v12  ;;  %v1801_v10 = vadd.f32 %v1800_v5, %v6113_v58  ;;  %v1690_v13 = vadd.f32 %v1689_v17, %v6117_v40 }
 0x468   : > { %v1803_v60 = vadd.f32 %v1802_v11, %v6111_v4  ;;  %v4616_v9 = vpop.eup %4615  ;;  %4625 = vrcp.f32 %v1912_v43  ;;  %v1828_v50 = vmul.f32 0.17677669, %v1688_v3 }
 0x469   : > { %1957 = vst [vmem:[#allocation5 + $0x30] sm:$0xff] %v4616_v9  ;;  %4627 = vpow2.f32 %v3936_v16  ;;  %v6279_v21 = vpack.c.bf16 %v1801_v10, %v1797_v34  ;;  %v6281_v25 = vpack.c.bf16 %v1690_v13, %v1686_v28  ;;  %2045 = vrot.lane.b32.xlu0 %v6170_v35, %s5147_s27  ;;  %2088 = vrot.lane.b32.xlu1 %v6195_v33, %s5147_s27 }
 0x46a   : > { %v3937_v52 = vmul.f32 -1.442695, %v1803_v60  ;;  %v4618_v38 = vpop.eup %4617  ;;  %v6285_v8 = vpack.c.bf16 %v1828_v50, %v1827_v46  ;;  %v1693_v51 = vpop.f32.mrb[44].mxu1 }
 0x46b   : > { %v4620_v42 = vpop.eup %4619  ;;  %1958 = vst [vmem:[#allocation5 + $0x38] sm:$0xff] %v4618_v38  ;;  %1990 = vst.msk [vmem:[#allocation4 + $0x30] sm:$0xff] %vm1967_vm0, %v6279_v21  ;;  %v1806_v41 = vpop.f32.mrb[44].mxu0  ;;  %v1694_v63 = vadd.f32 %v1693_v51, %v6109_v29 }
 0x46c   : > { %1982 = vst.msk [vmem:[#allocation3 + $0x30] sm:$0xff] %vm1967_vm0, %v6281_v25  ;;  %4629 = vpow2.f32 %v3937_v52  ;;  %v1913_v27 = vadd.f32 1.0, %v4620_v42  ;;  %1974 = vst.msk [vmem:[#allocation2 + $0x30] sm:$0xff] %vm1967_vm0, %v6285_v8  ;;  %v1695_v18 = vpop.f32.mrb[45].mxu1  ;;  %v1808_v30 = vpop.f32.mrb[45].mxu0  ;;  %v1807_v56 = vadd.f32 %v1806_v41, %v6113_v58 }
 0x46d   : > { %v4622_v48 = vpop.eup %4621  ;;  %v1809_v49 = vadd.f32 %v1808_v30, %v6111_v4  ;;  %v1697_v37 = vpop.f32.mrb[46].mxu1  ;;  %2152 = vrot.lane.b32.xlu0 %v6170_v35, %s5148_s30  ;;  %v1696_v44 = vadd.f32 %v1695_v18, %v6117_v40  ;;  %2187 = vrot.lane.b32.xlu1 %v6195_v33, %s5148_s30  ;;  %v1829_v47 = vmul.f32 0.17677669, %v1694_v63 }
 0x46e   : > { %v1810_v31 = vpop.f32.mrb[46].mxu0  ;;  %4631 = vrcp.f32 %v1913_v27  ;;  %v1914_v59 = vadd.f32 1.0, %v4622_v48  ;;  %v1698_v19 = vadd.f32 %v1697_v37, %v6109_v29  ;;  %v1699_v45 = vpop.f32.mrb[47].mxu1 }
 0x46f   : > { %v1812_v1 = vpop.f32.mrb[47].mxu0  ;;  %v3938_v55 = vmul.f32 -1.442695, %v1809_v49  ;;  %v1811_v24 = vadd.f32 %v1810_v31, %v6113_v58  ;;  %v1700_v53 = vadd.f32 %v1699_v45, %v6117_v40 }
 0x470   : > { %v1813_v57 = vadd.f32 %v1812_v1, %v6111_v4  ;;  %v4624_v0 = vpop.eup %4623  ;;  %4633 = vrcp.f32 %v1914_v59  ;;  %v1830_v39 = vmul.f32 0.17677669, %v1698_v19 }
 0x471   : > { %1959 = vst [vmem:[#allocation5 + $0x40] sm:$0xff] %v4624_v0  ;;  %4635 = vpow2.f32 %v3938_v55  ;;  %v6307_v15 = vpack.c.bf16 %v1811_v24, %v1807_v56  ;;  %v6309_v29 = vpack.c.bf16 %v1700_v53, %v1696_v44  ;;  %2251 = vrot.lane.b32.xlu0 %v6170_v35, %s5149_s12  ;;  %2286 = vrot.lane.b32.xlu1 %v6195_v33, %s5149_s12 }
 0x472   : > { %v3939_v2 = vmul.f32 -1.442695, %v1813_v57  ;;  %v4626_v7 = vpop.eup %4625  ;;  %v6313_v58 = vpack.c.bf16 %v1830_v39, %v1829_v47 }
 0x473   : > { %v4628_v4 = vpop.eup %4627  ;;  %1960 = vst [vmem:[#allocation5 + $0x48] sm:$0xff] %v4626_v7  ;;  %1991 = vst.msk [vmem:[#allocation4 + $0x38] sm:$0xff] %vm1967_vm0, %v6307_v15 }
 0x474   : > { %1983 = vst.msk [vmem:[#allocation3 + $0x38] sm:$0xff] %vm1967_vm0, %v6309_v29  ;;  %4637 = vpow2.f32 %v3939_v2  ;;  %v1915_v40 = vadd.f32 1.0, %v4628_v4  ;;  %1975 = vst.msk [vmem:[#allocation2 + $0x38] sm:$0xff] %vm1967_vm0, %v6313_v58 }
 0x475   : > { %2119 = vrot.lane.b32.xlu0 %v6174_v26, %s5148_s30  ;;  %2047 = vrot.lane.b32.xlu1 %v6197_v36, %s5147_s27 }
 0x476   : > { %v4630_v35 = vpop.eup %4629  ;;  %4639 = vrcp.f32 %v1915_v40 }
 0x477   : > { %v1916_v20 = vadd.f32 1.0, %v4630_v35 }
 0x478   : > { %v4632_v33 = vpop.eup %4631 }
 0x479   : > { %4641 = vrcp.f32 %v1916_v20  ;;  %1961 = vst [vmem:[#allocation5 + $0x50] sm:$0xff] %v4632_v33  ;;  %2218 = vrot.lane.b32.xlu0 %v6174_v26, %s5149_s12  ;;  %2154 = vrot.lane.b32.xlu1 %v6197_v36, %s5148_s30 }
 0x47a   : > { %v4634_v34 = vpop.eup %4633 }
 0x47b   : > { %v4636_v12 = vpop.eup %4635  ;;  %1962 = vst [vmem:[#allocation5 + $0x58] sm:$0xff] %v4634_v34 }
 0x47c   : > { %v1917_v6 = vadd.f32 1.0, %v4636_v12 }
 0x47d   : > { %2090 = vrot.lane.b32.xlu0 %v6223_v62, %s5147_s27  ;;  %2253 = vrot.lane.b32.xlu1 %v6197_v36, %s5149_s12 }
 0x47e   : > { %v4638_v5 = vpop.eup %4637  ;;  %4643 = vrcp.f32 %v1917_v6 }
 0x47f   : > { %v1918_v43 = vadd.f32 1.0, %v4638_v5 }
 0x480   : > { %v4640_v28 = vpop.eup %4639 }
 0x481   : > { %4645 = vrcp.f32 %v1918_v43  ;;  %1963 = vst [vmem:[#allocation5 + $0x60] sm:$0xff] %v4640_v28  ;;  %2189 = vrot.lane.b32.xlu0 %v6223_v62, %s5148_s30  ;;  %2006 = vrot.lane.b32.xlu1 %v6201_v61, %s5147_s27 }
 0x483   : > { %v4642_v26 = vpop.eup %4641 }
 0x484   : > { %1964 = vst [vmem:[#allocation5 + $0x68] sm:$0xff] %v4642_v26 }
 0x485   : > { %2288 = vrot.lane.b32.xlu0 %v6223_v62, %s5149_s12  ;;  %2121 = vrot.lane.b32.xlu1 %v6201_v61, %s5148_s30 }
 0x488   : > { %v4644_v3 = vpop.eup %4643 }
 0x489   : > { %1965 = vst [vmem:[#allocation5 + $0x70] sm:$0xff] %v4644_v3  ;;  %2049 = vrot.lane.b32.xlu0 %v6225_v14, %s5147_s27  ;;  %2220 = vrot.lane.b32.xlu1 %v6201_v61, %s5149_s12 }
 0x48b   : > { %v4646_v36 = vpop.eup %4645 }
 0x48c   : > { %1966 = vst [vmem:[#allocation5 + $0x78] sm:$0xff] %v4646_v36 }
 0x48d   : > { %2156 = vrot.lane.b32.xlu0 %v6225_v14, %s5148_s30  ;;  %2092 = vrot.lane.b32.xlu1 %v6251_v22, %s5147_s27 }
 0x491   : > { %2255 = vrot.lane.b32.xlu0 %v6225_v14, %s5149_s12  ;;  %2191 = vrot.lane.b32.xlu1 %v6251_v22, %s5148_s30 }
 0x495   : > { %2008 = vrot.lane.b32.xlu0 %v6229_v32, %s5147_s27  ;;  %2290 = vrot.lane.b32.xlu1 %v6251_v22, %s5149_s12 }
 0x499   : > { %2123 = vrot.lane.b32.xlu0 %v6229_v32, %s5148_s30  ;;  %2051 = vrot.lane.b32.xlu1 %v6253_v23, %s5147_s27 }
 0x49d   : > { %2222 = vrot.lane.b32.xlu0 %v6229_v32, %s5149_s12  ;;  %2158 = vrot.lane.b32.xlu1 %v6253_v23, %s5148_s30 }
 0x4a1   : > { %2094 = vrot.lane.b32.xlu0 %v6279_v21, %s5147_s27  ;;  %2257 = vrot.lane.b32.xlu1 %v6253_v23, %s5149_s12 }
 0x4a5   : > { %2193 = vrot.lane.b32.xlu0 %v6279_v21, %s5148_s30  ;;  %2010 = vrot.lane.b32.xlu1 %v6257_v54, %s5147_s27 }
 0x4a9   : > { %2053 = vrot.lane.b32.xlu0 %v6281_v25, %s5147_s27  ;;  %2125 = vrot.lane.b32.xlu1 %v6257_v54, %s5148_s30 }
 0x4ab   : > { %v2083_v61 = vpop.permute.xlu0 %2082 }
 0x4ac   : > { %2107 = vst.msk [vmem:[#allocation4 + $0x40] sm:$0xff] %vm1967_vm0, %v2083_v61 }
 0x4ad   : > { %2160 = vrot.lane.b32.xlu0 %v6281_v25, %s5148_s30  ;;  %2224 = vrot.lane.b32.xlu1 %v6257_v54, %s5149_s12 }
 0x4af   : > { %v2182_v62 = vpop.permute.xlu0 %2181 }
 0x4b0   : > { %2206 = vst.msk [vmem:[#allocation4 + $0x80] sm:$0xff] %vm1967_vm0, %v2182_v62 }
 0x4b1   : > { %2259 = vrot.lane.b32.xlu0 %v6281_v25, %s5149_s12  ;;  %2096 = vrot.lane.b32.xlu1 %v6307_v15, %s5147_s27 }
 0x4b3   : > { %v2281_v14 = vpop.permute.xlu0 %2280  ;;  %v2085_v32 = vpop.permute.xlu1 %2084 }
 0x4b4   : > { %2305 = vst.msk [vmem:[#allocation4 + $0xc0] sm:$0xff] %vm1967_vm0, %v2281_v14  ;;  %2108 = vst.msk [vmem:[#allocation4 + $0x48] sm:$0xff] %vm1967_vm0, %v2085_v32 }
 0x4b5   : > { %2012 = vrot.lane.b32.xlu0 %v6285_v8, %s5147_s27  ;;  %2195 = vrot.lane.b32.xlu1 %v6307_v15, %s5148_s30 }
 0x4b7   : > { %v2042_v22 = vpop.permute.xlu0 %2041  ;;  %v2184_v23 = vpop.permute.xlu1 %2183 }
 0x4b8   : > { %2066 = vst.msk [vmem:[#allocation3 + $0x40] sm:$0xff] %vm1967_vm0, %v2042_v22  ;;  %2207 = vst.msk [vmem:[#allocation4 + $0x88] sm:$0xff] %vm1967_vm0, %v2184_v23 }
 0x4b9   : > { %2127 = vrot.lane.b32.xlu0 %v6285_v8, %s5148_s30  ;;  %2055 = vrot.lane.b32.xlu1 %v6309_v29, %s5147_s27 }
 0x4bb   : > { %v2149_v54 = vpop.permute.xlu0 %2148  ;;  %v2283_v17 = vpop.permute.xlu1 %2282 }
 0x4bc   : > { %2173 = vst.msk [vmem:[#allocation3 + $0x80] sm:$0xff] %vm1967_vm0, %v2149_v54  ;;  %2306 = vst.msk [vmem:[#allocation4 + $0xc8] sm:$0xff] %vm1967_vm0, %v2283_v17 }
 0x4bd   : > { %2226 = vrot.lane.b32.xlu0 %v6285_v8, %s5149_s12  ;;  %2162 = vrot.lane.b32.xlu1 %v6309_v29, %s5148_s30 }
 0x4bf   : > { %v2248_v11 = vpop.permute.xlu0 %2247  ;;  %v2044_v16 = vpop.permute.xlu1 %2043 }
 0x4c0   : > { %2272 = vst.msk [vmem:[#allocation3 + $0xc0] sm:$0xff] %vm1967_vm0, %v2248_v11  ;;  %2067 = vst.msk [vmem:[#allocation3 + $0x48] sm:$0xff] %vm1967_vm0, %v2044_v16 }
 0x4c1   : > { %2292 = vrot.lane.b32.xlu0 %v6279_v21, %s5149_s12  ;;  %2261 = vrot.lane.b32.xlu1 %v6309_v29, %s5149_s12 }
 0x4c3   : > { %v2001_v10 = vpop.permute.xlu0 %2000  ;;  %v2151_v13 = vpop.permute.xlu1 %2150 }
 0x4c4   : > { %2025 = vst.msk [vmem:[#allocation2 + $0x40] sm:$0xff] %vm1967_vm0, %v2001_v10  ;;  %2174 = vst.msk [vmem:[#allocation3 + $0x88] sm:$0xff] %vm1967_vm0, %v2151_v13 }
 0x4c5   : > { %2014 = vrot.lane.b32.xlu1 %v6313_v58, %s5147_s27 }
 0x4c7   : > { %v2116_v60 = vpop.permute.xlu0 %2115  ;;  %v2250_v9 = vpop.permute.xlu1 %2249 }
 0x4c8   : > { %2140 = vst.msk [vmem:[#allocation2 + $0x80] sm:$0xff] %vm1967_vm0, %v2116_v60  ;;  %2273 = vst.msk [vmem:[#allocation3 + $0xc8] sm:$0xff] %vm1967_vm0, %v2250_v9 }
 0x4c9   : > { %2129 = vrot.lane.b32.xlu1 %v6313_v58, %s5148_s30 }
 0x4cb   : > { %v2215_v46 = vpop.permute.xlu0 %2214  ;;  %v2003_v50 = vpop.permute.xlu1 %2002 }
 0x4cc   : > { %2239 = vst.msk [vmem:[#allocation2 + $0xc0] sm:$0xff] %vm1967_vm0, %v2215_v46  ;;  %2026 = vst.msk [vmem:[#allocation2 + $0x48] sm:$0xff] %vm1967_vm0, %v2003_v50 }
 0x4cd   : > { %2228 = vrot.lane.b32.xlu1 %v6313_v58, %s5149_s12 }
 0x4cf   : > { %v2087_v21 = vpop.permute.xlu0 %2086  ;;  %v2118_v25 = vpop.permute.xlu1 %2117 }
 0x4d0   : > { %2109 = vst.msk [vmem:[#allocation4 + $0x50] sm:$0xff] %vm1967_vm0, %v2087_v21  ;;  %2141 = vst.msk [vmem:[#allocation2 + $0x88] sm:$0xff] %vm1967_vm0, %v2118_v25 }
 0x4d1   : > { %2294 = vrot.lane.b32.xlu1 %v6307_v15, %s5149_s12 }
 0x4d3   : > { %v2186_v52 = vpop.permute.xlu0 %2185  ;;  %v2217_v38 = vpop.permute.xlu1 %2216 }
 0x4d4   : > { %2208 = vst.msk [vmem:[#allocation4 + $0x90] sm:$0xff] %vm1967_vm0, %v2186_v52  ;;  %2240 = vst.msk [vmem:[#allocation2 + $0xc8] sm:$0xff] %vm1967_vm0, %v2217_v38 }
 0x4d7   : > { %v2285_v8 = vpop.permute.xlu0 %2284  ;;  %v2005_v42 = vpop.permute.xlu1 %2004 }
 0x4d8   : > { %2307 = vst.msk [vmem:[#allocation4 + $0xd0] sm:$0xff] %vm1967_vm0, %v2285_v8  ;;  %2027 = vst.msk [vmem:[#allocation2 + $0x50] sm:$0xff] %vm1967_vm0, %v2005_v42 }
 0x4db   : > { %v2046_v51 = vpop.permute.xlu0 %2045  ;;  %v2089_v41 = vpop.permute.xlu1 %2088 }
 0x4dc   : > { %2068 = vst.msk [vmem:[#allocation3 + $0x50] sm:$0xff] %vm1967_vm0, %v2046_v51  ;;  %2110 = vst.msk [vmem:[#allocation4 + $0x58] sm:$0xff] %vm1967_vm0, %v2089_v41 }
 0x4df   : > { %v2153_v27 = vpop.permute.xlu0 %2152  ;;  %v2188_v63 = vpop.permute.xlu1 %2187 }
 0x4e0   : > { %2175 = vst.msk [vmem:[#allocation3 + $0x90] sm:$0xff] %vm1967_vm0, %v2153_v27  ;;  %2209 = vst.msk [vmem:[#allocation4 + $0x98] sm:$0xff] %vm1967_vm0, %v2188_v63 }
 0x4e3   : > { %v2252_v18 = vpop.permute.xlu0 %2251  ;;  %v2287_v30 = vpop.permute.xlu1 %2286 }
 0x4e4   : > { %2274 = vst.msk [vmem:[#allocation3 + $0xd0] sm:$0xff] %vm1967_vm0, %v2252_v18  ;;  %2308 = vst.msk [vmem:[#allocation4 + $0xd8] sm:$0xff] %vm1967_vm0, %v2287_v30 }
 0x4e7   : > { %v2120_v48 = vpop.permute.xlu0 %2119  ;;  %v2048_v56 = vpop.permute.xlu1 %2047 }
 0x4e8   : > { %2142 = vst.msk [vmem:[#allocation2 + $0x90] sm:$0xff] %vm1967_vm0, %v2120_v48  ;;  %2069 = vst.msk [vmem:[#allocation3 + $0x58] sm:$0xff] %vm1967_vm0, %v2048_v56 }
 0x4eb   : > { %v2219_v49 = vpop.permute.xlu0 %2218  ;;  %v2155_v37 = vpop.permute.xlu1 %2154 }
 0x4ec   : > { %2241 = vst.msk [vmem:[#allocation2 + $0xd0] sm:$0xff] %vm1967_vm0, %v2219_v49  ;;  %2176 = vst.msk [vmem:[#allocation3 + $0x98] sm:$0xff] %vm1967_vm0, %v2155_v37 }
 0x4ef   : > { %v2091_v31 = vpop.permute.xlu0 %2090  ;;  %v2254_v59 = vpop.permute.xlu1 %2253 }
 0x4f0   : > { %2111 = vst.msk [vmem:[#allocation4 + $0x60] sm:$0xff] %vm1967_vm0, %v2091_v31  ;;  %2275 = vst.msk [vmem:[#allocation3 + $0xd8] sm:$0xff] %vm1967_vm0, %v2254_v59 }
 0x4f3   : > { %v2190_v44 = vpop.permute.xlu0 %2189  ;;  %v2007_v19 = vpop.permute.xlu1 %2006 }
 0x4f4   : > { %2210 = vst.msk [vmem:[#allocation4 + $0xa0] sm:$0xff] %vm1967_vm0, %v2190_v44  ;;  %2028 = vst.msk [vmem:[#allocation2 + $0x58] sm:$0xff] %vm1967_vm0, %v2007_v19 }
 0x4f7   : > { %v2289_v45 = vpop.permute.xlu0 %2288  ;;  %v2122_v1 = vpop.permute.xlu1 %2121 }
 0x4f8   : > { %2309 = vst.msk [vmem:[#allocation4 + $0xe0] sm:$0xff] %vm1967_vm0, %v2289_v45  ;;  %2143 = vst.msk [vmem:[#allocation2 + $0x98] sm:$0xff] %vm1967_vm0, %v2122_v1 }
 0x4fb   : > { %v2050_v55 = vpop.permute.xlu0 %2049  ;;  %v2221_v24 = vpop.permute.xlu1 %2220 }
 0x4fc   : > { %2070 = vst.msk [vmem:[#allocation3 + $0x60] sm:$0xff] %vm1967_vm0, %v2050_v55  ;;  %2242 = vst.msk [vmem:[#allocation2 + $0xd8] sm:$0xff] %vm1967_vm0, %v2221_v24 }
 0x4ff   : > { %v2157_v53 = vpop.permute.xlu0 %2156  ;;  %v2093_v57 = vpop.permute.xlu1 %2092 }
 0x500   : > { %2177 = vst.msk [vmem:[#allocation3 + $0xa0] sm:$0xff] %vm1967_vm0, %v2157_v53  ;;  %2112 = vst.msk [vmem:[#allocation4 + $0x68] sm:$0xff] %vm1967_vm0, %v2093_v57 }
 0x503   : > { %v2256_v0 = vpop.permute.xlu0 %2255  ;;  %v2192_v47 = vpop.permute.xlu1 %2191 }
 0x504   : > { %2276 = vst.msk [vmem:[#allocation3 + $0xe0] sm:$0xff] %vm1967_vm0, %v2256_v0  ;;  %2211 = vst.msk [vmem:[#allocation4 + $0xa8] sm:$0xff] %vm1967_vm0, %v2192_v47 }
 0x507   : > { %v2009_v39 = vpop.permute.xlu0 %2008  ;;  %v2291_v15 = vpop.permute.xlu1 %2290 }
 0x508   : > { %2029 = vst.msk [vmem:[#allocation2 + $0x60] sm:$0xff] %vm1967_vm0, %v2009_v39  ;;  %2310 = vst.msk [vmem:[#allocation4 + $0xe8] sm:$0xff] %vm1967_vm0, %v2291_v15 }
 0x50b   : > { %v2124_v29 = vpop.permute.xlu0 %2123  ;;  %v2052_v2 = vpop.permute.xlu1 %2051 }
 0x50c   : > { %2144 = vst.msk [vmem:[#allocation2 + $0xa0] sm:$0xff] %vm1967_vm0, %v2124_v29  ;;  %2071 = vst.msk [vmem:[#allocation3 + $0x68] sm:$0xff] %vm1967_vm0, %v2052_v2 }
 0x50f   : > { %v2223_v7 = vpop.permute.xlu0 %2222  ;;  %v2159_v58 = vpop.permute.xlu1 %2158 }
 0x510   : > { %2243 = vst.msk [vmem:[#allocation2 + $0xe0] sm:$0xff] %vm1967_vm0, %v2223_v7  ;;  %2178 = vst.msk [vmem:[#allocation3 + $0xa8] sm:$0xff] %vm1967_vm0, %v2159_v58 }
 0x513   : > { %v2095_v4 = vpop.permute.xlu0 %2094  ;;  %v2258_v40 = vpop.permute.xlu1 %2257 }
 0x514   : > { %2113 = vst.msk [vmem:[#allocation4 + $0x70] sm:$0xff] %vm1967_vm0, %v2095_v4  ;;  %2277 = vst.msk [vmem:[#allocation3 + $0xe8] sm:$0xff] %vm1967_vm0, %v2258_v40 }
 0x517   : > { %v2194_v35 = vpop.permute.xlu0 %2193  ;;  %v2011_v20 = vpop.permute.xlu1 %2010 }
 0x518   : > { %2212 = vst.msk [vmem:[#allocation4 + $0xb0] sm:$0xff] %vm1967_vm0, %v2194_v35  ;;  %2030 = vst.msk [vmem:[#allocation2 + $0x68] sm:$0xff] %vm1967_vm0, %v2011_v20 }
 0x51b   : > { %v2054_v33 = vpop.permute.xlu0 %2053  ;;  %v2126_v34 = vpop.permute.xlu1 %2125 }
 0x51c   : > { %2072 = vst.msk [vmem:[#allocation3 + $0x70] sm:$0xff] %vm1967_vm0, %v2054_v33  ;;  %2145 = vst.msk [vmem:[#allocation2 + $0xa8] sm:$0xff] %vm1967_vm0, %v2126_v34 }
 0x51f   : > { %v2161_v12 = vpop.permute.xlu0 %2160  ;;  %v2225_v6 = vpop.permute.xlu1 %2224 }
 0x520   : > { %2179 = vst.msk [vmem:[#allocation3 + $0xb0] sm:$0xff] %vm1967_vm0, %v2161_v12  ;;  %2244 = vst.msk [vmem:[#allocation2 + $0xe8] sm:$0xff] %vm1967_vm0, %v2225_v6 }
 0x523   : > { %v2260_v5 = vpop.permute.xlu0 %2259  ;;  %v2097_v43 = vpop.permute.xlu1 %2096 }
 0x524   : > { %2278 = vst.msk [vmem:[#allocation3 + $0xf0] sm:$0xff] %vm1967_vm0, %v2260_v5  ;;  %2114 = vst.msk [vmem:[#allocation4 + $0x78] sm:$0xff] %vm1967_vm0, %v2097_v43 }
 0x527   : > { %v2013_v28 = vpop.permute.xlu0 %2012  ;;  %v2196_v26 = vpop.permute.xlu1 %2195 }
 0x528   : > { %2031 = vst.msk [vmem:[#allocation2 + $0x70] sm:$0xff] %vm1967_vm0, %v2013_v28  ;;  %2213 = vst.msk [vmem:[#allocation4 + $0xb8] sm:$0xff] %vm1967_vm0, %v2196_v26 }
 0x52b   : > { %v2128_v3 = vpop.permute.xlu0 %2127  ;;  %v2056_v36 = vpop.permute.xlu1 %2055 }
 0x52c   : > { %2146 = vst.msk [vmem:[#allocation2 + $0xb0] sm:$0xff] %vm1967_vm0, %v2128_v3  ;;  %2073 = vst.msk [vmem:[#allocation3 + $0x78] sm:$0xff] %vm1967_vm0, %v2056_v36 }
 0x52f   : > { %v2227_v61 = vpop.permute.xlu0 %2226  ;;  %v2163_v62 = vpop.permute.xlu1 %2162 }
 0x530   : > { %2245 = vst.msk [vmem:[#allocation2 + $0xf0] sm:$0xff] %vm1967_vm0, %v2227_v61  ;;  %2180 = vst.msk [vmem:[#allocation3 + $0xb8] sm:$0xff] %vm1967_vm0, %v2163_v62 }
 0x533   : > { %v2293_v14 = vpop.permute.xlu0 %2292  ;;  %v2262_v32 = vpop.permute.xlu1 %2261 }
 0x534   : > { %2311 = vst.msk [vmem:[#allocation4 + $0xf0] sm:$0xff] %vm1967_vm0, %v2293_v14  ;;  %2279 = vst.msk [vmem:[#allocation3 + $0xf8] sm:$0xff] %vm1967_vm0, %v2262_v32 }
 0x537   : > { %v2015_v22 = vpop.permute.xlu1 %2014 }
 0x538   : > { %2032 = vst.msk [vmem:[#allocation2 + $0x78] sm:$0xff] %vm1967_vm0, %v2015_v22 }
 0x53b   : > { %v2130_v23 = vpop.permute.xlu1 %2129 }
 0x53c   : > { %2147 = vst.msk [vmem:[#allocation2 + $0xb8] sm:$0xff] %vm1967_vm0, %v2130_v23 }
 0x53f   : > { %v2229_v54 = vpop.permute.xlu1 %2228 }
 0x540   : > { %2246 = vst.msk [vmem:[#allocation2 + $0xf8] sm:$0xff] %vm1967_vm0, %v2229_v54 }
 0x543   : > { %v2295_v17 = vpop.permute.xlu1 %2294 }
 0x544   : > { %2312 = vst.msk [vmem:[#allocation4 + $0xf8] sm:$0xff] %vm1967_vm0, %v2295_v17 }
 0x545 PF: > { %s7095_s10 = sld [smem:[#allocation27_spill]]  ;;  %vm2353_vm1 = vcmask 261120   ;;  %v2348_v31 = vlaneseq  ;;  %v2313_v59 = vld [vmem:[%s596_s9] sm:$0x1]  ;;  %v2501_v53 = vld [vmem:[%s5607_s18 + $0x10] sm:$0xff]  ;;  %v2502_v40 = vld [vmem:[%s5607_s18 + $0x18] sm:$0xff] }
 0x546   : > { %v3940_v44 = vadd.f32 -1.0, %v2313_v59  ;;  %v2499_v47 = vld [vmem:[%s5607_s18] sm:$0xff]  ;;  %v2500_v35 = vld [vmem:[%s5607_s18 + $0x8] sm:$0xff]  ;;  %v2505_v62 = vld [vmem:[%s5607_s18 + $0x30] sm:$0xff] }
 0x547   : > { %v2349_v19 = vshrl.u32 %v2348_v31, 7  ;;  %v2503_v6 = vld [vmem:[%s5607_s18 + $0x20] sm:$0xff]  ;;  %v2504_v26 = vld [vmem:[%s5607_s18 + $0x28] sm:$0xff]  ;;  %v2506_v22 = vld [vmem:[%s5607_s18 + $0x38] sm:$0xff] }
 0x548   : > { %v2315_v45 = vmul.f32 1e+09, %v3940_v44  ;;  %v2513_v59 = vld [vmem:[%s5607_s18 + $0x70] sm:$0xff] }
 0x549   : > { %v2350_v1 = vsub.s32 0, %v2349_v19 }
 0x54b   : > { %s6484_s3 = sshll.u32 %s7095_s10, 6  ;;  %v6537_v55 = vrot.slane %v2315_v45, %v2350_v1  ;;  %v2514_v45 = vld [vmem:[%s5607_s18 + $0x78] sm:$0xff]  ;;  %p3954_p4 = scmp.ne.s32.totalorder %s7095_s10, 3 }
 0x54c   : > { %s6487_s11 = scalar_lea.vmem [#allocation3], %s6484_s3  ;;  %s6494_s14 = scalar_lea.vmem [#allocation2], %s6484_s3  ;;  %vm3077_vm2 = vcmask (!%p3954_p4), 523264   ;;  %vm3094_vm3 = vcmask (!%p3954_p4), 785408  }
 0x54d   : > { %v2329_v11 = vld [vmem:[%s6487_s11] sm:$0xff]  ;;  %v2330_v16 = vld [vmem:[%s6487_s11 + $0x8] sm:$0xff]  ;;  %v2331_v9 = vld [vmem:[%s6487_s11 + $0x10] sm:$0xff]  ;;  %s6620_s1 = scalar_lea.vmem [#allocation4], %s6484_s3  ;;  %s5150_s21 = smov (!%p3954_p4), 32  }
 0x54e   : > { %4207 = vmatprep.subr.msk.bf16.mxu0 %vm2353_vm1, %v2329_v11  ;;  %v2379_v10 = vsel %vm2353_vm1, %v2329_v11, 0  ;;  %v2319_v13 = vld [vmem:[%s6494_s14] sm:$0xff]  ;;  %v2382_v60 = vsel %vm2353_vm1, %v2330_v16, 0  ;;  %v2385_v46 = vsel %vm2353_vm1, %v2331_v9, 0  ;;  %v2332_v50 = vld [vmem:[%s6487_s11 + $0x18] sm:$0xff]  ;;  %v2334_v38 = vld [vmem:[%s6487_s11 + $0x28] sm:$0xff] }
 0x54f   : > { %4064 = vmatpush3.bf16.xpose.msra.mxu0 %v2379_v10  ;;  %4079 = vmatprep.mubr.msk.bf16.mxu0 %vm2353_vm1, %v2319_v13  ;;  %v2388_v21 = vsel %vm2353_vm1, %v2332_v50, 0  ;;  %v2333_v25 = vld [vmem:[%s6487_s11 + $0x20] sm:$0xff]  ;;  %v2394_v8 = vsel %vm2353_vm1, %v2334_v38, 0  ;;  %v2335_v42 = vld [vmem:[%s6487_s11 + $0x30] sm:$0xff]  ;;  %v2336_v41 = vld [vmem:[%s6487_s11 + $0x38] sm:$0xff]  ;;  %s5151_s6 = smov (!%p3954_p4), 64  }
 0x550   : > { %4208 = vmatprep.subr.msk.bf16.mxu0 %vm2353_vm1, %v2330_v16  ;;  %v2391_v52 = vsel %vm2353_vm1, %v2333_v25, 0  ;;  %v2397_v51 = vsel %vm2353_vm1, %v2335_v42, 0  ;;  %v2400_v27 = vsel %vm2353_vm1, %v2336_v41, 0  ;;  %v2320_v63 = vld [vmem:[%s6494_s14 + $0x8] sm:$0xff]  ;;  %v2321_v18 = vld [vmem:[%s6494_s14 + $0x10] sm:$0xff]  ;;  %v2322_v30 = vld [vmem:[%s6494_s14 + $0x18] sm:$0xff] }
 0x551   : > { %v2323_v48 = vld [vmem:[%s6494_s14 + $0x20] sm:$0xff]  ;;  %v2324_v56 = vld [vmem:[%s6494_s14 + $0x28] sm:$0xff]  ;;  %v2325_v49 = vld [vmem:[%s6494_s14 + $0x30] sm:$0xff]  ;;  %s5152_s5 = smov (!%p3954_p4), 96   ;;  %s7097_s2 = sld [smem:[#allocation47_spill]] (!%p3954_p4) }
 0x552   : > { %v2326_v37 = vld [vmem:[%s6494_s14 + $0x38] sm:$0xff]  ;;  %v2507_v11 = vld [vmem:[%s5607_s18 + $0x40] sm:$0xff] }
 0x557   : > { %4066 = vmatpush3.bf16.xpose.msra.mxu0 %v2382_v60 }
 0x558   : > { %4209 = vmatprep.subr.msk.bf16.mxu0 %vm2353_vm1, %v2331_v9  ;;  %v2508_v9 = vld [vmem:[%s5607_s18 + $0x48] sm:$0xff] }
 0x55f   : > { %4068 = vmatpush3.bf16.xpose.msra.mxu0 %v2385_v46 }
 0x560   : > { %4210 = vmatprep.subr.msk.bf16.mxu0 %vm2353_vm1, %v2332_v50 }
 0x567   : > { %4070 = vmatpush3.bf16.xpose.msra.mxu0 %v2388_v21 }
 0x568   : > { %4211 = vmatprep.subr.msk.bf16.mxu0 %vm2353_vm1, %v2333_v25  ;;  %v2509_v25 = vld [vmem:[%s5607_s18 + $0x50] sm:$0xff] }
 0x56f   : > { %4072 = vmatpush3.bf16.xpose.msra.mxu0 %v2391_v52 }
 0x570   : > { %4212 = vmatprep.subr.msk.bf16.mxu0 %vm2353_vm1, %v2334_v38 }
 0x577   : > { %4074 = vmatpush3.bf16.xpose.msra.mxu0 %v2394_v8  ;;  %v2510_v8 = vld [vmem:[%s5607_s18 + $0x58] sm:$0xff] }
 0x578   : > { %4213 = vmatprep.subr.msk.bf16.mxu0 %vm2353_vm1, %v2335_v42 }
 0x57f   : > { %4076 = vmatpush3.bf16.xpose.msra.mxu0 %v2397_v51 }
 0x580   : > { %4214 = vmatprep.subr.msk.bf16.mxu0 %vm2353_vm1, %v2336_v41 }
 0x587   : > { %4078 = vmatpush3.bf16.xpose.msra.mxu0 %v2400_v27  ;;  %v2511_v27 = vld [vmem:[%s5607_s18 + $0x60] sm:$0xff] }
 0x58e   : > { %4080 = vmatmul.mubr.msk.bf16.vlgmr.msra.gmra.mrb[0].mxu0 %vm2353_vm1, %v2320_v63 }
 0x58f   : > { %4083 = vmatprep.mubr.msk.bf16.mxu0 %vm2353_vm1, %v2321_v18 }
 0x596   : > { %4084 = vmatmul.mubr.msk.bf16.gmra.mrb[4].mxu0 %vm2353_vm1, %v2322_v30 }
 0x597   : > { %4087 = vmatprep.mubr.msk.bf16.mxu0 %vm2353_vm1, %v2323_v48 }
 0x59e   : > { %4088 = vmatmul.mubr.msk.bf16.gmra.mrb[8].mxu0 %vm2353_vm1, %v2324_v56  ;;  %v2512_v56 = vld [vmem:[%s5607_s18 + $0x68] sm:$0xff]  ;;  %s3953_s18 = sshll.u32 %s7095_s10, 7 }
 0x59f   : > { %4091 = vmatprep.mubr.msk.bf16.mxu0 %vm2353_vm1, %v2325_v49  ;;  %s6711_s9 = scalar_lea.vmem [#allocation6], %s3953_s18 }
 0x5a6   : > { %4092 = vmatmul.mubr.msk.bf16.gmra.mrb[12].mxu0 %vm2353_vm1, %v2326_v37 }
 0x661   : > { %v4081_v24 = vpop.f32.mrb[0].mxu0 }
 0x662   : > { %v2445_v57 = vadd.f32 %v4081_v24, %v6537_v55  ;;  %v2436_v0 = vpop.f32.mrb[1].mxu0 }
 0x663   : > { %v2437_v39 = vadd.f32 %v2436_v0, %v6537_v55  ;;  %v4082_v15 = vpop.f32.mrb[2].mxu0 }
 0x664   : > { %v2448_v29 = vadd.f32 %v4082_v15, %v6537_v55  ;;  %v2439_v2 = vpop.f32.mrb[3].mxu0  ;;  %v6544_v7 = vadd.f32 %v2501_v53, %v2445_v57  ;;  %v2340_v53 = vld [vmem:[%s6620_s1 + $0x8] sm:$0xff]  ;;  %v2341_v57 = vld [vmem:[%s6620_s1 + $0x10] sm:$0xff] }
 0x665   : > { %v2440_v58 = vadd.f32 %v2439_v2, %v6537_v55  ;;  %v6547_v4 = vadd.f32 %v2499_v47, %v2437_v39 }
 0x666   : > { %2535 = vmax.xlane.f32.xlu1 %v6544_v7  ;;  %v6553_v20 = vadd.f32 %v2502_v40, %v2448_v29 }
 0x667   : > { %2531 = vmax.xlane.f32.xlu0 %v6547_v4  ;;  %v6555_v34 = vadd.f32 %v2500_v35, %v2440_v58 }
 0x669   : > { %v4085_v33 = vpop.f32.mrb[4].mxu0 }
 0x66a   : > { %v2452_v12 = vpop.f32.mrb[5].mxu0  ;;  %2537 = vmax.xlane.f32.xlu1 %v6553_v20  ;;  %v2461_v3 = vadd.f32 %v4085_v33, %v6537_v55 }
 0x66b   : > { %v2453_v5 = vadd.f32 %v2452_v12, %v6537_v55  ;;  %v4086_v43 = vpop.f32.mrb[6].mxu0  ;;  %2533 = vmax.xlane.f32.xlu0 %v6555_v34 }
 0x66c   : > { %v2455_v28 = vpop.f32.mrb[7].mxu0  ;;  %v2464_v14 = vadd.f32 %v4086_v43, %v6537_v55  ;;  %v6573_v54 = vadd.f32 %v2505_v62, %v2461_v3 }
 0x66d   : > { %v2456_v36 = vadd.f32 %v2455_v28, %v6537_v55  ;;  %v6564_v61 = vadd.f32 %v2503_v6, %v2453_v5 }
 0x66e   : > { %v6578_v13 = vadd.f32 %v2506_v22, %v2464_v14 }
 0x66f   : > { %2539 = vmax.xlane.f32.xlu0 %v6564_v61  ;;  %v6569_v32 = vadd.f32 %v2504_v26, %v2456_v36 }
 0x671   : > { %v4089_v23 = vpop.f32.mrb[8].mxu0  ;;  %2541 = vmax.xlane.f32.xlu1 %v6569_v32 }
 0x672   : > { %v2468_v17 = vpop.f32.mrb[9].mxu0  ;;  %v2477_v46 = vadd.f32 %v4089_v23, %v6537_v55 }
 0x673   : > { %v2469_v16 = vadd.f32 %v2468_v17, %v6537_v55  ;;  %v4090_v10 = vpop.f32.mrb[10].mxu0  ;;  %2543 = vmax.xlane.f32.xlu0 %v6573_v54 }
 0x674   : > { %v2471_v60 = vpop.f32.mrb[11].mxu0  ;;  %v2480_v52 = vadd.f32 %v4090_v10, %v6537_v55  ;;  %v6593_v51 = vadd.f32 %v2509_v25, %v2477_v46 }
 0x675   : > { %v2472_v50 = vadd.f32 %v2471_v60, %v6537_v55  ;;  %2545 = vmax.xlane.f32.xlu1 %v6578_v13  ;;  %v6584_v21 = vadd.f32 %v2507_v11, %v2469_v16 }
 0x676   : > { %v6598_v30 = vadd.f32 %v2510_v8, %v2480_v52 }
 0x677   : > { %2547 = vmax.xlane.f32.xlu0 %v6584_v21  ;;  %v6589_v38 = vadd.f32 %v2508_v9, %v2472_v50 }
 0x679   : > { %v4093_v42 = vpop.f32.mrb[12].mxu0  ;;  %2549 = vmax.xlane.f32.xlu1 %v6589_v38 }
 0x67a   : > { %v2484_v41 = vpop.f32.mrb[13].mxu0  ;;  %v2493_v49 = vadd.f32 %v4093_v42, %v6537_v55 }
 0x67b   : > { %v2485_v63 = vadd.f32 %v2484_v41, %v6537_v55  ;;  %v4094_v18 = vpop.f32.mrb[14].mxu0  ;;  %2551 = vmax.xlane.f32.xlu0 %v6593_v51 }
 0x67c   : > { %v2487_v48 = vpop.f32.mrb[15].mxu0  ;;  %v2496_v44 = vadd.f32 %v4094_v18, %v6537_v55  ;;  %v6613_v1 = vadd.f32 %v2513_v59, %v2493_v49 }
 0x67d   : > { %v2488_v37 = vadd.f32 %v2487_v48, %v6537_v55  ;;  %2553 = vmax.xlane.f32.xlu1 %v6598_v30  ;;  %v6604_v31 = vadd.f32 %v2511_v27, %v2485_v63  ;;  %v2339_v55 = vld [vmem:[%s6620_s1] sm:$0xff] }
 0x67e   : > { %v6616_v24 = vadd.f32 %v2514_v45, %v2496_v44  ;;  %4095 = vmatprep.subr.bf16.mxu1 %v2339_v55 }
 0x67f   : > { %2555 = vmax.xlane.f32.xlu0 %v6604_v31  ;;  %v6609_v19 = vadd.f32 %v2512_v56, %v2488_v37  ;;  %4096 = vmatpush3.bf16.msra.mxu1 %v2339_v55  ;;  %v2342_v37 = vld [vmem:[%s6620_s1 + $0x18] sm:$0xff]  ;;  %v2343_v55 = vld [vmem:[%s6620_s1 + $0x20] sm:$0xff] }
 0x680   : > { %4097 = vmatprep.subr.bf16.mxu1 %v2340_v53 }
 0x681   : > { %2557 = vmax.xlane.f32.xlu1 %v6609_v19 }
 0x683   : > { %2559 = vmax.xlane.f32.xlu0 %v6613_v1  ;;  %4098 = vmatpush3.bf16.msra.mxu1 %v2340_v53 }
 0x684   : > { %4099 = vmatprep.subr.bf16.mxu1 %v2341_v57 }
 0x685   : > { %2561 = vmax.xlane.f32.xlu1 %v6616_v24 }
 0x687   : > { %4100 = vmatpush3.bf16.msra.mxu1 %v2341_v57  ;;  %v2344_v57 = vld [vmem:[%s6620_s1 + $0x28] sm:$0xff] }
 0x688   : > { %4101 = vmatprep.subr.bf16.mxu1 %v2342_v37 }
 0x68b   : > { %4102 = vmatpush3.bf16.msra.mxu1 %v2342_v37 }
 0x68c   : > { %4103 = vmatprep.subr.bf16.mxu1 %v2343_v55 }
 0x68f   : > { %4104 = vmatpush3.bf16.msra.mxu1 %v2343_v55 }
 0x690   : > { %4105 = vmatprep.subr.bf16.mxu1 %v2344_v57 }
 0x693   : > { %4106 = vmatpush3.bf16.msra.mxu1 %v2344_v57 }
 0x6f3   : > { %v2536_v0 = vpop.xlane.xlu1 %2535 }
 0x6f4   : > { %v2565_v47 = vsub.f32 %v6544_v7, %v2536_v0  ;;  %v2532_v39 = vpop.xlane.xlu0 %2531 }
 0x6f5   : > { %v2563_v15 = vsub.f32 %v6547_v4, %v2532_v39  ;;  %v2345_v39 = vld [vmem:[%s6620_s1 + $0x30] sm:$0xff] }
 0x6f6   : > { %v2583_v58 = vmul.f32 1.442695, %v2565_v47  ;;  %4107 = vmatprep.subr.bf16.mxu1 %v2345_v39 }
 0x6f7   : > { %v2579_v29 = vmul.f32 1.442695, %v2563_v15  ;;  %v2538_v2 = vpop.xlane.xlu1 %2537  ;;  %4108 = vmatpush3.bf16.msra.mxu1 %v2345_v39 }
 0x6f8   : > { %v2566_v40 = vsub.f32 %v6553_v20, %v2538_v2  ;;  %v2534_v35 = vpop.xlane.xlu0 %2533 }
 0x6f9   : > { %4647 = vpow2.f32 %v2579_v29  ;;  %v2564_v33 = vsub.f32 %v6555_v34, %v2534_v35  ;;  %v2346_v29 = vld [vmem:[%s6620_s1 + $0x38] sm:$0xff] }
 0x6fa   : > { %4649 = vpow2.f32 %v2583_v58  ;;  %v2585_v6 = vmul.f32 1.442695, %v2566_v40  ;;  %4109 = vmatprep.subr.bf16.mxu1 %v2346_v29 }
 0x6fb   : > { %v2581_v12 = vmul.f32 1.442695, %v2564_v33  ;;  %4110 = vmatpush3.bf16.msra.mxu1 %v2346_v29 }
 0x6fc   : > { %v2540_v5 = vpop.xlane.xlu0 %2539 }
 0x6fd   : > { %4651 = vpow2.f32 %v2581_v12  ;;  %v2567_v43 = vsub.f32 %v6564_v61, %v2540_v5 }
 0x6fe   : > { %v2542_v7 = vpop.xlane.xlu1 %2541  ;;  %4653 = vpow2.f32 %v2585_v6 }
 0x6ff   : > { %v2587_v28 = vmul.f32 1.442695, %v2567_v43  ;;  %v2568_v4 = vsub.f32 %v6569_v32, %v2542_v7 }
 0x700   : > { %v2544_v26 = vpop.xlane.xlu0 %2543 }
 0x701   : > { %4655 = vpow2.f32 %v2587_v28  ;;  %v2589_v3 = vmul.f32 1.442695, %v2568_v4  ;;  %v2569_v20 = vsub.f32 %v6573_v54, %v2544_v26 }
 0x702   : > { %v2546_v36 = vpop.xlane.xlu1 %2545 }
 0x703   : > { %v6632_v62 = vpop.eup %4647  ;;  %v2591_v34 = vmul.f32 1.442695, %v2569_v20  ;;  %v2570_v14 = vsub.f32 %v6578_v13, %v2546_v36  ;;  %4657 = vpow2.f32 %v2589_v3 }
 0x704   : > { %2611 = vadd.xlane.f32.xlu0 %v6632_v62  ;;  %v2548_v61 = vpop.xlane.xlu0 %2547  ;;  %v6637_v23 = vpop.eup %4649 }
 0x705   : > { %4659 = vpow2.f32 %v2591_v34  ;;  %v2593_v22 = vmul.f32 1.442695, %v2570_v14  ;;  %v2571_v32 = vsub.f32 %v6584_v21, %v2548_v61 }
 0x706   : > { %v2550_v17 = vpop.xlane.xlu1 %2549 }
 0x707   : > { %v6639_v11 = vpop.eup %4651  ;;  %v2595_v54 = vmul.f32 1.442695, %v2571_v32  ;;  %v2572_v16 = vsub.f32 %v6589_v38, %v2550_v17  ;;  %4661 = vpow2.f32 %v2593_v22 }
 0x708   : > { %2615 = vadd.xlane.f32.xlu0 %v6637_v23  ;;  %2613 = vadd.xlane.f32.xlu1 %v6639_v11  ;;  %v2552_v10 = vpop.xlane.xlu0 %2551  ;;  %v6645_v9 = vpop.eup %4653 }
 0x709   : > { %4663 = vpow2.f32 %v2595_v54  ;;  %v2597_v13 = vmul.f32 1.442695, %v2572_v16  ;;  %v2573_v60 = vsub.f32 %v6593_v51, %v2552_v10 }
 0x70a   : > { %v2554_v46 = vpop.xlane.xlu1 %2553 }
 0x70b   : > { %v6647_v50 = vpop.eup %4655  ;;  %v2599_v21 = vmul.f32 1.442695, %v2573_v60  ;;  %v2574_v25 = vsub.f32 %v6598_v30, %v2554_v46  ;;  %4665 = vpow2.f32 %v2597_v13 }
 0x70c   : > { %2617 = vadd.xlane.f32.xlu1 %v6645_v9  ;;  %2619 = vadd.xlane.f32.xlu0 %v6647_v50  ;;  %v2556_v52 = vpop.xlane.xlu0 %2555 }
 0x70d   : > { %4667 = vpow2.f32 %v2599_v21  ;;  %v2601_v38 = vmul.f32 1.442695, %v2574_v25  ;;  %v2575_v8 = vsub.f32 %v6604_v31, %v2556_v52  ;;  %v6653_v42 = vpop.eup %4657 }
 0x70e   : > { %v2558_v51 = vpop.xlane.xlu1 %2557 }
 0x70f   : > { %v6655_v41 = vpop.eup %4659  ;;  %v2603_v27 = vmul.f32 1.442695, %v2575_v8  ;;  %v2576_v63 = vsub.f32 %v6609_v19, %v2558_v51  ;;  %4669 = vpow2.f32 %v2601_v38 }
 0x710   : > { %2621 = vadd.xlane.f32.xlu1 %v6653_v42  ;;  %2623 = vadd.xlane.f32.xlu0 %v6655_v41  ;;  %v2560_v18 = vpop.xlane.xlu0 %2559 }
 0x711   : > { %4671 = vpow2.f32 %v2603_v27  ;;  %v2605_v30 = vmul.f32 1.442695, %v2576_v63  ;;  %v2577_v48 = vsub.f32 %v6613_v1, %v2560_v18  ;;  %v6661_v56 = vpop.eup %4661 }
 0x712   : > { %v2562_v49 = vpop.xlane.xlu1 %2561 }
 0x713   : > { %v6664_v31 = vpop.eup %4663  ;;  %v2607_v59 = vmul.f32 1.442695, %v2577_v48  ;;  %v2578_v44 = vsub.f32 %v6616_v24, %v2562_v49  ;;  %4673 = vpow2.f32 %v2605_v30 }
 0x714   : > { %2625 = vadd.xlane.f32.xlu1 %v6661_v56  ;;  %2627 = vadd.xlane.f32.xlu0 %v6664_v31 }
 0x715   : > { %4675 = vpow2.f32 %v2607_v59  ;;  %v2609_v19 = vmul.f32 1.442695, %v2578_v44  ;;  %v6669_v45 = vpop.eup %4665 }
 0x717   : > { %v6671_v1 = vpop.eup %4667  ;;  %4677 = vpow2.f32 %v2609_v19 }
 0x718   : > { %2629 = vadd.xlane.f32.xlu1 %v6669_v45  ;;  %2631 = vadd.xlane.f32.xlu0 %v6671_v1 }
 0x719   : > { %v6676_v24 = vpop.eup %4669 }
 0x71b   : > { %v6678_v53 = vpop.eup %4671 }
 0x71c   : > { %2633 = vadd.xlane.f32.xlu1 %v6676_v24  ;;  %2635 = vadd.xlane.f32.xlu0 %v6678_v53 }
 0x71d   : > { %v6683_v0 = vpop.eup %4673 }
 0x71f   : > { %v6685_v47 = vpop.eup %4675 }
 0x720   : > { %2637 = vadd.xlane.f32.xlu1 %v6683_v0  ;;  %2639 = vadd.xlane.f32.xlu0 %v6685_v47 }
 0x721   : > { %v6690_v15 = vpop.eup %4677 }
 0x724   : > { %2641 = vadd.xlane.f32.xlu1 %v6690_v15 }
 0x791   : > { %v2612_v2 = vpop.xlane.xlu0 %2611 }
 0x792   : > { %4679 = vrcp.f32 %v2612_v2 }
 0x795   : > { %v2614_v58 = vpop.xlane.xlu1 %2613  ;;  %v2616_v40 = vpop.xlane.xlu0 %2615 }
 0x796   : > { %4681 = vrcp.f32 %v2614_v58 }
 0x797   : > { %4683 = vrcp.f32 %v2616_v40 }
 0x799   : > { %v2618_v35 = vpop.xlane.xlu1 %2617  ;;  %v2620_v33 = vpop.xlane.xlu0 %2619 }
 0x79a   : > { %4685 = vrcp.f32 %v2618_v35 }
 0x79b   : > { %4687 = vrcp.f32 %v2620_v33 }
 0x79c   : > { %v4680_v5 = vpop.eup %4679 }
 0x79d   : > { %v2622_v12 = vpop.xlane.xlu1 %2621  ;;  %v2624_v6 = vpop.xlane.xlu0 %2623  ;;  %v2659_v4 = vmul.f32 %v4680_v5, %v6632_v62 }
 0x79e   : > { %4689 = vrcp.f32 %v2622_v12 }
 0x79f   : > { %4691 = vrcp.f32 %v2624_v6 }
 0x7a0   : > { %v4682_v43 = vpop.eup %4681 }
 0x7a1   : > { %v2626_v7 = vpop.xlane.xlu1 %2625  ;;  %v2628_v28 = vpop.xlane.xlu0 %2627  ;;  %v2660_v26 = vmul.f32 %v4682_v43, %v6639_v11 }
 0x7a2   : > { %v4684_v3 = vpop.eup %4683  ;;  %4693 = vrcp.f32 %v2626_v7 }
 0x7a3   : > { %v2675_v20 = vpack.c.bf16 %v2660_v26, %v2659_v4  ;;  %4695 = vrcp.f32 %v2628_v28  ;;  %v2661_v61 = vmul.f32 %v4684_v3, %v6637_v23 }
 0x7a4   : > { %v4686_v36 = vpop.eup %4685 }
 0x7a5   : > { %v2630_v34 = vpop.xlane.xlu1 %2629  ;;  %4111 = vmatprep.mubr.bf16.mxu1 %v2675_v20  ;;  %v2632_v14 = vpop.xlane.xlu0 %2631  ;;  %v2662_v22 = vmul.f32 %v4686_v36, %v6645_v9 }
 0x7a6   : > { %v4688_v32 = vpop.eup %4687  ;;  %4697 = vrcp.f32 %v2630_v34 }
 0x7a7   : > { %v2676_v17 = vpack.c.bf16 %v2662_v22, %v2661_v61  ;;  %4699 = vrcp.f32 %v2632_v14  ;;  %v2663_v16 = vmul.f32 %v4688_v32, %v6647_v50  ;;  %v4711_v61 = vld [vmem:[#allocation18] sm:$0xff] (!%p3954_p4)   ;;  %v4712_v22 = vld [vmem:[#allocation18 + $0x8] sm:$0xff] (!%p3954_p4)  }
 0x7a8   : > { %v4690_v54 = vpop.eup %4689  ;;  %4159 = vmatprep.subr.bf16.mxu1 (!%p3954_p4), %v4711_v61 }
 0x7a9   : > { %v2634_v62 = vpop.xlane.xlu1 %2633  ;;  %4112 = vmatmul.mubr.bf16.vlgmr.msra.gmra.mrb[0].mxu1 %v2676_v17  ;;  %v2636_v11 = vpop.xlane.xlu0 %2635  ;;  %v2664_v10 = vmul.f32 %v4690_v54, %v6653_v42  ;;  %v4713_v54 = vld [vmem:[#allocation18 + $0x10] sm:$0xff] (!%p3954_p4)  }
 0x7aa   : > { %v4692_v13 = vpop.eup %4691  ;;  %4701 = vrcp.f32 %v2634_v62  ;;  %4160 = vmatpush3.bf16.msra.mxu1 (!%p3954_p4), %v4711_v61  ;;  %v3327_v61 = vld [vmem:[%s5613_s0 + $0x78] sm:$0xff] (!%p3954_p4) }
 0x7ab   : > { %v2677_v60 = vpack.c.bf16 %v2664_v10, %v2663_v16  ;;  %4703 = vrcp.f32 %v2636_v11  ;;  %v2665_v21 = vmul.f32 %v4692_v13, %v6655_v41  ;;  %4161 = vmatprep.subr.bf16.mxu1 (!%p3954_p4), %v4712_v22  ;;  %v4714_v16 = vld [vmem:[#allocation18 + $0x18] sm:$0xff] (!%p3954_p4)   ;;  %v4718_v10 = vld [vmem:[#allocation16] sm:$0xff] (!%p3954_p4)  }
 0x7ac   : > { %v4694_v46 = vpop.eup %4693  ;;  %4127 = vmatprep.subr.bf16.mxu0 (!%p3954_p4), %v4718_v10 }
 0x7ad   : > { %v2638_v23 = vpop.xlane.xlu1 %2637  ;;  %4115 = vmatprep.mubr.bf16.mxu1 %v2677_v60  ;;  %v2640_v9 = vpop.xlane.xlu0 %2639  ;;  %v2666_v25 = vmul.f32 %v4694_v46, %v6661_v56  ;;  %v3312_v60 = vld [vmem:[%s5613_s0] sm:$0xff] (!%p3954_p4)  ;;  %v3313_v46 = vld [vmem:[%s5613_s0 + $0x8] sm:$0xff] (!%p3954_p4)  ;;  %4128 = vmatpush3.bf16.msra.mxu0 (!%p3954_p4), %v4718_v10 }
 0x7ae   : > { %v4696_v52 = vpop.eup %4695  ;;  %4705 = vrcp.f32 %v2638_v23  ;;  %4162 = vmatpush3.bf16.msra.mxu1 (!%p3954_p4), %v4712_v22 }
 0x7af   : > { %v2678_v38 = vpack.c.bf16 %v2666_v25, %v2665_v21  ;;  %4707 = vrcp.f32 %v2640_v9  ;;  %v2667_v42 = vmul.f32 %v4696_v52, %v6664_v31  ;;  %4163 = vmatprep.subr.bf16.mxu1 (!%p3954_p4), %v4713_v54  ;;  %v3328_v9 = vpack.c.bf16 (!%p3954_p4), %v3313_v46, %v3312_v60  ;;  %v4720_v21 = vld [vmem:[#allocation16 + $0x8] sm:$0xff] (!%p3954_p4)   ;;  %v4715_v25 = vld [vmem:[#allocation18 + $0x20] sm:$0xff] (!%p3954_p4)   ;;  %v4721_v52 = vld [vmem:[#allocation16 + $0x10] sm:$0xff] (!%p3954_p4)  }
 0x7b0   : > { %v4698_v8 = vpop.eup %4697  ;;  %4129 = vmatprep.subr.bf16.mxu0 (!%p3954_p4), %v4720_v21 }
 0x7b1   : > { %v2642_v50 = vpop.xlane.xlu1 %2641  ;;  %4116 = vmatmul.mubr.bf16.gmra.mrb[4].mxu1 %v2678_v38  ;;  %v2668_v51 = vmul.f32 %v4698_v8, %v6669_v45  ;;  %v4700_v27 = vpop.eup %4699  ;;  %4130 = vmatpush3.bf16.msra.mxu0 (!%p3954_p4), %v4720_v21 }
 0x7b2   : > { %4709 = vrcp.f32 %v2642_v50  ;;  %v2669_v41 = vmul.f32 %v4700_v27, %v6671_v1  ;;  %4164 = vmatpush3.bf16.msra.mxu1 (!%p3954_p4), %v4713_v54  ;;  %v4716_v50 = vld [vmem:[#allocation18 + $0x28] sm:$0xff] (!%p3954_p4)   ;;  %4131 = vmatprep.subr.bf16.mxu0 (!%p3954_p4), %v4721_v52 }
 0x7b3   : > { %v2679_v63 = vpack.c.bf16 %v2668_v51, %v2667_v42  ;;  %4165 = vmatprep.subr.bf16.mxu1 (!%p3954_p4), %v4714_v16  ;;  %v4722_v42 = vld [vmem:[#allocation16 + $0x18] sm:$0xff] (!%p3954_p4)  }
 0x7b4   : > { %v4702_v18 = vpop.eup %4701 }
 0x7b5   : > { %4119 = vmatprep.mubr.bf16.mxu1 %v2679_v63  ;;  %v2670_v30 = vmul.f32 %v4702_v18, %v6676_v24  ;;  %v4704_v48 = vpop.eup %4703  ;;  %v4717_v63 = vld [vmem:[#allocation18 + $0x30] sm:$0xff] (!%p3954_p4)   ;;  %4132 = vmatpush3.bf16.msra.mxu0 (!%p3954_p4), %v4721_v52  ;;  %v4723_v18 = vld [vmem:[#allocation16 + $0x20] sm:$0xff] (!%p3954_p4)  }
 0x7b6   : > { %v2671_v37 = vmul.f32 %v4704_v48, %v6678_v53  ;;  %4166 = vmatpush3.bf16.msra.mxu1 (!%p3954_p4), %v4714_v16  ;;  %4133 = vmatprep.subr.bf16.mxu0 (!%p3954_p4), %v4722_v42  ;;  %v4719_v48 = vld [vmem:[#allocation18 + $0x38] sm:$0xff] (!%p3954_p4)  }
 0x7b7   : > { %v2680_v56 = vpack.c.bf16 %v2670_v30, %v2669_v41  ;;  %4167 = vmatprep.subr.bf16.mxu1 (!%p3954_p4), %v4715_v25 }
 0x7b8   : > { %v4706_v49 = vpop.eup %4705 }
 0x7b9   : > { %4120 = vmatmul.mubr.bf16.gmra.mrb[8].mxu1 %v2680_v56  ;;  %v2672_v31 = vmul.f32 %v4706_v49, %v6683_v0  ;;  %v4708_v59 = vpop.eup %4707  ;;  %4134 = vmatpush3.bf16.msra.mxu0 (!%p3954_p4), %v4722_v42  ;;  %v4724_v56 = vld [vmem:[#allocation16 + $0x28] sm:$0xff] (!%p3954_p4)  }
 0x7ba   : > { %v2673_v45 = vmul.f32 %v4708_v59, %v6685_v47  ;;  %4168 = vmatpush3.bf16.msra.mxu1 (!%p3954_p4), %v4715_v25  ;;  %4135 = vmatprep.subr.bf16.mxu0 (!%p3954_p4), %v4723_v18  ;;  %v3315_v59 = vld [vmem:[%s5613_s0 + $0x18] sm:$0xff] (!%p3954_p4) }
 0x7bb   : > { %v2681_v44 = vpack.c.bf16 %v2672_v31, %v2671_v37  ;;  %4169 = vmatprep.subr.bf16.mxu1 (!%p3954_p4), %v4716_v50  ;;  %v3314_v31 = vld [vmem:[%s5613_s0 + $0x10] sm:$0xff] (!%p3954_p4) }
 0x7bc   : > { %v4710_v19 = vpop.eup %4709 }
 0x7bd   : > { %4123 = vmatprep.mubr.bf16.mxu1 %v2681_v44  ;;  %v2674_v55 = vmul.f32 %v4710_v19, %v6690_v15  ;;  %4136 = vmatpush3.bf16.msra.mxu0 (!%p3954_p4), %v4723_v18  ;;  %v4725_v44 = vld [vmem:[#allocation16 + $0x30] sm:$0xff] (!%p3954_p4)   ;;  %v3316_v19 = vld [vmem:[%s5613_s0 + $0x20] sm:$0xff] (!%p3954_p4) }
 0x7be   : > { %4170 = vmatpush3.bf16.msra.mxu1 (!%p3954_p4), %v4716_v50  ;;  %4137 = vmatprep.subr.bf16.mxu0 (!%p3954_p4), %v4724_v56 }
 0x7bf   : > { %v2682_v1 = vpack.c.bf16 %v2674_v55, %v2673_v45  ;;  %4171 = vmatprep.subr.bf16.mxu1 (!%p3954_p4), %v4717_v63  ;;  %v3317_v45 = vld [vmem:[%s5613_s0 + $0x28] sm:$0xff] (!%p3954_p4) }
 0x7c1   : > { %4124 = vmatmul.mubr.bf16.gmra.mrb[12].mxu1 %v2682_v1  ;;  %4138 = vmatpush3.bf16.msra.mxu0 (!%p3954_p4), %v4724_v56 }
 0x7c2   : > { %4175 = vmatprep.mubr.bf16.mxu1 (!%p3954_p4), %v3328_v9  ;;  %4172 = vmatpush3.bf16.msra.mxu1 (!%p3954_p4), %v4717_v63 }
 0x7c3   : > { %4173 = vmatprep.subr.bf16.mxu1 (!%p3954_p4), %v4719_v48  ;;  %4139 = vmatprep.subr.bf16.mxu0 (!%p3954_p4), %v4725_v44 }
 0x7c5   : > { %4140 = vmatpush3.bf16.msra.mxu0 (!%p3954_p4), %v4725_v44 }
 0x7c6   : > { %4174 = vmatpush3.bf16.msra.mxu1 (!%p3954_p4), %v4719_v48  ;;  %v3112_v48 = vld [vmem:[#allocation5 + $0x8] sm:$0xff] (!%p3954_p4) }
 0x87c   : > { %v4113_v24 = vpop.f32.mrb[0].mxu1 }
 0x87d   : > { %2784 = vst.msk [vmem:[%s6711_s9 + $0x10] sm:$0xff] %vm2353_vm1, %v4113_v24  ;;  %v2717_v53 = vpop.f32.mrb[1].mxu1  ;;  %v3329_v24 = vpack.c.bf16 (!%p3954_p4), %v3315_v59, %v3314_v31 }
 0x87e   : > { %2782 = vst.msk [vmem:[%s6711_s9] sm:$0xff] %vm2353_vm1, %v2717_v53  ;;  %v4114_v57 = vpop.f32.mrb[2].mxu1  ;;  %v3330_v53 = vpack.c.bf16 (!%p3954_p4), %v3317_v45, %v3316_v19 }
 0x87f   : > { %2785 = vst.msk [vmem:[%s6711_s9 + $0x18] sm:$0xff] %vm2353_vm1, %v4114_v57  ;;  %v2720_v0 = vpop.f32.mrb[3].mxu1  ;;  %v4726_v57 = vld [vmem:[#allocation16 + $0x38] sm:$0xff] (!%p3954_p4)   ;;  %4176 = vmatmul.mubr.bf16.vlgmr.msra.gmra.mrb[0].mxu1 (!%p3954_p4), %v3329_v24 }
 0x880   : > { %2783 = vst.msk [vmem:[%s6711_s9 + $0x8] sm:$0xff] %vm2353_vm1, %v2720_v0  ;;  %4179 = vmatprep.mubr.bf16.mxu1 (!%p3954_p4), %v3330_v53  ;;  %4141 = vmatprep.subr.bf16.mxu0 (!%p3954_p4), %v4726_v57 }
 0x881   : > { %4142 = vmatpush3.bf16.msra.mxu0 (!%p3954_p4), %v4726_v57  ;;  %v3114_v57 = vld [vmem:[#allocation5 + $0x18] sm:$0xff] (!%p3954_p4) }
 0x884   : > { %v4117_v47 = vpop.f32.mrb[4].mxu1 }
 0x885   : > { %2788 = vst.msk [vmem:[%s6711_s9 + $0x30] sm:$0xff] %vm2353_vm1, %v4117_v47  ;;  %v2733_v39 = vpop.f32.mrb[5].mxu1 }
 0x886   : > { %2786 = vst.msk [vmem:[%s6711_s9 + $0x20] sm:$0xff] %vm2353_vm1, %v2733_v39  ;;  %v4118_v15 = vpop.f32.mrb[6].mxu1  ;;  %v3318_v39 = vld [vmem:[%s5613_s0 + $0x30] sm:$0xff] (!%p3954_p4) }
 0x887   : > { %2789 = vst.msk [vmem:[%s6711_s9 + $0x38] sm:$0xff] %vm2353_vm1, %v4118_v15  ;;  %v2736_v29 = vpop.f32.mrb[7].mxu1  ;;  %v3319_v15 = vld [vmem:[%s5613_s0 + $0x38] sm:$0xff] (!%p3954_p4) }
 0x888   : > { %2787 = vst.msk [vmem:[%s6711_s9 + $0x28] sm:$0xff] %vm2353_vm1, %v2736_v29  ;;  %v3320_v29 = vld [vmem:[%s5613_s0 + $0x40] sm:$0xff] (!%p3954_p4) }
 0x88c   : > { %v4121_v2 = vpop.f32.mrb[8].mxu1 }
 0x88d   : > { %2792 = vst.msk [vmem:[%s6711_s9 + $0x50] sm:$0xff] %vm2353_vm1, %v4121_v2  ;;  %v2749_v58 = vpop.f32.mrb[9].mxu1  ;;  %v3321_v2 = vld [vmem:[%s5613_s0 + $0x48] sm:$0xff] (!%p3954_p4) }
 0x88e   : > { %2790 = vst.msk [vmem:[%s6711_s9 + $0x40] sm:$0xff] %vm2353_vm1, %v2749_v58  ;;  %v4122_v40 = vpop.f32.mrb[10].mxu1 }
 0x88f   : > { %2793 = vst.msk [vmem:[%s6711_s9 + $0x58] sm:$0xff] %vm2353_vm1, %v4122_v40  ;;  %v2752_v35 = vpop.f32.mrb[11].mxu1 }
 0x890   : > { %2791 = vst.msk [vmem:[%s6711_s9 + $0x48] sm:$0xff] %vm2353_vm1, %v2752_v35  ;;  %v3331_v35 = vpack.c.bf16 (!%p3954_p4), %v3319_v15, %v3318_v39 }
 0x892   : > { %2801 = sbr.rel (%p3954_p4) target bundleno = 2638 (0xa4e), region = 104  ;;  %4180 = vmatmul.mubr.bf16.gmra.mrb[4].mxu1 (!%p3954_p4), %v3331_v35 }
 0x894   : > { %v4125_v33 = vpop.f32.mrb[12].mxu1 }
 0x895   : > { %2796 = vst.msk [vmem:[%s6711_s9 + $0x70] sm:$0xff] %vm2353_vm1, %v4125_v33  ;;  %v2765_v12 = vpop.f32.mrb[13].mxu1  ;;  %v3332_v33 = vpack.c.bf16 (!%p3954_p4), %v3321_v2, %v3320_v29 }
 0x896   : > { %2794 = vst.msk [vmem:[%s6711_s9 + $0x60] sm:$0xff] %vm2353_vm1, %v2765_v12  ;;  %v4126_v6 = vpop.f32.mrb[14].mxu1 }
 0x897   : > { %2797 = vst.msk [vmem:[%s6711_s9 + $0x78] sm:$0xff] %vm2353_vm1, %v4126_v6  ;;  %v2768_v5 = vpop.f32.mrb[15].mxu1  ;;  %4183 = vmatprep.mubr.bf16.mxu1 (!%p3954_p4), %v3332_v33 }
 0x898   : > { %2795 = vst.msk [vmem:[%s6711_s9 + $0x68] sm:$0xff] %vm2353_vm1, %v2768_v5  ;;  %v3322_v5 = vld [vmem:[%s5613_s0 + $0x50] sm:$0xff] (!%p3954_p4) }
 0x89f   : > { %v2821_v43 = vld [vmem:[#allocation6 + $0x90] sm:$0xff]  ;;  %v2819_v7 = vld [vmem:[#allocation6 + $0x80] sm:$0xff]  ;;  %v2822_v28 = vld [vmem:[#allocation6 + $0x98] sm:$0xff] }
 0x8a0   : > { %2889 = vrot.lane.b32.xlu1 %v2821_v43, %s5150_s21  ;;  %2885 = vrot.lane.b32.xlu0 %v2819_v7, %s5150_s21  ;;  %v2820_v4 = vld [vmem:[#allocation6 + $0x88] sm:$0xff]  ;;  %v2836_v3 = vld [vmem:[#allocation6 + $0x100] sm:$0xff]  ;;  %v2839_v20 = vld [vmem:[#allocation6 + $0x118] sm:$0xff] }
 0x8a1   : > { %v2837_v26 = vld [vmem:[#allocation6 + $0x108] sm:$0xff]  ;;  %v2838_v36 = vld [vmem:[#allocation6 + $0x110] sm:$0xff]  ;;  %v2853_v14 = vld [vmem:[#allocation6 + $0x180] sm:$0xff] }
 0x8a2   : > { %v2854_v34 = vld [vmem:[#allocation6 + $0x188] sm:$0xff]  ;;  %v2856_v32 = vld [vmem:[#allocation6 + $0x198] sm:$0xff]  ;;  %v2855_v17 = vld [vmem:[#allocation6 + $0x190] sm:$0xff] }
 0x8a3   : > { %v2824_v62 = vld [vmem:[#allocation6 + $0xa8] sm:$0xff]  ;;  %v2823_v11 = vld [vmem:[#allocation6 + $0xa0] sm:$0xff]  ;;  %v2826_v13 = vld [vmem:[#allocation6 + $0xb8] sm:$0xff] }
 0x8a4   : > { %2891 = vrot.lane.b32.xlu1 %v2822_v28, %s5150_s21  ;;  %2887 = vrot.lane.b32.xlu0 %v2820_v4, %s5150_s21  ;;  %v2825_v23 = vld [vmem:[#allocation6 + $0xb0] sm:$0xff]  ;;  %v2841_v38 = vld [vmem:[#allocation6 + $0x128] sm:$0xff]  ;;  %v2840_v8 = vld [vmem:[#allocation6 + $0x120] sm:$0xff] }
 0x8a5   : > { %v2843_v51 = vld [vmem:[#allocation6 + $0x138] sm:$0xff]  ;;  %v2842_v27 = vld [vmem:[#allocation6 + $0x130] sm:$0xff]  ;;  %v2858_v41 = vld [vmem:[#allocation6 + $0x1a8] sm:$0xff] }
 0x8a6   : > { %v2857_v30 = vld [vmem:[#allocation6 + $0x1a0] sm:$0xff]  ;;  %v2860_v49 = vld [vmem:[#allocation6 + $0x1b8] sm:$0xff]  ;;  %v2859_v37 = vld [vmem:[#allocation6 + $0x1b0] sm:$0xff] }
 0x8a7   : > { %v2828_v55 = vld [vmem:[#allocation6 + $0xc8] sm:$0xff]  ;;  %v2827_v1 = vld [vmem:[#allocation6 + $0xc0] sm:$0xff]  ;;  %v2830_v0 = vld [vmem:[#allocation6 + $0xd8] sm:$0xff] }
 0x8a8   : > { %2951 = vrot.lane.b32.xlu1 %v2837_v26, %s5151_s6  ;;  %2949 = vrot.lane.b32.xlu0 %v2836_v3, %s5151_s6  ;;  %v2829_v47 = vld [vmem:[#allocation6 + $0xd0] sm:$0xff]  ;;  %v2845_v58 = vld [vmem:[#allocation6 + $0x148] sm:$0xff]  ;;  %v2844_v40 = vld [vmem:[#allocation6 + $0x140] sm:$0xff] }
 0x8a9   : > { %v2847_v12 = vld [vmem:[#allocation6 + $0x158] sm:$0xff]  ;;  %v2846_v6 = vld [vmem:[#allocation6 + $0x150] sm:$0xff]  ;;  %v3324_v7 = vld [vmem:[%s5613_s0 + $0x60] sm:$0xff] }
 0x8aa   : > { %v3323_v43 = vld [vmem:[%s5613_s0 + $0x58] sm:$0xff]  ;;  %v3325_v28 = vld [vmem:[%s5613_s0 + $0x68] sm:$0xff]  ;;  %v2861_v26 = vld [vmem:[#allocation6 + $0x1c0] sm:$0xff] }
 0x8ab   : > { %v2862_v4 = vld [vmem:[#allocation6 + $0x1c8] sm:$0xff]  ;;  %v3333_v3 = vpack.c.bf16 %v3323_v43, %v3322_v5  ;;  %v2834_v54 = vld [vmem:[#allocation6 + $0xf8] sm:$0xff]  ;;  %v2848_v16 = vld [vmem:[#allocation6 + $0x160] sm:$0xff] }
 0x8ac   : > { %2955 = vrot.lane.b32.xlu1 %v2839_v20, %s5151_s6  ;;  %2953 = vrot.lane.b32.xlu0 %v2838_v36, %s5151_s6  ;;  %v3334_v20 = vpack.c.bf16 %v3325_v28, %v3324_v7  ;;  %v2864_v36 = vld [vmem:[#allocation6 + $0x1d8] sm:$0xff]  ;;  %v2832_v22 = vld [vmem:[#allocation6 + $0xe8] sm:$0xff]  ;;  %v2865_v46 = vld [vmem:[#allocation6 + $0x1e0] sm:$0xff] }
 0x8ad   : > { %4184 = vmatmul.mubr.bf16.gmra.mrb[8].mxu1 %v3333_v3  ;;  %v2851_v10 = vld [vmem:[#allocation6 + $0x178] sm:$0xff]  ;;  %v2866_v60 = vld [vmem:[#allocation6 + $0x1e8] sm:$0xff]  ;;  %v2867_v9 = vld [vmem:[#allocation6 + $0x1f0] sm:$0xff] }
 0x8ae   : > { %4187 = vmatprep.mubr.bf16.mxu1 %v3334_v20  ;;  %v2802_v42 = vld [vmem:[#allocation6] sm:$0xff]  ;;  %v2804_v56 = vld [vmem:[#allocation6 + $0x10] sm:$0xff] }
 0x8af   : > { %v2806_v3 = vld [vmem:[#allocation6 + $0x20] sm:$0xff] }
 0x8b0   : > { %3015 = vrot.lane.b32.xlu1 %v2854_v34, %s5152_s5  ;;  %3013 = vrot.lane.b32.xlu0 %v2853_v14, %s5152_s5  ;;  %v2863_v34 = vld [vmem:[#allocation6 + $0x1d0] sm:$0xff] }
 0x8b1   : > { %v3326_v14 = vld [vmem:[%s5613_s0 + $0x70] sm:$0xff] }
 0x8b4   : > { %3019 = vrot.lane.b32.xlu1 %v2856_v32, %s5152_s5  ;;  %3017 = vrot.lane.b32.xlu0 %v2855_v17, %s5152_s5  ;;  %v2831_v32 = vld [vmem:[#allocation6 + $0xe0] sm:$0xff]  ;;  %v3335_v17 = vpack.c.bf16 %v3327_v61, %v3326_v14  ;;  %v3116_v61 = vld [vmem:[#allocation5 + $0x28] sm:$0xff] }
 0x8b6   : > { %4188 = vmatmul.mubr.bf16.gmra.mrb[12].mxu1 %v3335_v17  ;;  %v2808_v17 = vld [vmem:[#allocation6 + $0x30] sm:$0xff] }
 0x8b8   : > { %2895 = vrot.lane.b32.xlu1 %v2824_v62, %s5150_s21  ;;  %2893 = vrot.lane.b32.xlu0 %v2823_v11, %s5150_s21  ;;  %v2833_v62 = vld [vmem:[#allocation6 + $0xf0] sm:$0xff]  ;;  %v2849_v11 = vld [vmem:[#allocation6 + $0x168] sm:$0xff] }
 0x8bc   : > { %2899 = vrot.lane.b32.xlu1 %v2826_v13, %s5150_s21  ;;  %2897 = vrot.lane.b32.xlu0 %v2825_v23, %s5150_s21  ;;  %v2850_v13 = vld [vmem:[#allocation6 + $0x170] sm:$0xff]  ;;  %v2868_v23 = vld [vmem:[#allocation6 + $0x1f8] sm:$0xff] }
 0x8c0   : > { %2959 = vrot.lane.b32.xlu1 %v2841_v38, %s5151_s6  ;;  %2957 = vrot.lane.b32.xlu0 %v2840_v8, %s5151_s6 }
 0x8c4   : > { %2963 = vrot.lane.b32.xlu1 %v2843_v51, %s5151_s6  ;;  %2961 = vrot.lane.b32.xlu0 %v2842_v27, %s5151_s6  ;;  %v2803_v51 = vld [vmem:[#allocation6 + $0x8] sm:$0xff] }
 0x8c8   : > { %3023 = vrot.lane.b32.xlu1 %v2858_v41, %s5152_s5  ;;  %3021 = vrot.lane.b32.xlu0 %v2857_v30, %s5152_s5  ;;  %v3111_v30 = vld [vmem:[#allocation5] sm:$0xff] }
 0x8cc   : > { %3027 = vrot.lane.b32.xlu1 %v2860_v49, %s5152_s5  ;;  %3025 = vrot.lane.b32.xlu0 %v2859_v37, %s5152_s5  ;;  %v2805_v49 = vld [vmem:[#allocation6 + $0x18] sm:$0xff] }
 0x8d0   : > { %2903 = vrot.lane.b32.xlu1 %v2828_v55, %s5150_s21  ;;  %2901 = vrot.lane.b32.xlu0 %v2827_v1, %s5150_s21 }
 0x8d4   : > { %2907 = vrot.lane.b32.xlu1 %v2830_v0, %s5150_s21  ;;  %2905 = vrot.lane.b32.xlu0 %v2829_v47, %s5150_s21  ;;  %v3113_v0 = vld [vmem:[#allocation5 + $0x10] sm:$0xff] }
 0x8d8   : > { %2967 = vrot.lane.b32.xlu1 %v2845_v58, %s5151_s6  ;;  %2965 = vrot.lane.b32.xlu0 %v2844_v40, %s5151_s6 }
 0x8dc   : > { %2971 = vrot.lane.b32.xlu1 %v2847_v12, %s5151_s6  ;;  %2969 = vrot.lane.b32.xlu0 %v2846_v6, %s5151_s6 }
 0x8e0   : > { %3031 = vrot.lane.b32.xlu1 %v2862_v4, %s5152_s5  ;;  %3029 = vrot.lane.b32.xlu0 %v2861_v26, %s5152_s5  ;;  %v2807_v26 = vld [vmem:[#allocation6 + $0x28] sm:$0xff] }
 0x8e4   : > { %3035 = vrot.lane.b32.xlu1 %v2864_v36, %s5152_s5  ;;  %3033 = vrot.lane.b32.xlu0 %v2863_v34, %s5152_s5 }
 0x8e8   : > { %2911 = vrot.lane.b32.xlu1 %v2832_v22, %s5150_s21  ;;  %2909 = vrot.lane.b32.xlu0 %v2831_v32, %s5150_s21  ;;  %v3115_v22 = vld [vmem:[#allocation5 + $0x20] sm:$0xff]  ;;  %v2809_v32 = vld [vmem:[#allocation6 + $0x38] sm:$0xff] }
 0x8ec   : > { %2915 = vrot.lane.b32.xlu1 %v2834_v54, %s5150_s21  ;;  %2913 = vrot.lane.b32.xlu0 %v2833_v62, %s5150_s21 }
 0x8f0   : > { %2975 = vrot.lane.b32.xlu1 %v2849_v11, %s5151_s6  ;;  %2973 = vrot.lane.b32.xlu0 %v2848_v16, %s5151_s6 }
 0x8f4   : > { %2979 = vrot.lane.b32.xlu1 %v2851_v10, %s5151_s6  ;;  %2977 = vrot.lane.b32.xlu0 %v2850_v13, %s5151_s6 }
 0x8f8   : > { %3039 = vrot.lane.b32.xlu1 %v2866_v60, %s5152_s5  ;;  %3037 = vrot.lane.b32.xlu0 %v2865_v46, %s5152_s5 }
 0x8fc   : > { %3043 = vrot.lane.b32.xlu1 %v2868_v23, %s5152_s5  ;;  %3041 = vrot.lane.b32.xlu0 %v2867_v9, %s5152_s5 }
 0x912   : > { %v2890_v21 = vpop.permute.xlu1 %2889  ;;  %v2886_v25 = vpop.permute.xlu0 %2885 }
 0x913   : > { %v3061_v18 = vsel %vm2353_vm1, %v2802_v42, %v2886_v25  ;;  %v3063_v24 = vsel %vm2353_vm1, %v2804_v56, %v2890_v21  ;;  %v3118_v21 = vld [vmem:[#allocation5 + $0x38] sm:$0xff]  ;;  %v3117_v25 = vld [vmem:[#allocation5 + $0x30] sm:$0xff] }
 0x916   : > { %v2892_v52 = vpop.permute.xlu1 %2891  ;;  %v2888_v38 = vpop.permute.xlu0 %2887 }
 0x917   : > { %v3062_v41 = vsel %vm2353_vm1, %v2803_v51, %v2888_v38  ;;  %v3064_v53 = vsel %vm2353_vm1, %v2805_v49, %v2892_v52 }
 0x91a   : > { %v2952_v8 = vpop.permute.xlu1 %2951  ;;  %v2950_v50 = vpop.permute.xlu0 %2949 }
 0x91b   : > { %v3079_v37 = vsel %vm3077_vm2, %v3062_v41, %v2952_v8  ;;  %v3078_v31 = vsel %vm3077_vm2, %v3061_v18, %v2950_v50 }
 0x91e   : > { %v2956_v27 = vpop.permute.xlu1 %2955  ;;  %v2954_v63 = vpop.permute.xlu0 %2953 }
 0x91f   : > { %v3081_v47 = vsel %vm3077_vm2, %v3064_v53, %v2956_v27  ;;  %v3080_v39 = vsel %vm3077_vm2, %v3063_v24, %v2954_v63  ;;  %v3120_v24 = vld [vmem:[#allocation5 + $0x48] sm:$0xff]  ;;  %v3119_v53 = vld [vmem:[#allocation5 + $0x40] sm:$0xff] }
 0x922   : > { %v3016_v59 = vpop.permute.xlu1 %3015  ;;  %v3014_v44 = vpop.permute.xlu0 %3013 }
 0x923   : > { %v3096_v19 = vsel %vm3094_vm3, %v3079_v37, %v3016_v59  ;;  %v3095_v45 = vsel %vm3094_vm3, %v3078_v31, %v3014_v44  ;;  %v2811_v59 = vld [vmem:[#allocation6 + $0x48] sm:$0xff]  ;;  %v2810_v44 = vld [vmem:[#allocation6 + $0x40] sm:$0xff] }
 0x924   : > { %v3127_v55 = vmul.f32 %v3111_v30, %v3095_v45  ;;  %v3128_v1 = vmul.f32 %v3112_v48, %v3096_v19 }
 0x926   : > { %v3020_v15 = vpop.permute.xlu1 %3019  ;;  %v3018_v29 = vpop.permute.xlu0 %3017  ;;  %v3143_v2 = vpack.c.bf16 %v3128_v1, %v3127_v55 }
 0x927   : > { %v3098_v58 = vsel %vm3094_vm3, %v3081_v47, %v3020_v15  ;;  %v3097_v40 = vsel %vm3094_vm3, %v3080_v39, %v3018_v29 }
 0x928   : > { %v3130_v35 = vmul.f32 %v3114_v57, %v3098_v58  ;;  %v3129_v33 = vmul.f32 %v3113_v0, %v3097_v40  ;;  %4143 = vmatprep.mubr.bf16.mxu0 %v3143_v2  ;;  %v2813_v57 = vld [vmem:[#allocation6 + $0x58] sm:$0xff]  ;;  %v2812_v0 = vld [vmem:[#allocation6 + $0x50] sm:$0xff] }
 0x92a   : > { %v2896_v12 = vpop.permute.xlu1 %2895  ;;  %v2894_v6 = vpop.permute.xlu0 %2893  ;;  %v3144_v5 = vpack.c.bf16 %v3130_v35, %v3129_v33 }
 0x92b   : > { %v3066_v34 = vsel %vm2353_vm1, %v2807_v26, %v2896_v12  ;;  %v3065_v14 = vsel %vm2353_vm1, %v2806_v3, %v2894_v6  ;;  %v3122_v6 = vld [vmem:[#allocation5 + $0x58] sm:$0xff] }
 0x92c   : > { %4144 = vmatmul.mubr.bf16.vlgmr.msra.gmra.mrb[0].mxu0 %v3144_v5  ;;  %v3121_v5 = vld [vmem:[#allocation5 + $0x50] sm:$0xff] }
 0x92e   : > { %v2900_v43 = vpop.permute.xlu1 %2899  ;;  %v2898_v7 = vpop.permute.xlu0 %2897 }
 0x92f   : > { %v3068_v23 = vsel %vm2353_vm1, %v2809_v32, %v2900_v43  ;;  %v3067_v9 = vsel %vm2353_vm1, %v2808_v17, %v2898_v7 }
 0x932   : > { %v2960_v28 = vpop.permute.xlu1 %2959  ;;  %v2958_v4 = vpop.permute.xlu0 %2957 }
 0x933   : > { %v3083_v54 = vsel %vm3077_vm2, %v3066_v34, %v2960_v28  ;;  %v3082_v62 = vsel %vm3077_vm2, %v3065_v14, %v2958_v4 }
 0x936   : > { %v2964_v20 = vpop.permute.xlu1 %2963  ;;  %v2962_v36 = vpop.permute.xlu0 %2961 }
 0x937   : > { %v3085_v52 = vsel %vm3077_vm2, %v3068_v23, %v2964_v20  ;;  %v3084_v38 = vsel %vm3077_vm2, %v3067_v9, %v2962_v36  ;;  %v3124_v23 = vld [vmem:[#allocation5 + $0x68] sm:$0xff]  ;;  %v3123_v9 = vld [vmem:[#allocation5 + $0x60] sm:$0xff] }
 0x93a   : > { %v3024_v11 = vpop.permute.xlu1 %3023  ;;  %v3022_v16 = vpop.permute.xlu0 %3021 }
 0x93b   : > { %v3100_v10 = vsel %vm3094_vm3, %v3083_v54, %v3024_v11  ;;  %v3099_v13 = vsel %vm3094_vm3, %v3082_v62, %v3022_v16  ;;  %v2815_v11 = vld [vmem:[#allocation6 + $0x68] sm:$0xff]  ;;  %v2814_v16 = vld [vmem:[#allocation6 + $0x60] sm:$0xff] }
 0x93c   : > { %v3132_v60 = vmul.f32 %v3116_v61, %v3100_v10  ;;  %v3131_v46 = vmul.f32 %v3115_v22, %v3099_v13 }
 0x93e   : > { %v3028_v8 = vpop.permute.xlu1 %3027  ;;  %v3026_v50 = vpop.permute.xlu0 %3025  ;;  %v3145_v42 = vpack.c.bf16 %v3132_v60, %v3131_v46 }
 0x93f   : > { %v3102_v51 = vsel %vm3094_vm3, %v3085_v52, %v3028_v8  ;;  %v3101_v27 = vsel %vm3094_vm3, %v3084_v38, %v3026_v50 }
 0x940   : > { %v3134_v63 = vmul.f32 %v3118_v21, %v3102_v51  ;;  %v3133_v18 = vmul.f32 %v3117_v25, %v3101_v27  ;;  %4147 = vmatprep.mubr.bf16.mxu0 %v3145_v42  ;;  %v2817_v21 = vld [vmem:[#allocation6 + $0x78] sm:$0xff]  ;;  %v2816_v25 = vld [vmem:[#allocation6 + $0x70] sm:$0xff] }
 0x942   : > { %v2904_v41 = vpop.permute.xlu1 %2903  ;;  %v2902_v30 = vpop.permute.xlu0 %2901  ;;  %v3146_v48 = vpack.c.bf16 %v3134_v63, %v3133_v18 }
 0x943   : > { %v3070_v55 = vsel %vm2353_vm1, %v2811_v59, %v2904_v41  ;;  %v3069_v1 = vsel %vm2353_vm1, %v2810_v44, %v2902_v30  ;;  %v3126_v30 = vld [vmem:[#allocation5 + $0x78] sm:$0xff] }
 0x944   : > { %4148 = vmatmul.mubr.bf16.gmra.mrb[4].mxu0 %v3146_v48  ;;  %v3125_v48 = vld [vmem:[#allocation5 + $0x70] sm:$0xff] }
 0x946   : > { %v2908_v56 = vpop.permute.xlu1 %2907  ;;  %v2906_v49 = vpop.permute.xlu0 %2905 }
 0x947   : > { %v3072_v33 = vsel %vm2353_vm1, %v2813_v57, %v2908_v56  ;;  %v3071_v12 = vsel %vm2353_vm1, %v2812_v0, %v2906_v49 }
 0x94a   : > { %v2968_v37 = vpop.permute.xlu1 %2967  ;;  %v2966_v31 = vpop.permute.xlu0 %2965 }
 0x94b   : > { %v3087_v47 = vsel %vm3077_vm2, %v3070_v55, %v2968_v37  ;;  %v3086_v39 = vsel %vm3077_vm2, %v3069_v1, %v2966_v31 }
 0x94e   : > { %v2972_v19 = vpop.permute.xlu1 %2971  ;;  %v2970_v45 = vpop.permute.xlu0 %2969 }
 0x94f   : > { %v3089_v43 = vsel %vm3077_vm2, %v3072_v33, %v2972_v19  ;;  %v3088_v7 = vsel %vm3077_vm2, %v3071_v12, %v2970_v45  ;;  %v6869_v33 = vld [vmem:[%s7097_s2] ss:$0 sm:$0xff] }
 0x952   : > { %v3032_v15 = vpop.permute.xlu1 %3031  ;;  %v3030_v29 = vpop.permute.xlu0 %3029 }
 0x953   : > { %v3104_v2 = vsel %vm3094_vm3, %v3087_v47, %v3032_v15  ;;  %v3103_v58 = vsel %vm3094_vm3, %v3086_v39, %v3030_v29 }
 0x954   : > { %v3136_v40 = vmul.f32 %v3120_v24, %v3104_v2  ;;  %v3135_v35 = vmul.f32 %v3119_v53, %v3103_v58  ;;  %v4177_v24 = vpop.f32.mrb[0].mxu1 }
 0x955   : > { %v3441_v53 = vpop.f32.mrb[1].mxu1 }
 0x956   : > { %v3036_v28 = vpop.permute.xlu1 %3035  ;;  %v3034_v4 = vpop.permute.xlu0 %3033  ;;  %v3147_v26 = vpack.c.bf16 %v3136_v40, %v3135_v35 }
 0x957   : > { %v3106_v3 = vsel %vm3094_vm3, %v3089_v43, %v3036_v28  ;;  %v3105_v20 = vsel %vm3094_vm3, %v3088_v7, %v3034_v4  ;;  %v4178_v57 = vpop.f32.mrb[2].mxu1 }
 0x958   : > { %v3138_v36 = vmul.f32 %v3122_v6, %v3106_v3  ;;  %v3137_v34 = vmul.f32 %v3121_v5, %v3105_v20  ;;  %4151 = vmatprep.mubr.bf16.mxu0 %v3147_v26  ;;  %v3444_v0 = vpop.f32.mrb[3].mxu1  ;;  %v3450_v3 = vadd.f32 %v4177_v24, %v6869_v33  ;;  %v3442_v20 = vadd.f32 %v6869_v33, %v3441_v53 }
 0x95a   : > { %v2912_v14 = vpop.permute.xlu1 %2911  ;;  %v2910_v61 = vpop.permute.xlu0 %2909  ;;  %v3148_v22 = vpack.c.bf16 %v3138_v36, %v3137_v34  ;;  %v3453_v36 = vadd.f32 %v4178_v57, %v6869_v33  ;;  %v3445_v34 = vadd.f32 %v6869_v33, %v3444_v0 }
 0x95b   : > { %v3074_v60 = vsel %vm2353_vm1, %v2815_v11, %v2912_v14  ;;  %v3073_v46 = vsel %vm2353_vm1, %v2814_v16, %v2910_v61  ;;  %v3974_v14 = vmul.f32 -1.442695, %v3450_v3  ;;  %v3972_v61 = vmul.f32 -1.442695, %v3442_v20 }
 0x95c   : > { %4152 = vmatmul.mubr.bf16.gmra.mrb[8].mxu0 %v3148_v22  ;;  %v3975_v22 = vmul.f32 -1.442695, %v3453_v36 }
 0x95d   : > { %4727 = vpow2.f32 %v3974_v14 }
 0x95e   : > { %v2916_v32 = vpop.permute.xlu1 %2915  ;;  %v2914_v17 = vpop.permute.xlu0 %2913  ;;  %4729 = vpow2.f32 %v3972_v61 }
 0x95f   : > { %v3076_v18 = vsel %vm2353_vm1, %v2817_v21, %v2916_v32  ;;  %v3075_v41 = vsel %vm2353_vm1, %v2816_v25, %v2914_v17  ;;  %v3973_v32 = vmul.f32 -1.442695, %v3445_v34  ;;  %4731 = vpow2.f32 %v3975_v22 }
 0x961   : > { %4733 = vpow2.f32 %v3973_v32 }
 0x962   : > { %v2976_v54 = vpop.permute.xlu1 %2975  ;;  %v2974_v62 = vpop.permute.xlu0 %2973 }
 0x963   : > { %v3091_v52 = vsel %vm3077_vm2, %v3074_v60, %v2976_v54  ;;  %v3090_v38 = vsel %vm3077_vm2, %v3073_v46, %v2974_v62 }
 0x965   : > { %v4181_v47 = vpop.f32.mrb[4].mxu1 }
 0x966   : > { %v2980_v10 = vpop.permute.xlu1 %2979  ;;  %v2978_v13 = vpop.permute.xlu0 %2977  ;;  %v3466_v46 = vadd.f32 %v4181_v47, %v6869_v33 }
 0x967   : > { %v3093_v56 = vsel %vm3077_vm2, %v3076_v18, %v2980_v10  ;;  %v3092_v49 = vsel %vm3077_vm2, %v3075_v41, %v2978_v13  ;;  %v3457_v39 = vpop.f32.mrb[5].mxu1  ;;  %v4728_v17 = vpop.eup %4727 }
 0x968   : > { %v4182_v15 = vpop.f32.mrb[6].mxu1  ;;  %v4730_v54 = vpop.eup %4729  ;;  %v3554_v16 = vadd.f32 1.0, %v4728_v17  ;;  %v3978_v25 = vmul.f32 -1.442695, %v3466_v46 }
 0x969   : > { %v3460_v29 = vpop.f32.mrb[7].mxu1  ;;  %v4732_v62 = vpop.eup %4731  ;;  %v3552_v10 = vadd.f32 1.0, %v4730_v54 }
 0x96a   : > { %v3040_v8 = vpop.permute.xlu1 %3039  ;;  %v3038_v50 = vpop.permute.xlu0 %3037  ;;  %v3555_v13 = vadd.f32 1.0, %v4732_v62  ;;  %4735 = vrcp.f32 %v3554_v16  ;;  %v3461_v21 = vadd.f32 %v6869_v33, %v3460_v29 }
 0x96b   : > { %v3108_v42 = vsel %vm3094_vm3, %v3091_v52, %v3040_v8  ;;  %v3107_v51 = vsel %vm3094_vm3, %v3090_v38, %v3038_v50  ;;  %v4734_v11 = vpop.eup %4733  ;;  %4737 = vrcp.f32 %v3552_v10 }
 0x96c   : > { %v3140_v27 = vmul.f32 %v3124_v23, %v3108_v42  ;;  %v3139_v63 = vmul.f32 %v3123_v9, %v3107_v51  ;;  %v3553_v60 = vadd.f32 1.0, %v4734_v11  ;;  %v3458_v23 = vadd.f32 %v6869_v33, %v3457_v39 }
 0x96d   : > { %v3469_v9 = vadd.f32 %v4182_v15, %v6869_v33  ;;  %4739 = vrcp.f32 %v3555_v13  ;;  %v3977_v8 = vmul.f32 -1.442695, %v3461_v21 }
 0x96e   : > { %v3044_v37 = vpop.permute.xlu1 %3043  ;;  %v3042_v31 = vpop.permute.xlu0 %3041  ;;  %v3149_v59 = vpack.c.bf16 %v3140_v27, %v3139_v63  ;;  %4741 = vrcp.f32 %v3553_v60  ;;  %v3976_v52 = vmul.f32 -1.442695, %v3458_v23 }
 0x96f   : > { %v3110_v44 = vsel %vm3094_vm3, %v3093_v56, %v3044_v37  ;;  %v3109_v19 = vsel %vm3094_vm3, %v3092_v49, %v3042_v31  ;;  %v3979_v38 = vmul.f32 -1.442695, %v3469_v9  ;;  %4743 = vpow2.f32 %v3978_v25 }
 0x970   : > { %v3142_v45 = vmul.f32 %v3126_v30, %v3110_v44  ;;  %v3141_v55 = vmul.f32 %v3125_v48, %v3109_v19  ;;  %4155 = vmatprep.mubr.bf16.mxu0 %v3149_v59  ;;  %4745 = vpow2.f32 %v3976_v52 }
 0x971   : > { %4747 = vpow2.f32 %v3979_v38 }
 0x972   : > { %v3150_v1 = vpack.c.bf16 %v3142_v45, %v3141_v55  ;;  %4749 = vpow2.f32 %v3977_v8 }
 0x974   : > { %4156 = vmatmul.mubr.bf16.gmra.mrb[12].mxu0 %v3150_v1  ;;  %v4736_v50 = vpop.eup %4735 }
 0x975   : > { %v4738_v42 = vpop.eup %4737 }
 0x977   : > { %v4740_v51 = vpop.eup %4739 }
 0x978   : > { %v4742_v63 = vpop.eup %4741 }
 0x979   : > { %v4744_v31 = vpop.eup %4743 }
 0x97a   : > { %v4746_v59 = vpop.eup %4745  ;;  %v3558_v45 = vadd.f32 1.0, %v4744_v31 }
 0x97b   : > { %v4748_v44 = vpop.eup %4747  ;;  %v3556_v55 = vadd.f32 1.0, %v4746_v59 }
 0x97c   : > { %v4750_v19 = vpop.eup %4749  ;;  %v3559_v1 = vadd.f32 1.0, %v4748_v44  ;;  %4751 = vrcp.f32 %v3558_v45 }
 0x97d   : > { %v3557_v24 = vadd.f32 1.0, %v4750_v19  ;;  %4753 = vrcp.f32 %v3556_v55 }
 0x97e   : > { %4755 = vrcp.f32 %v3559_v1 }
 0x97f   : > { %4757 = vrcp.f32 %v3557_v24 }
 0x980   : > { %v6858_v2 = vpop.f32.mrb[8].mxu1 }
 0x981   : > { %v6860_v58 = vpop.f32.mrb[9].mxu1  ;;  %v3482_v53 = vadd.f32 %v6858_v2, %v6869_v33 }
 0x982   : > { %v6862_v40 = vpop.f32.mrb[10].mxu1  ;;  %v3474_v57 = vadd.f32 %v6869_v33, %v6860_v58 }
 0x983   : > { %v6864_v35 = vpop.f32.mrb[11].mxu1  ;;  %v3485_v0 = vadd.f32 %v6862_v40, %v6869_v33  ;;  %v3982_v39 = vmul.f32 -1.442695, %v3482_v53 }
 0x984   : > { %v3477_v47 = vadd.f32 %v6869_v33, %v6864_v35  ;;  %v3980_v15 = vmul.f32 -1.442695, %v3474_v57 }
 0x985   : > { %v3983_v29 = vmul.f32 -1.442695, %v3485_v0  ;;  %4759 = vpow2.f32 %v3982_v39 }
 0x986   : > { %4761 = vpow2.f32 %v3980_v15  ;;  %v4752_v2 = vpop.eup %4751 }
 0x987   : > { %4763 = vpow2.f32 %v3983_v29  ;;  %v4754_v58 = vpop.eup %4753 }
 0x988   : > { %v4756_v40 = vpop.eup %4755 }
 0x989   : > { %v4189_v12 = vpop.f32.mrb[12].mxu1 }
 0x98a   : > { %v6872_v6 = vadd.f32 %v4189_v12, %v6869_v33  ;;  %v3489_v5 = vpop.f32.mrb[13].mxu1  ;;  %v3981_v12 = vmul.f32 -1.442695, %v3477_v47 }
 0x98b   : > { %v6875_v43 = vadd.f32 %v6869_v33, %v3489_v5  ;;  %v4190_v7 = vpop.f32.mrb[14].mxu1 }
 0x98c   : > { %v6878_v28 = vadd.f32 %v4190_v7, %v6869_v33  ;;  %v3492_v4 = vpop.f32.mrb[15].mxu1  ;;  %4765 = vpow2.f32 %v3981_v12  ;;  %v4758_v7 = vpop.eup %4757  ;;  %v3986_v16 = vmul.f32 -1.442695, %v6872_v6 }
 0x98d   : > { %v6881_v26 = vadd.f32 %v6869_v33, %v3492_v4  ;;  %v3984_v10 = vmul.f32 -1.442695, %v6875_v43 }
 0x98e   : > { %v3987_v13 = vmul.f32 -1.442695, %v6878_v28 }
 0x98f   : > { %v4760_v14 = vpop.eup %4759  ;;  %v3985_v60 = vmul.f32 -1.442695, %v6881_v26 }
 0x990   : > { %v4762_v61 = vpop.eup %4761  ;;  %v3562_v17 = vadd.f32 1.0, %v4760_v14 }
 0x991   : > { %v4764_v22 = vpop.eup %4763  ;;  %v3560_v54 = vadd.f32 1.0, %v4762_v61 }
 0x992   : > { %v3563_v62 = vadd.f32 1.0, %v4764_v22  ;;  %4767 = vrcp.f32 %v3562_v17 }
 0x993   : > { %4769 = vrcp.f32 %v3560_v54 }
 0x994   : > { %4771 = vrcp.f32 %v3563_v62 }
 0x996   : > { %v4766_v32 = vpop.eup %4765 }
 0x997   : > { %v3561_v11 = vadd.f32 1.0, %v4766_v32 }
 0x999   : > { %4773 = vrcp.f32 %v3561_v11 }
 0x99a   : > { %4775 = vpow2.f32 %v3986_v16 }
 0x99b   : > { %4777 = vpow2.f32 %v3984_v10 }
 0x99c   : > { %v4768_v46 = vpop.eup %4767  ;;  %4779 = vpow2.f32 %v3987_v13 }
 0x99d   : > { %v4770_v23 = vpop.eup %4769  ;;  %4781 = vpow2.f32 %v3985_v60 }
 0x99e   : > { %v4772_v9 = vpop.eup %4771 }
 0x9a3   : > { %v4774_v25 = vpop.eup %4773 }
 0x9ff   : > { %v4145_v27 = vpop.f32.mrb[0].mxu0 }
 0xa00   : > { %v3602_v18 = vmul.f32 %v4736_v50, %v4145_v27  ;;  %v3249_v41 = vpop.f32.mrb[1].mxu0 }
 0xa01   : > { %v3600_v30 = vmul.f32 %v4738_v42, %v3249_v41  ;;  %v4146_v48 = vpop.f32.mrb[2].mxu0  ;;  %v4776_v42 = vpop.eup %4775 }
 0xa02   : > { %3618 = vst [vmem:[%s5635_s8 + $0x10] sm:$0xff] %v3602_v18  ;;  %v3603_v56 = vmul.f32 %v4740_v51, %v4146_v48  ;;  %v3252_v49 = vpop.f32.mrb[3].mxu0  ;;  %v4778_v26 = vpop.eup %4777  ;;  %v3566_v51 = vadd.f32 1.0, %v4776_v42 }
 0xa03   : > { %3616 = vst [vmem:[%s5635_s8] sm:$0xff] %v3600_v30  ;;  %v3601_v37 = vmul.f32 %v4742_v63, %v3252_v49  ;;  %v4780_v27 = vpop.eup %4779  ;;  %v3564_v63 = vadd.f32 1.0, %v4778_v26 }
 0xa04   : > { %3619 = vst [vmem:[%s5635_s8 + $0x18] sm:$0xff] %v3603_v56  ;;  %v4782_v18 = vpop.eup %4781  ;;  %4783 = vrcp.f32 %v3566_v51  ;;  %v3567_v41 = vadd.f32 1.0, %v4780_v27 }
 0xa05   : > { %3617 = vst [vmem:[%s5635_s8 + $0x8] sm:$0xff] %v3601_v37  ;;  %4785 = vrcp.f32 %v3564_v63  ;;  %v3565_v30 = vadd.f32 1.0, %v4782_v18 }
 0xa06   : > { %4787 = vrcp.f32 %v3567_v41 }
 0xa07   : > { %4789 = vrcp.f32 %v3565_v30 }
 0xa0e   : > { %v4784_v48 = vpop.eup %4783 }
 0xa0f   : > { %v4786_v56 = vpop.eup %4785 }
 0xa10   : > { %v4788_v59 = vpop.eup %4787 }
 0xa11   : > { %v4790_v45 = vpop.eup %4789 }
 0xa17   : > { %v4149_v5 = vpop.f32.mrb[4].mxu0 }
 0xa18   : > { %v3606_v4 = vmul.f32 %v4752_v2, %v4149_v5  ;;  %v3265_v35 = vpop.f32.mrb[5].mxu0 }
 0xa19   : > { %v3604_v33 = vmul.f32 %v4754_v58, %v3265_v35  ;;  %v4150_v3 = vpop.f32.mrb[6].mxu0 }
 0xa1a   : > { %3622 = vst [vmem:[%s5635_s8 + $0x30] sm:$0xff] %v3606_v4  ;;  %v3607_v20 = vmul.f32 %v4756_v40, %v4150_v3  ;;  %v3268_v36 = vpop.f32.mrb[7].mxu0 }
 0xa1b   : > { %3620 = vst [vmem:[%s5635_s8 + $0x20] sm:$0xff] %v3604_v33  ;;  %v3605_v34 = vmul.f32 %v4758_v7, %v3268_v36 }
 0xa1c   : > { %3623 = vst [vmem:[%s5635_s8 + $0x38] sm:$0xff] %v3607_v20 }
 0xa1d   : > { %3621 = vst [vmem:[%s5635_s8 + $0x28] sm:$0xff] %v3605_v34 }
 0xa2f   : > { %v4153_v21 = vpop.f32.mrb[8].mxu0 }
 0xa30   : > { %v3610_v6 = vmul.f32 %v4768_v46, %v4153_v21  ;;  %v3281_v52 = vpop.f32.mrb[9].mxu0 }
 0xa31   : > { %v3608_v43 = vmul.f32 %v4770_v23, %v3281_v52  ;;  %v4154_v38 = vpop.f32.mrb[10].mxu0 }
 0xa32   : > { %3626 = vst [vmem:[%s5635_s8 + $0x50] sm:$0xff] %v3610_v6  ;;  %v3611_v8 = vmul.f32 %v4772_v9, %v4154_v38  ;;  %v3284_v28 = vpop.f32.mrb[11].mxu0 }
 0xa33   : > { %3624 = vst [vmem:[%s5635_s8 + $0x40] sm:$0xff] %v3608_v43  ;;  %v3609_v50 = vmul.f32 %v4774_v25, %v3284_v28 }
 0xa34   : > { %3627 = vst [vmem:[%s5635_s8 + $0x58] sm:$0xff] %v3611_v8 }
 0xa35   : > { %3625 = vst [vmem:[%s5635_s8 + $0x48] sm:$0xff] %v3609_v50 }
 0xa47   : > { %v4157_v49 = vpop.f32.mrb[12].mxu0 }
 0xa48   : > { %v3614_v37 = vmul.f32 %v4784_v48, %v4157_v49  ;;  %v3297_v31 = vpop.f32.mrb[13].mxu0 }
 0xa49   : > { %v3612_v44 = vmul.f32 %v4786_v56, %v3297_v31  ;;  %v4158_v19 = vpop.f32.mrb[14].mxu0 }
 0xa4a   : > { %3630 = vst [vmem:[%s5635_s8 + $0x70] sm:$0xff] %v3614_v37  ;;  %v3615_v55 = vmul.f32 %v4788_v59, %v4158_v19  ;;  %v3300_v1 = vpop.f32.mrb[15].mxu0 }
 0xa4b   : > { %3628 = vst [vmem:[%s5635_s8 + $0x60] sm:$0xff] %v3612_v44  ;;  %v3613_v24 = vmul.f32 %v4790_v45, %v3300_v1 }
 0xa4c   : > { %3631 = vst [vmem:[%s5635_s8 + $0x78] sm:$0xff] %v3615_v55 }
 0xa4d   : > { %3629 = vst [vmem:[%s5635_s8 + $0x68] sm:$0xff] %v3613_v24 }
 0xa4e PF: > { %s7098_s27 = sld [smem:[#allocation28_spill]]  ;;  %s3646_s14 = sshll.u32 %s5635_s8, 4  ;;  %s6926_s14 = int_to_ptr.vmem [resolvable:$true] %s3646_s14 }
 0xa4f   : > { %s7099_s3 = sld [smem:[#allocation48_spill]]  ;;  %s3633_s20 = scalar_lea.sflag [#allocation9], %s5595_s29 }
 0xa50   : > { %s4993_s7 = scalar_lea.vmem %s6926_s14, 2048  ;;  %p7100_p11 = scmp.ne.s32.totalorder %s7072_s28, 0 }
 0xa51   : > { %p4994_p5 = scmp.ne.s32.totalorder %s6926_s14, %s4993_s7  ;;  %s5153_s15 = smov [#allocation19]  }
 0xa52   : > { %s4997_s1 = sshll.u32 %s5153_s15, 4  ;;  %s4998_s1 = int_to_ptr.vmem [resolvable:$false] %s4997_s1 }
 0xa53   : > { %p4995_p9 = pnand %p4994_p5, %p7100_p11  ;;  %s4999_s18 = scalar_lea.vmem %s4998_s1, 4096 }
 0xa54   : > { %s3998_s30 = sshll.u32 %s7098_s27, 11  ;;  %p5000_p7 = scmp.lt.s32.totalorder %s6926_s14, %s4998_s1 }
 0xa55   : > { %s6923_s11 = scalar_lea.hbm %s7099_s3, %s3998_s30  ;;  %p4996_p3 = pneg %p4995_p9 }
 0xa56   : > { %p5001_p8 = scmp.lt.s32.totalorder %s4999_s18, %s4993_s7 }
 0xa58   : > { %p5002_p10 = por %p5001_p8, %p5000_p7 }
 0xa5a   : > { %p5003_p2 = pnand %p5002_p10, %p4996_p3 }
 0xa5c   : > { %5006 = shalt.err (!%p5003_p2)
}
 0xa5d   : > { %s5007_s8 = scalar_lea.hbm %s6923_s11, 2048  ;;  %s5011_s6 = scalar_lea.hbm %s7099_s3, 4096 }
 0xa5e   : > { %p5008_p12 = scmp.ne.s32.totalorder %s6923_s11, %s5007_s8  ;;  %p5012_p0 = scmp.lt.u32.totalorder %s6923_s11, %s7099_s3 }
 0xa5f   : > { %p5013_p1 = scmp.lt.u32.totalorder %s5011_s6, %s5007_s8  ;;  %p5015_p5 = scmp.lt.u32.totalorder %s5007_s8, %s6923_s11 }
 0xa60   : > { %p5009_p6 = pnand %p5008_p12, %p7100_p11 }
 0xa61   : > { %p5014_p4 = por %p5013_p1, %p5012_p0 }
 0xa62   : > { %p5010_p13 = pneg %p5009_p6 }
 0xa63   : > { %p5016_p9 = por %p5015_p5, %p5014_p4 }
 0xa65   : > { %p5017_p3 = pnand %p5016_p9, %p5010_p13 }
 0xa67   : > { %5020 = shalt.err (!%p5017_p3)
}
 0xa68   : > { %s5154_s22 = smov 128   ;;  %s5155_s2 = smov 8  }
 0xa69   : > { %4237 = dma.vmem_to_hbm [thread:$0]  (%p7100_p11), %s6926_s14, 2048, %s6923_s11, %s3633_s20, %s5154_s22, %s5154_s22, %s5155_s2  }
 0xa6a PF: > { %p4275_p7 = scmp.ge.s32.totalorder %s5131_s13, 2  ;;  %s3661_s27 = sand.u32 1, %s5103_s24  }
 0xa6b   : > { %p7101_p8 = scmp.ne.s32.totalorder %s7075_s19, 0  ;;  %s3662_s30 = scalar_lea.sflag [#allocation9], %s3661_s27 }
 0xa6d   : > { %p4263_p10 = pnand %p4275_p7, %p7101_p8 }
 0xa6f   : > { %5086 = dma.done.wait (!%p4263_p10), %s3662_s30, 2048  }
 0xa70   : > { %5088 = vsyncadd (!%p4263_p10), %s3662_s30, 4294965248  ;;  %s33_s13 = sadd.s32 1, %s5131_s13   ;;  %s7102_s21 = sld [smem:[#allocation26_spill]] }
 0xa71   : > { %p30_p2 = scmp.ge.s32.totalorder %s33_s13, 10   ;;  %s7103_s28 = sld [smem:[#allocation35_spill]] }
 0xa72   : > { %s7104_s27 = sld [smem:[#allocation29_spill]]  ;;  %s7105_s29 = sld [smem:[#allocation30_spill]] }
 0xa73   : > { %s7106_s12 = sld [smem:[#allocation32_spill]]  ;;  %s7107_s30 = sld [smem:[#allocation33_spill]] }
 0xa74   : > { %s7108_s22 = smov %s5099_s23  ;;  %s7109_s23 = smov %s5388_s4 }
 0xa75   : > { %s7110_s24 = smov %s5107_s25  ;;  %s7111_s25 = smov %s5111_s26 }
 0xa76   :  { %32 = sbr.rel (!%p30_p2) target bundleno = 27 (0x1b), region = 180 }
 0xa77   : > { %s7112_s26 = smov %s7103_s28 }
 0xa78   : > { %s7113_s28 = smov %s7105_s29 }
 0xa79   : > { %s7114_s29 = smov %s7106_s12 }
 0xa7d   :  { %3667 = vsyncpa [#allocation8], 1 }
 0xa7e   :  { %3669 = vsyncpa [#allocation8 + $0x1], 1 }
 0xa7f   :  { %3670 = vsyncpa [#allocation11], 1 }
 0xa80   :  { %3672 = vsyncpa [#allocation11 + $0x1], 1 }
 0xa81   :  { %3673 = vsyncpa [#allocation14], 1 }
 0xa82   :  { %3674 = vsyncpa [#allocation17], 1 }
 0xa83   :  { %3675 = vsyncpa [#allocation9], 1 }
 0xa84   :  { %3677 = vsyncpa [#allocation9 + $0x1], 1 }

</bundles_post_ra>
